<compile_context>
chip_gen: v6e
topology: v6e:2x2x1
jax: 0.10.0
libtpu: 0.0.40
codegen_flags: <defaults>
</compile_context>

<pallas_src>
import functools

import jax
import jax.numpy as jnp
from jax.experimental import pallas as pl
from jax.experimental.pallas import tpu as pltpu

LANE = 128     # vreg lane width (last dim)
SUBLANE = 8    # vreg sublane width for f32 (second-to-last dim)


def _ceil_to(v, m):
    return ((v + m - 1) // m) * m


# ---------------------------------------------------------------------------
# Fully fused forward kernel.  Single invocation (no grid): every pre-padded
# weight is VMEM-resident, all activations stay in vregs/VMEM.
# Ref layout: x, (We_i, be_i)*n_enc, Wg, bg, (Wq_i, bq_i)*n_q,  q_out, h_out, c_out
# ---------------------------------------------------------------------------
def _dqnr_fused_kernel(*refs, n_enc, n_q, hidden_pad):
    it = iter(refs)
    x_ref = next(it)
    enc = [(next(it), next(it)) for _ in range(n_enc)]
    wg_ref, bg_ref = next(it), next(it)
    qnet = [(next(it), next(it)) for _ in range(n_q)]
    q_ref, h_ref, c_ref = next(it), next(it), next(it)

    f32 = jnp.float32

    # --- Encoder MLP: ReLU after every layer (activation_on_output=True). ---
    h = x_ref[...]
    for w_ref, b_ref in enc:
        h = jnp.dot(h, w_ref[...], preferred_element_type=f32) + b_ref[...]
        h = jnp.maximum(h, 0.0)

    # --- LSTM cell with zero initial state (self.state is None). ------------
    # h_prev == 0  =>  the recurrent matmul vanishes; b_ih + b_hh were summed
    # at pack time.  Gate columns were re-laid out so each gate owns a
    # 128-lane-aligned slab of width Hp; padded lanes are zero => padded h/c
    # lanes come out exactly zero (sigmoid(0)*tanh(0) = 0).
    gates = jnp.dot(h, wg_ref[...], preferred_element_type=f32) + bg_ref[...]
    Hp = hidden_pad
    i_gate = jax.nn.sigmoid(gates[:, 0 * Hp:1 * Hp])
    # forget gate skipped: f * c_prev == 0 exactly (zero initial cell state)
    g_gate = jnp.tanh(gates[:, 2 * Hp:3 * Hp])
    o_gate = jax.nn.sigmoid(gates[:, 3 * Hp:4 * Hp])
    c_new = i_gate * g_gate                       # = f*c_prev + i*g, c_prev=0
    h_new = o_gate * jnp.tanh(c_new)
    h_ref[...] = h_new.astype(h_ref.dtype)
    c_ref[...] = c_new.astype(c_ref.dtype)        # cell state kept in f32

    # --- Q_Net: three plain linear layers (no activation). ------------------
    q = h_new
    for w_ref, b_ref in qnet:
        q = jnp.dot(q, w_ref[...], preferred_element_type=f32) + b_ref[...]
    q_ref[...] = q.astype(q_ref.dtype)


# ---------------------------------------------------------------------------
# Parameter init (raw, PyTorch-equivalent) and one-time packing (pre-padding).
# ---------------------------------------------------------------------------
def _linear_init(key, fan_in, fan_out, dtype):
    kw, kb = jax.random.split(key)
    bound = 1.0 / (fan_in ** 0.5)
    w = jax.random.uniform(kw, (fan_in, fan_out), dtype, -bound, bound)
    b = jax.random.uniform(kb, (fan_out,), dtype, -bound, bound)
    return w, b


def init_dqnr_params(key, in_features, mlp_units, num_actions,
                     dtype=jnp.float32):
    """Raw (unpadded) parameters mirroring the PyTorch module layout."""
    if isinstance(mlp_units, int):
        mlp_units = (mlp_units,)
    q_units = (1024, 512, num_actions)           # Q_Net: MLP(H, (1024,512,A))
    keys = iter(jax.random.split(key, len(mlp_units) + 1 + len(q_units)))

    encoder = []
    prev = in_features
    for units in mlp_units:
        encoder.append(_linear_init(next(keys), prev, units, dtype))
        prev = units
    hidden = prev

    bound = 1.0 / (hidden ** 0.5)
    k1, k2, k3, k4 = jax.random.split(next(keys), 4)
    lstm = dict(
        w_ih_t=jax.random.uniform(k1, (hidden, 4 * hidden), dtype, -bound, bound),
        w_hh_t=jax.random.uniform(k2, (hidden, 4 * hidden), dtype, -bound, bound),
        b_ih=jax.random.uniform(k3, (4 * hidden,), dtype, -bound, bound),
        b_hh=jax.random.uniform(k4, (4 * hidden,), dtype, -bound, bound),
    )

    q_net = []
    prev = hidden
    for units in q_units:
        q_net.append(_linear_init(next(keys), prev, units, dtype))
        prev = units

    return dict(encoder=encoder, lstm=lstm, q_net=q_net,
                in_features=in_features, hidden=hidden,
                num_actions=num_actions)


def _pad_linear(w, b):
    kp = _ceil_to(w.shape[0], LANE)
    np_ = _ceil_to(w.shape[1], LANE)
    wp = jnp.pad(w, ((0, kp - w.shape[0]), (0, np_ - w.shape[1])))
    bp = jnp.pad(b, (0, np_ - b.shape[0])).reshape(1, np_)
    return wp, bp


def pack_dqnr_params(raw):
    """One-time pre-padding / re-layout of the weights for the fused kernel."""
    in_features = raw["in_features"]
    hidden = raw["hidden"]
    num_actions = raw["num_actions"]
    dtype = raw["encoder"][0][0].dtype

    enc = [_pad_linear(w, b) for w, b in raw["encoder"]]

    hp = _ceil_to(hidden, LANE)
    kp = _ceil_to(hidden, LANE)                  # gate matmul K = encoder out
    w_ih_t = raw["lstm"]["w_ih_t"]
    b_sum = raw["lstm"]["b_ih"] + raw["lstm"]["b_hh"]
    gate_w = jnp.zeros((kp, 4 * hp), dtype)
    gate_b = jnp.zeros((1, 4 * hp), dtype)
    for g in range(4):                           # PyTorch gate order: i, f, g, o
        gate_w = gate_w.at[:hidden, g * hp:g * hp + hidden].set(
            w_ih_t[:, g * hidden:(g + 1) * hidden])
        gate_b = gate_b.at[0, g * hp:g * hp + hidden].set(
            b_sum[g * hidden:(g + 1) * hidden])
    # TODO(synk): w_hh_t is not packed because the module is exercised with a
    # zero initial state (self.state is None); add it as a second K-block of
    # the gate matmul if persistent recurrent state is ever carried in.

    q_net = [_pad_linear(w, b) for w, b in raw["q_net"]]

    return dict(dtype=dtype,
                in_features=in_features, Fp=_ceil_to(in_features, LANE),
                hidden=hidden, Hp=hp,
                num_actions=num_actions, Ap=_ceil_to(num_actions, LANE),
                enc=enc, gate_w=gate_w, gate_b=gate_b, q=q_net)


# ---------------------------------------------------------------------------
# Forward pass
# ---------------------------------------------------------------------------
def dqnr_forward(packed, x, mask=None):
    """DQNR.forward: encoder MLP -> LSTMCell (zero initial state) -> Q_Net.

    Returns (q, state); state has the _state_reshape_out layout
    (B, n_agents, 2*H) = [h | c].
    """
    del mask  # unused by DQNR.forward, kept for signature parity
    dtype = packed["dtype"]
    B, A, F = x.shape
    assert F == packed["in_features"]
    M = B * A
    Mp = max(_ceil_to(M, SUBLANE), SUBLANE)
    Fp, Hp, Ap = packed["Fp"], packed["Hp"], packed["Ap"]
    H, n_act = packed["hidden"], packed["num_actions"]

    xf = jnp.asarray(x, dtype).reshape(M, F)
    xp = jnp.pad(xf, ((0, Mp - M), (0, Fp - F)))   # only the tiny input is padded per call

    args = [xp]
    for w, b in packed["enc"]:
        args += [w, b]
    args += [packed["gate_w"], packed["gate_b"]]
    for w, b in packed["q"]:
        args += [w, b]

    n_enc, n_q = len(packed["enc"]), len(packed["q"])
    kernel = functools.partial(_dqnr_fused_kernel,
                               n_enc=n_enc, n_q=n_q, hidden_pad=Hp)

    weights = ([w for w, _ in packed["enc"]] + [packed["gate_w"]]
               + [w for w, _ in packed["q"]])
    flops = sum(2 * Mp * w.shape[0] * w.shape[1] for w in weights)
    itemsize = jnp.dtype(dtype).itemsize
    bytes_accessed = (sum(int(a.size) * a.dtype.itemsize for a in args)
                      + (Mp * Ap + 2 * Mp * Hp) * itemsize)

    vmem_spec = pl.BlockSpec(memory_space=pltpu.MemorySpace.VMEM)
    q_pad, h_pad, c_pad = pl.pallas_call(
        kernel,
        out_shape=(jax.ShapeDtypeStruct((Mp, Ap), dtype),
                   jax.ShapeDtypeStruct((Mp, Hp), dtype),
                   jax.ShapeDtypeStruct((Mp, Hp), dtype)),
        in_specs=[vmem_spec] * len(args),
        out_specs=(vmem_spec, vmem_spec, vmem_spec),
        cost_estimate=pl.CostEstimate(flops=flops,
                                      transcendentals=4 * Mp * Hp,
                                      bytes_accessed=bytes_accessed),
    )(*args)

    q = q_pad[:M, :n_act].reshape(B, A, n_act)
    # TODO(synk): the PyTorch module keeps self.state across calls; returned
    # functionally here instead.
    state = jnp.concatenate([h_pad[:M, :H], c_pad[:M, :H]],
                            axis=-1).reshape(B, A, 2 * H)
    return q, state


# ---------------------------------------------------------------------------
# Pure-JAX reference (mirrors the PyTorch module) for validation
# ---------------------------------------------------------------------------
def dqnr_reference(raw, x):
    B, A, F = x.shape
    h = x.reshape(B * A, F)
    for w, b in raw["encoder"]:
        h = jax.nn.relu(h @ w + b)

    H = raw["hidden"]
    M = h.shape[0]
    h_prev = jnp.zeros((M, H), h.dtype)
    c_prev = jnp.zeros((M, H), h.dtype)
    gates = (h @ raw["lstm"]["w_ih_t"] + raw["lstm"]["b_ih"]
             + h_prev @ raw["lstm"]["w_hh_t"] + raw["lstm"]["b_hh"])
    i_g, f_g, g_g, o_g = jnp.split(gates, 4, axis=1)
    c_new = jax.nn.sigmoid(f_g) * c_prev + jax.nn.sigmoid(i_g) * jnp.tanh(g_g)
    h_new = jax.nn.sigmoid(o_g) * jnp.tanh(c_new)
    state = jnp.concatenate([h_new, c_new], axis=-1).reshape(B, A, 2 * H)

    q = h_new
    for w, b in raw["q_net"]:
        q = q @ w + b
    return q.reshape(B, A, -1), state


if __name__ == "__main__":
    key = jax.random.PRNGKey(0)
    kparam, kx = jax.random.split(key)

    B, A = 2, 4                 # batch, n_agents  ->  M = B*A = 8 rows
    in_features = 32
    mlp_units = (64, 32)        # encoder -> hidden size 32
    num_actions = 4

    raw = init_dqnr_params(kparam, in_features, mlp_units, num_actions)
    packed = pack_dqnr_params(raw)              # one-time weight pre-padding

    x = jax.random.normal(kx, (B, A, in_features), dtype=jnp.float32)
    mask = jnp.ones((B, A), dtype=jnp.float32)  # unused, matches forward(x, mask)

    q, state = dqnr_forward(packed, x, mask)
    q = jax.block_until_ready(q)
    state = jax.block_until_ready(state)

    q_ref, state_ref = dqnr_reference(raw, x)
    ok = bool(jnp.allclose(q, q_ref, atol=1e-3, rtol=1e-3)
              and jnp.allclose(state, state_ref, atol=1e-3, rtol=1e-3))
    if ok:
        print("KERNEL_OK")
    else:
        print("MISMATCH: max |dq| =", float(jnp.max(jnp.abs(q - q_ref))),
              "max |dstate| =", float(jnp.max(jnp.abs(state - state_ref))))
</pallas_src>

<mosaic_0001>
module attributes {stable_mosaic.version = 11 : i64} {
  func.func @_dqnr_fused_kernel(%arg0: memref<8x128xf32, #tpu.memory_space<vmem>>, %arg1: memref<128x128xf32, #tpu.memory_space<vmem>>, %arg2: memref<1x128xf32, #tpu.memory_space<vmem>>, %arg3: memref<128x128xf32, #tpu.memory_space<vmem>>, %arg4: memref<1x128xf32, #tpu.memory_space<vmem>>, %arg5: memref<128x512xf32, #tpu.memory_space<vmem>>, %arg6: memref<1x512xf32, #tpu.memory_space<vmem>>, %arg7: memref<128x1024xf32, #tpu.memory_space<vmem>>, %arg8: memref<1x1024xf32, #tpu.memory_space<vmem>>, %arg9: memref<1024x512xf32, #tpu.memory_space<vmem>>, %arg10: memref<1x512xf32, #tpu.memory_space<vmem>>, %arg11: memref<512x128xf32, #tpu.memory_space<vmem>>, %arg12: memref<1x128xf32, #tpu.memory_space<vmem>>, %arg13: memref<8x128xf32, #tpu.memory_space<vmem>>, %arg14: memref<8x128xf32, #tpu.memory_space<vmem>>, %arg15: memref<8x128xf32, #tpu.memory_space<vmem>>) attributes {dimension_semantics = [], scalar_prefetch = 0 : i64, scratch_operands = 0 : i64, tpu.core_type = #tpu.core_type<tc>} {
    %c0 = arith.constant 0 : index
    %c0_0 = arith.constant 0 : index
    %0 = vector.load %arg0[%c0, %c0_0] : memref<8x128xf32, #tpu.memory_space<vmem>>, vector<8x128xf32>
    %c0_1 = arith.constant 0 : index
    %c0_2 = arith.constant 0 : index
    %1 = vector.load %arg1[%c0_1, %c0_2] : memref<128x128xf32, #tpu.memory_space<vmem>>, vector<128x128xf32>
    %cst = arith.constant dense<0.000000e+00> : vector<8x128xf32>
    %2 = tpu.matmul %0, %1, %cst {dimension_numbers = #tpu.dot_dimension_numbers<[1], [0], [0], [1], [0, 0, 1, 1], [], []>} : vector<8x128xf32>, vector<128x128xf32>, vector<8x128xf32> -> vector<8x128xf32>
    %c0_3 = arith.constant 0 : index
    %c0_4 = arith.constant 0 : index
    %3 = vector.load %arg2[%c0_3, %c0_4] : memref<1x128xf32, #tpu.memory_space<vmem>>, vector<1x128xf32>
    %4 = vector.broadcast %3 : vector<1x128xf32> to vector<8x128xf32>
    %5 = arith.addf %2, %4 : vector<8x128xf32>
    %cst_5 = arith.constant 0.000000e+00 : f32
    %6 = vector.broadcast %cst_5 : f32 to vector<8x128xf32>
    %7 = arith.maximumf %5, %6 : vector<8x128xf32>
    %c0_6 = arith.constant 0 : index
    %c0_7 = arith.constant 0 : index
    %8 = vector.load %arg3[%c0_6, %c0_7] : memref<128x128xf32, #tpu.memory_space<vmem>>, vector<128x128xf32>
    %cst_8 = arith.constant dense<0.000000e+00> : vector<8x128xf32>
    %9 = tpu.matmul %7, %8, %cst_8 {dimension_numbers = #tpu.dot_dimension_numbers<[1], [0], [0], [1], [0, 0, 1, 1], [], []>} : vector<8x128xf32>, vector<128x128xf32>, vector<8x128xf32> -> vector<8x128xf32>
    %c0_9 = arith.constant 0 : index
    %c0_10 = arith.constant 0 : index
    %10 = vector.load %arg4[%c0_9, %c0_10] : memref<1x128xf32, #tpu.memory_space<vmem>>, vector<1x128xf32>
    %11 = vector.broadcast %10 : vector<1x128xf32> to vector<8x128xf32>
    %12 = arith.addf %9, %11 : vector<8x128xf32>
    %cst_11 = arith.constant 0.000000e+00 : f32
    %13 = vector.broadcast %cst_11 : f32 to vector<8x128xf32>
    %14 = arith.maximumf %12, %13 : vector<8x128xf32>
    %c0_12 = arith.constant 0 : index
    %c0_13 = arith.constant 0 : index
    %15 = vector.load %arg5[%c0_12, %c0_13] : memref<128x512xf32, #tpu.memory_space<vmem>>, vector<128x512xf32>
    %cst_14 = arith.constant dense<0.000000e+00> : vector<8x512xf32>
    %16 = tpu.matmul %14, %15, %cst_14 {dimension_numbers = #tpu.dot_dimension_numbers<[1], [0], [0], [1], [0, 0, 1, 1], [], []>} : vector<8x128xf32>, vector<128x512xf32>, vector<8x512xf32> -> vector<8x512xf32>
    %c0_15 = arith.constant 0 : index
    %c0_16 = arith.constant 0 : index
    %17 = vector.load %arg6[%c0_15, %c0_16] : memref<1x512xf32, #tpu.memory_space<vmem>>, vector<1x512xf32>
    %18 = vector.broadcast %17 : vector<1x512xf32> to vector<8x512xf32>
    %19 = arith.addf %16, %18 : vector<8x512xf32>
    %20 = vector.extract_strided_slice %19 {offsets = [0, 0], sizes = [8, 128], strides = [1, 1]} : vector<8x512xf32> to vector<8x128xf32>
    %21 = arith.negf %20 : vector<8x128xf32>
    %22 = math.exp %21 : vector<8x128xf32>
    %cst_17 = arith.constant 1.000000e+00 : f32
    %23 = vector.broadcast %cst_17 : f32 to vector<8x128xf32>
    %24 = arith.addf %23, %22 : vector<8x128xf32>
    %25 = arith.divf %23, %24 : vector<8x128xf32>
    %26 = vector.extract_strided_slice %19 {offsets = [0, 256], sizes = [8, 128], strides = [1, 1]} : vector<8x512xf32> to vector<8x128xf32>
    %27 = math.tanh %26 : vector<8x128xf32>
    %28 = vector.extract_strided_slice %19 {offsets = [0, 384], sizes = [8, 128], strides = [1, 1]} : vector<8x512xf32> to vector<8x128xf32>
    %29 = arith.negf %28 : vector<8x128xf32>
    %30 = math.exp %29 : vector<8x128xf32>
    %cst_18 = arith.constant 1.000000e+00 : f32
    %31 = vector.broadcast %cst_18 : f32 to vector<8x128xf32>
    %32 = arith.addf %31, %30 : vector<8x128xf32>
    %33 = arith.divf %31, %32 : vector<8x128xf32>
    %34 = arith.mulf %25, %27 : vector<8x128xf32>
    %35 = math.tanh %34 : vector<8x128xf32>
    %36 = arith.mulf %33, %35 : vector<8x128xf32>
    %c0_19 = arith.constant 0 : index
    %c0_20 = arith.constant 0 : index
    %37 = vector.load %arg14[%c0_19, %c0_20] : memref<8x128xf32, #tpu.memory_space<vmem>>, vector<8x128xf32>
    tpu.vector_store %arg14[%c0_19, %c0_20], %36 {strides = array<i32>} : memref<8x128xf32, #tpu.memory_space<vmem>>, vector<8x128xf32>,
    %c0_21 = arith.constant 0 : index
    %c0_22 = arith.constant 0 : index
    %38 = vector.load %arg15[%c0_21, %c0_22] : memref<8x128xf32, #tpu.memory_space<vmem>>, vector<8x128xf32>
    tpu.vector_store %arg15[%c0_21, %c0_22], %34 {strides = array<i32>} : memref<8x128xf32, #tpu.memory_space<vmem>>, vector<8x128xf32>,
    %c0_23 = arith.constant 0 : index
    %c0_24 = arith.constant 0 : index
    %39 = vector.load %arg7[%c0_23, %c0_24] : memref<128x1024xf32, #tpu.memory_space<vmem>>, vector<128x1024xf32>
    %cst_25 = arith.constant dense<0.000000e+00> : vector<8x1024xf32>
    %40 = tpu.matmul %36, %39, %cst_25 {dimension_numbers = #tpu.dot_dimension_numbers<[1], [0], [0], [1], [0, 0, 1, 1], [], []>} : vector<8x128xf32>, vector<128x1024xf32>, vector<8x1024xf32> -> vector<8x1024xf32>
    %c0_26 = arith.constant 0 : index
    %c0_27 = arith.constant 0 : index
    %41 = vector.load %arg8[%c0_26, %c0_27] : memref<1x1024xf32, #tpu.memory_space<vmem>>, vector<1x1024xf32>
    %42 = vector.broadcast %41 : vector<1x1024xf32> to vector<8x1024xf32>
    %43 = arith.addf %40, %42 : vector<8x1024xf32>
    %c0_28 = arith.constant 0 : index
    %c0_29 = arith.constant 0 : index
    %44 = vector.load %arg9[%c0_28, %c0_29] : memref<1024x512xf32, #tpu.memory_space<vmem>>, vector<1024x512xf32>
    %cst_30 = arith.constant dense<0.000000e+00> : vector<8x512xf32>
    %45 = tpu.matmul %43, %44, %cst_30 {dimension_numbers = #tpu.dot_dimension_numbers<[1], [0], [0], [1], [0, 0, 1, 1], [], []>} : vector<8x1024xf32>, vector<1024x512xf32>, vector<8x512xf32> -> vector<8x512xf32>
    %c0_31 = arith.constant 0 : index
    %c0_32 = arith.constant 0 : index
    %46 = vector.load %arg10[%c0_31, %c0_32] : memref<1x512xf32, #tpu.memory_space<vmem>>, vector<1x512xf32>
    %47 = vector.broadcast %46 : vector<1x512xf32> to vector<8x512xf32>
    %48 = arith.addf %45, %47 : vector<8x512xf32>
    %c0_33 = arith.constant 0 : index
    %c0_34 = arith.constant 0 : index
    %49 = vector.load %arg11[%c0_33, %c0_34] : memref<512x128xf32, #tpu.memory_space<vmem>>, vector<512x128xf32>
    %cst_35 = arith.constant dense<0.000000e+00> : vector<8x128xf32>
    %50 = tpu.matmul %48, %49, %cst_35 {dimension_numbers = #tpu.dot_dimension_numbers<[1], [0], [0], [1], [0, 0, 1, 1], [], []>} : vector<8x512xf32>, vector<512x128xf32>, vector<8x128xf32> -> vector<8x128xf32>
    %c0_36 = arith.constant 0 : index
    %c0_37 = arith.constant 0 : index
    %51 = vector.load %arg12[%c0_36, %c0_37] : memref<1x128xf32, #tpu.memory_space<vmem>>, vector<1x128xf32>
    %52 = vector.broadcast %51 : vector<1x128xf32> to vector<8x128xf32>
    %53 = arith.addf %50, %52 : vector<8x128xf32>
    %c0_38 = arith.constant 0 : index
    %c0_39 = arith.constant 0 : index
    %54 = vector.load %arg13[%c0_38, %c0_39] : memref<8x128xf32, #tpu.memory_space<vmem>>, vector<8x128xf32>
    tpu.vector_store %arg13[%c0_38, %c0_39], %53 {strides = array<i32>} : memref<8x128xf32, #tpu.memory_space<vmem>>, vector<8x128xf32>,
    return
  }
}

</mosaic_0001>

<bundles_post_ra>
// kernel: tpu_custom_call.1
= control target key start
LH: loop header
LB: loop body
LE: loop exit
PB: predicated region body
PF: predicated region fallthrough
CT: control target
= control target key end

     0   :  { %21 = vsyncpa [#allocation3], 0  ;;  %s3300_s0 = inlined_call_operand.hbm [shape: f32[8,128], index: 0, kind: input, shape index: {}]   ;;  %s3301_s1 = inlined_call_operand.hbm [shape: f32[128,128], index: 1, kind: input, shape index: {}]   ;;  %s3302_s2 = inlined_call_operand.hbm [shape: f32[1,128], index: 2, kind: input, shape index: {}]   ;;  %s3303_s3 = inlined_call_operand.hbm [shape: f32[128,128], index: 3, kind: input, shape index: {}]   ;;  %s3304_s4 = inlined_call_operand.hbm [shape: f32[1,128], index: 4, kind: input, shape index: {}]   ;;  %s3305_s5 = inlined_call_operand.hbm [shape: f32[128,512], index: 5, kind: input, shape index: {}]   ;;  %s3306_s6 = inlined_call_operand.hbm [shape: f32[1,512], index: 6, kind: input, shape index: {}]   ;;  %s3307_s7 = inlined_call_operand.hbm [shape: f32[128,1024], index: 7, kind: input, shape index: {}]   ;;  %s3308_s8 = inlined_call_operand.hbm [shape: f32[1,1024], index: 8, kind: input, shape index: {}]   ;;  %s3309_s9 = inlined_call_operand.hbm [shape: f32[1024,512], index: 9, kind: input, shape index: {}]   ;;  %s3310_s10 = inlined_call_operand.hbm [shape: f32[1,512], index: 10, kind: input, shape index: {}]   ;;  %s3311_s11 = inlined_call_operand.hbm [shape: f32[512,128], index: 11, kind: input, shape index: {}]   ;;  %s3312_s12 = inlined_call_operand.hbm [shape: f32[1,128], index: 12, kind: input, shape index: {}]   ;;  %s3313_s13 = inlined_call_operand.hbm [shape: f32[8,128], index: 13, kind: output, shape index: {0}]   ;;  %s3314_s14 = inlined_call_operand.hbm [shape: f32[8,128], index: 14, kind: output, shape index: {1}]   ;;  %s3315_s15 = inlined_call_operand.hbm [shape: f32[8,128], index: 15, kind: output, shape index: {2}]  }
   0x1   :  { %22 = vsyncpa [#allocation6], 0 }
   0x2   :  { %23 = vsyncpa [#allocation9], 0 }
   0x3   :  { %24 = vsyncpa [#allocation12], 0 }
   0x4   :  { %25 = vsyncpa [#allocation15], 0 }
   0x5   :  { %26 = vsyncpa [#allocation18], 0 }
   0x6   :  { %27 = vsyncpa [#allocation21], 0 }
   0x7   :  { %28 = vsyncpa [#allocation4], 0 }
   0x8   :  { %29 = vsyncpa [#allocation25], 0  ;;  %s3009_s18 = smov [#allocation5]  }
   0x9   :  { %s45_s19 = sshll.u32 %s3009_s18, 4  ;;  %s46_s19 = int_to_ptr.vmem [resolvable:$true] %s45_s19 }
   0xa   :  { %s2679_s20 = scalar_lea.vmem %s46_s19, 2048  ;;  %p2684_p1 = scmp.lt.s32.totalorder %s46_s19, %s46_s19 }
   0xb   :  { %p2680_p0 = scmp.ne.s32.totalorder %s46_s19, %s2679_s20  ;;  %p2685_p2 = scmp.lt.s32.totalorder %s2679_s20, %s2679_s20 }
   0xd   :  { %p2686_p3 = por %p2685_p2, %p2684_p1 }
   0xf   :  { %p2687_p4 = pnand %p2686_p3, %p2680_p0 }
  0x11   :  { %2690 = shalt.err (!%p2687_p4)
}
  0x12   :  { %s3010_s21 = smov 128   ;;  %s3011_s22 = smov 8  }
  0x13   :  { %51 = dma.hbm_to_vmem [thread:$0]  %s3301_s1, 2048, %s46_s19, [#allocation6], %s3010_s21, %s3010_s21, %s3011_s22  }
  0x14   :  { %s3012_s25 = smov [#allocation8]   ;;  %s3013_s27 = smov [#allocation11]  }
  0x15   :  { %s67_s26 = sshll.u32 %s3012_s25, 4  ;;  %s89_s28 = sshll.u32 %s3013_s27, 4  ;;  %s68_s26 = int_to_ptr.vmem [resolvable:$true] %s67_s26  ;;  %s90_s28 = int_to_ptr.vmem [resolvable:$true] %s89_s28 }
  0x16   :  { %s2699_s29 = scalar_lea.vmem %s68_s26, 2048  ;;  %p2704_p6 = scmp.lt.s32.totalorder %s68_s26, %s68_s26 }
  0x17   :  { %p2700_p5 = scmp.ne.s32.totalorder %s68_s26, %s2699_s29  ;;  %p2705_p7 = scmp.lt.s32.totalorder %s2699_s29, %s2699_s29 }
  0x19   :  { %p2706_p8 = por %p2705_p7, %p2704_p6 }
  0x1b   :  { %p2707_p9 = pnand %p2706_p8, %p2700_p5 }
  0x1d   :  { %2710 = shalt.err (!%p2707_p9)
}
  0x1e   :  { %73 = dma.hbm_to_vmem [thread:$0]  %s3303_s3, 2048, %s68_s26, [#allocation9], %s3010_s21, %s3010_s21, %s3011_s22  }
  0x1f   :  { %s2719_s1 = scalar_lea.vmem %s90_s28, 8192  ;;  %p2724_p11 = scmp.lt.s32.totalorder %s90_s28, %s90_s28 }
  0x20   :  { %p2720_p10 = scmp.ne.s32.totalorder %s90_s28, %s2719_s1  ;;  %p2725_p12 = scmp.lt.s32.totalorder %s2719_s1, %s2719_s1 }
  0x22   :  { %p2726_p13 = por %p2725_p12, %p2724_p11 }
  0x24   :  { %p2727_p0 = pnand %p2726_p13, %p2720_p10 }
  0x26   :  { %2730 = shalt.err (!%p2727_p0)
}
  0x27   :  { %s3014_s17 = smov 512   ;;  %s3015_s18 = smov 32  }
  0x28   :  { %95 = dma.hbm_to_vmem [thread:$0]  %s3305_s5, 8192, %s90_s28, [#allocation12], %s3014_s17, %s3014_s17, %s3015_s18  }
  0x29   :  { %s3016_s23 = smov [#allocation14]  }
  0x2a   :  { %s111_s24 = sshll.u32 %s3016_s23, 4  ;;  %s112_s24 = int_to_ptr.vmem [resolvable:$true] %s111_s24 }
  0x2b   :  { %s2739_s3 = scalar_lea.vmem %s112_s24, 16384  ;;  %p2744_p2 = scmp.lt.s32.totalorder %s112_s24, %s112_s24 }
  0x2c   :  { %p2740_p1 = scmp.ne.s32.totalorder %s112_s24, %s2739_s3  ;;  %p2745_p3 = scmp.lt.s32.totalorder %s2739_s3, %s2739_s3 }
  0x2e   :  { %p2746_p4 = por %p2745_p3, %p2744_p2 }
  0x30   :  { %p2747_p5 = pnand %p2746_p4, %p2740_p1 }
  0x32   :  { %2750 = shalt.err (!%p2747_p5)
}
  0x33   :  { %s3017_s25 = smov 1024   ;;  %s3018_s26 = smov 64  }
  0x34   :  { %117 = dma.hbm_to_vmem [thread:$0]  %s3307_s7, 16384, %s112_s24, [#allocation15], %s3017_s25, %s3017_s25, %s3018_s26  }
  0x35   :  { %s3019_s30 = smov [#allocation17]   ;;  %s3020_s1 = smov [#allocation20]  }
  0x36   :  { %s133_s16 = sshll.u32 %s3019_s30, 4  ;;  %s155_s5 = sshll.u32 %s3020_s1, 4  ;;  %s134_s16 = int_to_ptr.vmem [resolvable:$true] %s133_s16  ;;  %s156_s5 = int_to_ptr.vmem [resolvable:$true] %s155_s5 }
  0x37   :  { %s2759_s28 = scalar_lea.vmem %s134_s16, 65536  ;;  %p2764_p7 = scmp.lt.s32.totalorder %s134_s16, %s134_s16 }
  0x38   :  { %p2760_p6 = scmp.ne.s32.totalorder %s134_s16, %s2759_s28  ;;  %p2765_p8 = scmp.lt.s32.totalorder %s2759_s28, %s2759_s28 }
  0x3a   :  { %p2766_p9 = por %p2765_p8, %p2764_p7 }
  0x3c   :  { %p2767_p10 = pnand %p2766_p9, %p2760_p6 }
  0x3e   :  { %2770 = shalt.err (!%p2767_p10)
}
  0x3f   :  { %139 = dma.hbm_to_vmem [thread:$0]  %s3309_s9, 65536, %s134_s16, [#allocation18], %s3014_s17, %s3014_s17, %s3015_s18  }
  0x40   :  { %s2779_s7 = scalar_lea.vmem %s156_s5, 8192  ;;  %p2784_p12 = scmp.lt.s32.totalorder %s156_s5, %s156_s5 }
  0x41   :  { %p2780_p11 = scmp.ne.s32.totalorder %s156_s5, %s2779_s7  ;;  %p2785_p13 = scmp.lt.s32.totalorder %s2779_s7, %s2779_s7 }
  0x43   :  { %p2786_p0 = por %p2785_p13, %p2784_p12 }
  0x45   :  { %p2787_p1 = pnand %p2786_p0, %p2780_p11 }
  0x47   :  { %2790 = shalt.err (!%p2787_p1)
}
  0x48   :  { %161 = dma.hbm_to_vmem [thread:$0]  %s3311_s11, 8192, %s156_s5, [#allocation21], %s3010_s21, %s3010_s21, %s3011_s22  }
  0x49   :  { %s3021_s3 = smov [#allocation2]   ;;  %s3022_s26 = smov [#allocation7]  }
  0x4a   :  { %s36_s25 = sshll.u32 %s3021_s3, 4  ;;  %s58_s27 = sshll.u32 %s3022_s26, 4  ;;  %s37_s25 = int_to_ptr.vmem [resolvable:$true] %s36_s25  ;;  %s59_s27 = int_to_ptr.vmem [resolvable:$true] %s58_s27 }
  0x4b   :  { %s2799_s9 = scalar_lea.vmem %s37_s25, 128  ;;  %p2804_p3 = scmp.lt.s32.totalorder %s37_s25, %s37_s25 }
  0x4c   :  { %p2800_p2 = scmp.ne.s32.totalorder %s37_s25, %s2799_s9  ;;  %p2805_p4 = scmp.lt.s32.totalorder %s2799_s9, %s2799_s9 }
  0x4e   :  { %p2806_p5 = por %p2805_p4, %p2804_p3 }
  0x50   :  { %p2807_p6 = pnand %p2806_p5, %p2800_p2 }
  0x52   :  { %2810 = shalt.err (!%p2807_p6)
}
  0x53   :  { %39 = dma.hbm_to_vmem [thread:$0]  %s3300_s0, 128, %s37_s25, [#allocation3]  }
  0x54   :  { %s2819_s29 = scalar_lea.vmem %s59_s27, 16  ;;  %s2823_s11 = scalar_lea.vmem %s59_s27, 32 }
  0x55   :  { %p2820_p7 = scmp.ne.s32.totalorder %s59_s27, %s2819_s29  ;;  %p2824_p8 = scmp.lt.s32.totalorder %s59_s27, %s59_s27 }
  0x56   :  { %p2825_p9 = scmp.lt.s32.totalorder %s2823_s11, %s2819_s29 }
  0x58   :  { %p2826_p10 = por %p2825_p9, %p2824_p8 }
  0x5a   :  { %p2827_p11 = pnand %p2826_p10, %p2820_p7 }
  0x5c   :  { %2830 = shalt.err (!%p2827_p11)
}
  0x5d   :  { %61 = dma.hbm_to_vmem [thread:$0]  %s3302_s2, 16, %s59_s27, [#allocation6]  }
  0x5e   :  { %s3023_s30 = smov [#allocation10]   ;;  %s3024_s1 = smov [#allocation13]  }
  0x5f   :  { %s80_s16 = sshll.u32 %s3023_s30, 4  ;;  %s102_s5 = sshll.u32 %s3024_s1, 4  ;;  %s81_s16 = int_to_ptr.vmem [resolvable:$true] %s80_s16  ;;  %s103_s5 = int_to_ptr.vmem [resolvable:$true] %s102_s5 }
  0x60   :  { %s2839_s28 = scalar_lea.vmem %s81_s16, 16  ;;  %s2843_s0 = scalar_lea.vmem %s81_s16, 32 }
  0x61   :  { %p2840_p12 = scmp.ne.s32.totalorder %s81_s16, %s2839_s28  ;;  %p2844_p13 = scmp.lt.s32.totalorder %s81_s16, %s81_s16 }
  0x62   :  { %p2845_p0 = scmp.lt.s32.totalorder %s2843_s0, %s2839_s28 }
  0x64   :  { %p2846_p1 = por %p2845_p0, %p2844_p13 }
  0x66   :  { %p2847_p2 = pnand %p2846_p1, %p2840_p12 }
  0x68   :  { %2850 = shalt.err (!%p2847_p2)
}
  0x69   :  { %83 = dma.hbm_to_vmem [thread:$0]  %s3304_s4, 16, %s81_s16, [#allocation9]  }
  0x6a   :  { %s2859_s7 = scalar_lea.vmem %s103_s5, 64  ;;  %p2864_p4 = scmp.lt.s32.totalorder %s103_s5, %s103_s5 }
  0x6b   :  { %p2860_p3 = scmp.ne.s32.totalorder %s103_s5, %s2859_s7  ;;  %p2865_p5 = scmp.lt.s32.totalorder %s2859_s7, %s2859_s7 }
  0x6d   :  { %p2866_p6 = por %p2865_p5, %p2864_p4 }
  0x6f   :  { %p2867_p7 = pnand %p2866_p6, %p2860_p3 }
  0x71   :  { %2870 = shalt.err (!%p2867_p7)
}
  0x72   :  { %105 = dma.hbm_to_vmem [thread:$0]  %s3306_s6, 64, %s103_s5, [#allocation12]  }
  0x73   :  { %s3025_s24 = smov [#allocation16]   ;;  %s3026_s25 = smov [#allocation19]  }
  0x74   :  { %s124_s3 = sshll.u32 %s3025_s24, 4  ;;  %s146_s26 = sshll.u32 %s3026_s25, 4  ;;  %s125_s3 = int_to_ptr.vmem [resolvable:$true] %s124_s3  ;;  %s147_s26 = int_to_ptr.vmem [resolvable:$true] %s146_s26 }
  0x75   :  { %s2879_s27 = scalar_lea.vmem %s125_s3, 128  ;;  %p2884_p9 = scmp.lt.s32.totalorder %s125_s3, %s125_s3 }
  0x76   :  { %p2880_p8 = scmp.ne.s32.totalorder %s125_s3, %s2879_s27  ;;  %p2885_p10 = scmp.lt.s32.totalorder %s2879_s27, %s2879_s27 }
  0x78   :  { %p2886_p11 = por %p2885_p10, %p2884_p9 }
  0x7a   :  { %p2887_p12 = pnand %p2886_p11, %p2880_p8 }
  0x7c   :  { %2890 = shalt.err (!%p2887_p12)
}
  0x7d   :  { %127 = dma.hbm_to_vmem [thread:$0]  %s3308_s8, 128, %s125_s3, [#allocation15]  }
  0x7e   :  { %s2899_s17 = scalar_lea.vmem %s147_s26, 64  ;;  %p2904_p0 = scmp.lt.s32.totalorder %s147_s26, %s147_s26 }
  0x7f   :  { %p2900_p13 = scmp.ne.s32.totalorder %s147_s26, %s2899_s17  ;;  %p2905_p1 = scmp.lt.s32.totalorder %s2899_s17, %s2899_s17 }
  0x81   :  { %p2906_p2 = por %p2905_p1, %p2904_p0 }
  0x83   :  { %p2907_p3 = pnand %p2906_p2, %p2900_p13 }
  0x85   :  { %2910 = shalt.err (!%p2907_p3)
}
  0x86   :  { %149 = dma.hbm_to_vmem [thread:$0]  %s3310_s10, 64, %s147_s26, [#allocation18]  }
  0x87   :  { %s3027_s29 = smov [#allocation22]  }
  0x88   :  { %s168_s11 = sshll.u32 %s3027_s29, 4  ;;  %s169_s11 = int_to_ptr.vmem [resolvable:$true] %s168_s11 }
  0x89   :  { %s2919_s21 = scalar_lea.vmem %s169_s11, 16  ;;  %s2923_s22 = scalar_lea.vmem %s169_s11, 32 }
  0x8a   :  { %p2920_p4 = scmp.ne.s32.totalorder %s169_s11, %s2919_s21  ;;  %p2924_p5 = scmp.lt.s32.totalorder %s169_s11, %s169_s11 }
  0x8b   :  { %p2925_p6 = scmp.lt.s32.totalorder %s2923_s22, %s2919_s21 }
  0x8d   :  { %p2926_p7 = por %p2925_p6, %p2924_p5 }
  0x8f   :  { %p2927_p8 = pnand %p2926_p7, %p2920_p4 }
  0x91   :  { %2930 = shalt.err (!%p2927_p8)
}
  0x92   :  { %171 = dma.hbm_to_vmem [thread:$0]  %s3312_s12, 16, %s169_s11, [#allocation21]  }
  0x93   :  { %2991 = dma.done.wait [#allocation3], 128  }
  0x94   :  { %2992 = vsyncadd [#allocation3], 4294967168 }
  0x95   :  { %2993 = dma.done.wait [#allocation6], 2064  }
  0x96   :  { %2994 = vsyncadd [#allocation6], 4294965232 }
  0x97   :  { %2995 = dma.done.wait [#allocation9], 2064  }
  0x98   :  { %2996 = vsyncadd [#allocation9], 4294965232 }
  0x99   :  { %2997 = dma.done.wait [#allocation12], 8256  }
  0x9a   :  { %2998 = vsyncadd [#allocation12], 4294959040 }
  0x9b   :  { %2999 = dma.done.wait [#allocation15], 16512  }
  0x9c   :  { %3000 = vsyncadd [#allocation15], 4294950784 }
  0x9d   :  { %3001 = dma.done.wait [#allocation18], 65600  }
  0x9e   :  { %3002 = vsyncadd [#allocation18], 4294901696 }
  0x9f   :  { %3003 = dma.done.wait [#allocation21], 8208  }
  0xa0   :  { %3004 = vsyncadd [#allocation21], 4294959088  ;;  %v3028_v0 = vmov 0.0   ;;  %vm3029_vm0 = vmmov 0   ;;  %v227_v1 = vld [vmem:[#allocation5 + $0x78] sm:$0xff]  ;;  %v226_v2 = vld [vmem:[#allocation5 + $0x70] sm:$0xff] }
  0xa1   :  { %2565 = vmatprep.subr.mxu0 %v3028_v0  ;;  %2597 = vmatprep.mubr.msk.f32.mxu0 %vm3029_vm0, %v3028_v0  ;;  %v225_v3 = vld [vmem:[#allocation5 + $0x68] sm:$0xff]  ;;  %v224_v4 = vld [vmem:[#allocation5 + $0x60] sm:$0xff]  ;;  %v223_v6 = vld [vmem:[#allocation5 + $0x58] sm:$0xff]  ;;  %s3030_s10 = smov [#allocation24]  }
  0xa2   :  { %2600 = vmatprep.subr.mxu1 %v3028_v0  ;;  %2632 = vmatprep.mubr.msk.f32.mxu1 %vm3029_vm0, %v3028_v0  ;;  %v321_v5 = vld [vmem:[#allocation8 + $0x78] sm:$0xff]  ;;  %v320_v7 = vld [vmem:[#allocation8 + $0x70] sm:$0xff]  ;;  %v319_v8 = vld [vmem:[#allocation8 + $0x68] sm:$0xff]  ;;  %s2424_s12 = sshll.u32 %s3030_s10, 4  ;;  %s2425_s12 = int_to_ptr.vmem [resolvable:$true] %s2424_s12 }
  0xa3   :  { %2566 = vmatpush3.msra.mxu0 %v227_v1  ;;  %2601 = vmatpush3.msra.mxu1 %v321_v5  ;;  %v222_v9 = vld [vmem:[#allocation5 + $0x50] sm:$0xff]  ;;  %v318_v10 = vld [vmem:[#allocation8 + $0x60] sm:$0xff]  ;;  %v317_v12 = vld [vmem:[#allocation8 + $0x58] sm:$0xff]  ;;  %s2931_s16 = scalar_lea.vmem %s2425_s12, 128  ;;  %p2936_p10 = scmp.lt.s32.totalorder %s2425_s12, %s2425_s12 }
  0xa4   :  { %2567 = vmatprep.subr.mxu0 %v3028_v0  ;;  %2602 = vmatprep.subr.mxu1 %v3028_v0  ;;  %v221_v11 = vld [vmem:[#allocation5 + $0x48] sm:$0xff]  ;;  %v220_v13 = vld [vmem:[#allocation5 + $0x40] sm:$0xff]  ;;  %v316_v14 = vld [vmem:[#allocation8 + $0x50] sm:$0xff]  ;;  %p2932_p9 = scmp.ne.s32.totalorder %s2425_s12, %s2931_s16  ;;  %p2937_p11 = scmp.lt.s32.totalorder %s2931_s16, %s2931_s16 }
  0xa5   :  { %2568 = vmatpush3.msra.mxu0 %v226_v2  ;;  %2603 = vmatpush3.msra.mxu1 %v320_v7  ;;  %v219_v15 = vld [vmem:[#allocation5 + $0x38] sm:$0xff]  ;;  %v315_v16 = vld [vmem:[#allocation8 + $0x48] sm:$0xff]  ;;  %v314_v18 = vld [vmem:[#allocation8 + $0x40] sm:$0xff] }
  0xa6   :  { %2569 = vmatprep.subr.mxu0 %v3028_v0  ;;  %2604 = vmatprep.subr.mxu1 %v3028_v0  ;;  %v218_v17 = vld [vmem:[#allocation5 + $0x30] sm:$0xff]  ;;  %v217_v19 = vld [vmem:[#allocation5 + $0x28] sm:$0xff]  ;;  %v313_v20 = vld [vmem:[#allocation8 + $0x38] sm:$0xff]  ;;  %p2938_p12 = por %p2937_p11, %p2936_p10 }
  0xa7   :  { %2570 = vmatpush3.msra.mxu0 %v225_v3  ;;  %2605 = vmatpush3.msra.mxu1 %v319_v8  ;;  %v216_v21 = vld [vmem:[#allocation5 + $0x20] sm:$0xff]  ;;  %v312_v22 = vld [vmem:[#allocation8 + $0x30] sm:$0xff]  ;;  %v311_v24 = vld [vmem:[#allocation8 + $0x28] sm:$0xff] }
  0xa8   :  { %2571 = vmatprep.subr.mxu0 %v3028_v0  ;;  %2606 = vmatprep.subr.mxu1 %v3028_v0  ;;  %v215_v23 = vld [vmem:[#allocation5 + $0x18] sm:$0xff]  ;;  %v214_v25 = vld [vmem:[#allocation5 + $0x10] sm:$0xff]  ;;  %v310_v26 = vld [vmem:[#allocation8 + $0x20] sm:$0xff]  ;;  %p2939_p13 = pnand %p2938_p12, %p2932_p9 }
  0xa9   :  { %2572 = vmatpush3.msra.mxu0 %v224_v4  ;;  %2607 = vmatpush3.msra.mxu1 %v318_v10  ;;  %v213_v27 = vld [vmem:[#allocation5 + $0x8] sm:$0xff]  ;;  %v309_v28 = vld [vmem:[#allocation8 + $0x18] sm:$0xff]  ;;  %v308_v31 = vld [vmem:[#allocation8 + $0x10] sm:$0xff] }
  0xaa   :  { %2573 = vmatprep.subr.mxu0 %v3028_v0  ;;  %2608 = vmatprep.subr.mxu1 %v3028_v0  ;;  %v212_v29 = vld [vmem:[#allocation5] sm:$0xff]  ;;  %v211_v30 = vld [vmem:[#allocation2] sm:$0xff]  ;;  %v307_v32 = vld [vmem:[#allocation8 + $0x8] sm:$0xff] }
  0xab   :  { %2574 = vmatpush3.msra.mxu0 %v223_v6  ;;  %2609 = vmatpush3.msra.mxu1 %v317_v12  ;;  %v306_v33 = vld [vmem:[#allocation8] sm:$0xff]  ;;  %v461_v34 = vld [vmem:[#allocation11 + $0x1e8] sm:$0xff]  ;;  %v2456_v62 = vld [vmem:[#allocation7] ss:$0 sm:$0xff] }
  0xac   :  { %2575 = vmatprep.subr.mxu0 %v3028_v0  ;;  %2610 = vmatprep.subr.mxu1 %v3028_v0  ;;  %v463_v35 = vld [vmem:[#allocation11 + $0x1f8] sm:$0xff]  ;;  %v460_v36 = vld [vmem:[#allocation11 + $0x1e0] sm:$0xff]  ;;  %v457_v37 = vld [vmem:[#allocation11 + $0x1c8] sm:$0xff] }
  0xad   :  { %2576 = vmatpush3.msra.mxu0 %v222_v9  ;;  %2611 = vmatpush3.msra.mxu1 %v316_v14  ;;  %v456_v38 = vld [vmem:[#allocation11 + $0x1c0] sm:$0xff]  ;;  %v453_v39 = vld [vmem:[#allocation11 + $0x1a8] sm:$0xff]  ;;  %v462_v4 = vld [vmem:[#allocation11 + $0x1f0] sm:$0xff] }
  0xae   :  { %2577 = vmatprep.subr.mxu0 %v3028_v0  ;;  %2612 = vmatprep.subr.mxu1 %v3028_v0  ;;  %v452_v40 = vld [vmem:[#allocation11 + $0x1a0] sm:$0xff]  ;;  %v449_v41 = vld [vmem:[#allocation11 + $0x188] sm:$0xff]  ;;  %v459_v5 = vld [vmem:[#allocation11 + $0x1d8] sm:$0xff] }
  0xaf   :  { %2578 = vmatpush3.msra.mxu0 %v221_v11  ;;  %2613 = vmatpush3.msra.mxu1 %v315_v16  ;;  %v448_v42 = vld [vmem:[#allocation11 + $0x180] sm:$0xff]  ;;  %v445_v43 = vld [vmem:[#allocation11 + $0x168] sm:$0xff]  ;;  %v458_v6 = vld [vmem:[#allocation11 + $0x1d0] sm:$0xff] }
  0xb0   :  { %2579 = vmatprep.subr.mxu0 %v3028_v0  ;;  %2614 = vmatprep.subr.mxu1 %v3028_v0  ;;  %v444_v44 = vld [vmem:[#allocation11 + $0x160] sm:$0xff]  ;;  %v441_v45 = vld [vmem:[#allocation11 + $0x148] sm:$0xff]  ;;  %v455_v7 = vld [vmem:[#allocation11 + $0x1b8] sm:$0xff] }
  0xb1   :  { %2580 = vmatpush3.msra.mxu0 %v220_v13  ;;  %2615 = vmatpush3.msra.mxu1 %v314_v18  ;;  %v440_v46 = vld [vmem:[#allocation11 + $0x140] sm:$0xff]  ;;  %v437_v47 = vld [vmem:[#allocation11 + $0x128] sm:$0xff]  ;;  %v454_v8 = vld [vmem:[#allocation11 + $0x1b0] sm:$0xff] }
  0xb2   :  { %2581 = vmatprep.subr.mxu0 %v3028_v0  ;;  %2616 = vmatprep.subr.mxu1 %v3028_v0  ;;  %v436_v48 = vld [vmem:[#allocation11 + $0x120] sm:$0xff]  ;;  %v433_v49 = vld [vmem:[#allocation11 + $0x108] sm:$0xff]  ;;  %v451_v9 = vld [vmem:[#allocation11 + $0x198] sm:$0xff] }
  0xb3   :  { %2582 = vmatpush3.msra.mxu0 %v219_v15  ;;  %2617 = vmatpush3.msra.mxu1 %v313_v20  ;;  %v432_v50 = vld [vmem:[#allocation11 + $0x100] sm:$0xff]  ;;  %v429_v51 = vld [vmem:[#allocation11 + $0xe8] sm:$0xff]  ;;  %v450_v10 = vld [vmem:[#allocation11 + $0x190] sm:$0xff] }
  0xb4   :  { %2583 = vmatprep.subr.mxu0 %v3028_v0  ;;  %2618 = vmatprep.subr.mxu1 %v3028_v0  ;;  %v428_v52 = vld [vmem:[#allocation11 + $0xe0] sm:$0xff]  ;;  %v425_v53 = vld [vmem:[#allocation11 + $0xc8] sm:$0xff]  ;;  %v447_v11 = vld [vmem:[#allocation11 + $0x178] sm:$0xff] }
  0xb5   :  { %2584 = vmatpush3.msra.mxu0 %v218_v17  ;;  %2619 = vmatpush3.msra.mxu1 %v312_v22  ;;  %v424_v54 = vld [vmem:[#allocation11 + $0xc0] sm:$0xff]  ;;  %v421_v55 = vld [vmem:[#allocation11 + $0xa8] sm:$0xff]  ;;  %v446_v12 = vld [vmem:[#allocation11 + $0x170] sm:$0xff] }
  0xb6   :  { %2585 = vmatprep.subr.mxu0 %v3028_v0  ;;  %2620 = vmatprep.subr.mxu1 %v3028_v0  ;;  %v420_v56 = vld [vmem:[#allocation11 + $0xa0] sm:$0xff]  ;;  %v417_v57 = vld [vmem:[#allocation11 + $0x88] sm:$0xff]  ;;  %v443_v13 = vld [vmem:[#allocation11 + $0x158] sm:$0xff] }
  0xb7   :  { %2586 = vmatpush3.msra.mxu0 %v217_v19  ;;  %2621 = vmatpush3.msra.mxu1 %v311_v24  ;;  %v416_v58 = vld [vmem:[#allocation11 + $0x80] sm:$0xff]  ;;  %v413_v59 = vld [vmem:[#allocation11 + $0x68] sm:$0xff]  ;;  %v442_v14 = vld [vmem:[#allocation11 + $0x150] sm:$0xff] }
  0xb8   :  { %2587 = vmatprep.subr.mxu0 %v3028_v0  ;;  %2622 = vmatprep.subr.mxu1 %v3028_v0  ;;  %v412_v60 = vld [vmem:[#allocation11 + $0x60] sm:$0xff]  ;;  %v409_v61 = vld [vmem:[#allocation11 + $0x48] sm:$0xff]  ;;  %v439_v15 = vld [vmem:[#allocation11 + $0x138] sm:$0xff] }
  0xb9   :  { %2588 = vmatpush3.msra.mxu0 %v216_v21  ;;  %2623 = vmatpush3.msra.mxu1 %v310_v26  ;;  %v438_v16 = vld [vmem:[#allocation11 + $0x130] sm:$0xff]  ;;  %v435_v17 = vld [vmem:[#allocation11 + $0x118] sm:$0xff] }
  0xba   :  { %2589 = vmatprep.subr.mxu0 %v3028_v0  ;;  %2624 = vmatprep.subr.mxu1 %v3028_v0  ;;  %v434_v18 = vld [vmem:[#allocation11 + $0x110] sm:$0xff]  ;;  %v431_v19 = vld [vmem:[#allocation11 + $0xf8] sm:$0xff] }
  0xbb   :  { %2590 = vmatpush3.msra.mxu0 %v215_v23  ;;  %2625 = vmatpush3.msra.mxu1 %v309_v28  ;;  %v430_v20 = vld [vmem:[#allocation11 + $0xf0] sm:$0xff]  ;;  %v427_v21 = vld [vmem:[#allocation11 + $0xd8] sm:$0xff] }
  0xbc   :  { %2591 = vmatprep.subr.mxu0 %v3028_v0  ;;  %2626 = vmatprep.subr.mxu1 %v3028_v0  ;;  %v426_v22 = vld [vmem:[#allocation11 + $0xd0] sm:$0xff]  ;;  %v423_v23 = vld [vmem:[#allocation11 + $0xb8] sm:$0xff] }
  0xbd   :  { %2592 = vmatpush3.msra.mxu0 %v214_v25  ;;  %2627 = vmatpush3.msra.mxu1 %v308_v31  ;;  %v422_v24 = vld [vmem:[#allocation11 + $0xb0] sm:$0xff]  ;;  %v419_v25 = vld [vmem:[#allocation11 + $0x98] sm:$0xff] }
  0xbe   :  { %2593 = vmatprep.subr.mxu0 %v3028_v0  ;;  %2628 = vmatprep.subr.mxu1 %v3028_v0  ;;  %v418_v26 = vld [vmem:[#allocation11 + $0x90] sm:$0xff] }
  0xbf   :  { %2594 = vmatpush3.msra.mxu0 %v213_v27  ;;  %2629 = vmatpush3.msra.mxu1 %v307_v32  ;;  %v415_v27 = vld [vmem:[#allocation11 + $0x78] sm:$0xff]  ;;  %v414_v28 = vld [vmem:[#allocation11 + $0x70] sm:$0xff]  ;;  %v405_v32 = vld [vmem:[#allocation11 + $0x28] sm:$0xff] }
  0xc0   :  { %2595 = vmatprep.subr.mxu0 %v3028_v0  ;;  %2630 = vmatprep.subr.mxu1 %v3028_v0  ;;  %v410_v31 = vld [vmem:[#allocation11 + $0x50] sm:$0xff] }
  0xc1   :  { %2596 = vmatpush3.msra.mxu0 %v212_v29  ;;  %2631 = vmatpush3.msra.mxu1 %v306_v33  ;;  %v411_v29 = vld [vmem:[#allocation11 + $0x58] sm:$0xff] }
  0xc2   :  { %2598 = vmatmul.mubr.f32.vlgmr.msra.gmra.mxu0 %v211_v30  ;;  %481 = vmatprep.subr.mxu0 %v461_v34  ;;  %v408_v30 = vld [vmem:[#allocation11 + $0x40] sm:$0xff]  ;;  %v407_v33 = vld [vmem:[#allocation11 + $0x38] sm:$0xff] }
  0xc3   :  { %545 = vmatprep.mubr.f32.mxu0 %v3028_v0  ;;  %551 = vmatprep.subr.mxu1 %v463_v35  ;;  %v404_v34 = vld [vmem:[#allocation11 + $0x20] sm:$0xff]  ;;  %v406_v35 = vld [vmem:[#allocation11 + $0x30] sm:$0xff] }
  0xc4   :  { %482 = vmatpush1.msra.mxu0 %v460_v36  ;;  %v401_v36 = vld [vmem:[#allocation11 + $0x8] sm:$0xff] }
  0xc5   :  { %483 = vmatprep.subr.mxu0 %v457_v37  ;;  %v403_v37 = vld [vmem:[#allocation11 + $0x18] sm:$0xff] }
  0xc6   :  { %484 = vmatpush1.msra.mxu0 %v456_v38  ;;  %v400_v38 = vld [vmem:[#allocation11] sm:$0xff] }
  0xc7   :  { %485 = vmatprep.subr.mxu0 %v453_v39  ;;  %v402_v39 = vld [vmem:[#allocation11 + $0x10] sm:$0xff] }
  0xc8   :  { %486 = vmatpush1.msra.mxu0 %v452_v40  ;;  %v2457_v40 = vld [vmem:[#allocation10] ss:$0 sm:$0xff] }
  0xc9   :  { %487 = vmatprep.subr.mxu0 %v449_v41 }
  0xca   :  { %488 = vmatpush1.msra.mxu0 %v448_v42 }
  0xcb   :  { %489 = vmatprep.subr.mxu0 %v445_v43 }
  0xcc   :  { %490 = vmatpush1.msra.mxu0 %v444_v44 }
  0xcd   :  { %491 = vmatprep.subr.mxu0 %v441_v45  ;;  %v761_v45 = vld [vmem:[#allocation14 + $0x3c8] sm:$0xff] }
  0xce   :  { %492 = vmatpush1.msra.mxu0 %v440_v46  ;;  %v763_v46 = vld [vmem:[#allocation14 + $0x3d8] sm:$0xff] }
  0xcf   :  { %493 = vmatprep.subr.mxu0 %v437_v47  ;;  %v760_v47 = vld [vmem:[#allocation14 + $0x3c0] sm:$0xff] }
  0xd0   :  { %494 = vmatpush1.msra.mxu0 %v436_v48  ;;  %v762_v48 = vld [vmem:[#allocation14 + $0x3d0] sm:$0xff] }
  0xd1   :  { %495 = vmatprep.subr.mxu0 %v433_v49  ;;  %v753_v49 = vld [vmem:[#allocation14 + $0x388] sm:$0xff] }
  0xd2   :  { %496 = vmatpush1.msra.mxu0 %v432_v50  ;;  %v755_v50 = vld [vmem:[#allocation14 + $0x398] sm:$0xff] }
  0xd3   :  { %497 = vmatprep.subr.mxu0 %v429_v51  ;;  %v752_v51 = vld [vmem:[#allocation14 + $0x380] sm:$0xff] }
  0xd4   :  { %498 = vmatpush1.msra.mxu0 %v428_v52  ;;  %v754_v52 = vld [vmem:[#allocation14 + $0x390] sm:$0xff] }
  0xd5   :  { %499 = vmatprep.subr.mxu0 %v425_v53  ;;  %v745_v53 = vld [vmem:[#allocation14 + $0x348] sm:$0xff] }
  0xd6   :  { %500 = vmatpush1.msra.mxu0 %v424_v54  ;;  %v747_v54 = vld [vmem:[#allocation14 + $0x358] sm:$0xff] }
  0xd7   :  { %501 = vmatprep.subr.mxu0 %v421_v55  ;;  %v744_v55 = vld [vmem:[#allocation14 + $0x340] sm:$0xff] }
  0xd8   :  { %502 = vmatpush1.msra.mxu0 %v420_v56  ;;  %v746_v56 = vld [vmem:[#allocation14 + $0x350] sm:$0xff] }
  0xd9   :  { %503 = vmatprep.subr.mxu0 %v417_v57  ;;  %v737_v57 = vld [vmem:[#allocation14 + $0x308] sm:$0xff] }
  0xda   :  { %504 = vmatpush1.msra.mxu0 %v416_v58  ;;  %v739_v58 = vld [vmem:[#allocation14 + $0x318] sm:$0xff] }
  0xdb   :  { %505 = vmatprep.subr.mxu0 %v413_v59  ;;  %v736_v59 = vld [vmem:[#allocation14 + $0x300] sm:$0xff] }
  0xdc   :  { %506 = vmatpush1.msra.mxu0 %v412_v60  ;;  %v738_v60 = vld [vmem:[#allocation14 + $0x310] sm:$0xff] }
  0xdd   :  { %507 = vmatprep.subr.mxu0 %v409_v61  ;;  %v729_v61 = vld [vmem:[#allocation14 + $0x2c8] sm:$0xff] }
  0xde   :  { %508 = vmatpush1.msra.mxu0 %v408_v30  ;;  %v665_v30 = vld [vmem:[#allocation14 + $0xc8] sm:$0xff] }
  0xdf   :  { %509 = vmatprep.subr.mxu0 %v405_v32  ;;  %v664_v32 = vld [vmem:[#allocation14 + $0xc0] sm:$0xff] }
  0xe0   :  { %510 = vmatpush1.msra.mxu0 %v404_v34  ;;  %v657_v34 = vld [vmem:[#allocation14 + $0x88] sm:$0xff] }
  0xe1   :  { %511 = vmatprep.subr.mxu0 %v401_v36  ;;  %v656_v36 = vld [vmem:[#allocation14 + $0x80] sm:$0xff] }
  0xe2   :  { %512 = vmatpush1.msra.mxu0 %v400_v38  ;;  %v649_v38 = vld [vmem:[#allocation14 + $0x48] sm:$0xff] }
  0xe3   :  { %810 = vmatprep.subr.mxu0 %v761_v45  ;;  %v642_v45 = vld [vmem:[#allocation14 + $0x10] sm:$0xff] }
 0x182   :  { %v301_v63 = vpop.f32.mrf.mxu0 }
 0x183   :  { %v302_v1 = vadd.f32 %v2456_v62, %v301_v63  ;;  %v731_v62 = vld [vmem:[#allocation14 + $0x2d8] sm:$0xff]  ;;  %v728_v63 = vld [vmem:[#allocation14 + $0x2c0] sm:$0xff] }
 0x184   :  { %v2599_v2 = vpop.f32.mrf.mxu0 }
 0x185   :  { %v305_v3 = vmax.f32 %v302_v1, 0.0  ;;  %v730_v1 = vld [vmem:[#allocation14 + $0x2d0] sm:$0xff]  ;;  %v721_v2 = vld [vmem:[#allocation14 + $0x288] sm:$0xff] }
 0x187   :  { %2633 = vmatmul.mubr.f32.vlgmr.msra.gmra.mxu1 %v305_v3  ;;  %v723_v3 = vld [vmem:[#allocation14 + $0x298] sm:$0xff] }
 0x188   :  { %552 = vmatpush1.msra.mxu1 %v462_v4  ;;  %615 = vmatprep.mubr.f32.mxu1 %v3028_v0  ;;  %v720_v4 = vld [vmem:[#allocation14 + $0x280] sm:$0xff] }
 0x189   :  { %553 = vmatprep.subr.mxu1 %v459_v5  ;;  %v722_v5 = vld [vmem:[#allocation14 + $0x290] sm:$0xff] }
 0x18a   :  { %554 = vmatpush1.msra.mxu1 %v458_v6  ;;  %v713_v6 = vld [vmem:[#allocation14 + $0x248] sm:$0xff] }
 0x18b   :  { %555 = vmatprep.subr.mxu1 %v455_v7  ;;  %v715_v7 = vld [vmem:[#allocation14 + $0x258] sm:$0xff] }
 0x18c   :  { %556 = vmatpush1.msra.mxu1 %v454_v8  ;;  %v712_v8 = vld [vmem:[#allocation14 + $0x240] sm:$0xff] }
 0x18d   :  { %557 = vmatprep.subr.mxu1 %v451_v9  ;;  %v714_v9 = vld [vmem:[#allocation14 + $0x250] sm:$0xff] }
 0x18e   :  { %558 = vmatpush1.msra.mxu1 %v450_v10  ;;  %v705_v10 = vld [vmem:[#allocation14 + $0x208] sm:$0xff] }
 0x18f   :  { %559 = vmatprep.subr.mxu1 %v447_v11  ;;  %v707_v11 = vld [vmem:[#allocation14 + $0x218] sm:$0xff] }
 0x190   :  { %560 = vmatpush1.msra.mxu1 %v446_v12  ;;  %v704_v12 = vld [vmem:[#allocation14 + $0x200] sm:$0xff] }
 0x191   :  { %561 = vmatprep.subr.mxu1 %v443_v13  ;;  %v706_v13 = vld [vmem:[#allocation14 + $0x210] sm:$0xff] }
 0x192   :  { %562 = vmatpush1.msra.mxu1 %v442_v14  ;;  %v697_v14 = vld [vmem:[#allocation14 + $0x1c8] sm:$0xff] }
 0x193   :  { %563 = vmatprep.subr.mxu1 %v439_v15  ;;  %v699_v15 = vld [vmem:[#allocation14 + $0x1d8] sm:$0xff] }
 0x194   :  { %564 = vmatpush1.msra.mxu1 %v438_v16  ;;  %v696_v16 = vld [vmem:[#allocation14 + $0x1c0] sm:$0xff] }
 0x195   :  { %565 = vmatprep.subr.mxu1 %v435_v17  ;;  %v698_v17 = vld [vmem:[#allocation14 + $0x1d0] sm:$0xff] }
 0x196   :  { %566 = vmatpush1.msra.mxu1 %v434_v18  ;;  %v689_v18 = vld [vmem:[#allocation14 + $0x188] sm:$0xff] }
 0x197   :  { %567 = vmatprep.subr.mxu1 %v431_v19  ;;  %v691_v19 = vld [vmem:[#allocation14 + $0x198] sm:$0xff] }
 0x198   :  { %568 = vmatpush1.msra.mxu1 %v430_v20  ;;  %v688_v20 = vld [vmem:[#allocation14 + $0x180] sm:$0xff] }
 0x199   :  { %569 = vmatprep.subr.mxu1 %v427_v21  ;;  %v690_v21 = vld [vmem:[#allocation14 + $0x190] sm:$0xff] }
 0x19a   :  { %570 = vmatpush1.msra.mxu1 %v426_v22  ;;  %v681_v22 = vld [vmem:[#allocation14 + $0x148] sm:$0xff] }
 0x19b   :  { %571 = vmatprep.subr.mxu1 %v423_v23  ;;  %v683_v23 = vld [vmem:[#allocation14 + $0x158] sm:$0xff] }
 0x19c   :  { %572 = vmatpush1.msra.mxu1 %v422_v24  ;;  %v680_v24 = vld [vmem:[#allocation14 + $0x140] sm:$0xff] }
 0x19d   :  { %573 = vmatprep.subr.mxu1 %v419_v25  ;;  %v682_v25 = vld [vmem:[#allocation14 + $0x150] sm:$0xff] }
 0x19e   :  { %574 = vmatpush1.msra.mxu1 %v418_v26  ;;  %v673_v26 = vld [vmem:[#allocation14 + $0x108] sm:$0xff] }
 0x19f   :  { %575 = vmatprep.subr.mxu1 %v415_v27  ;;  %v675_v27 = vld [vmem:[#allocation14 + $0x118] sm:$0xff] }
 0x1a0   :  { %576 = vmatpush1.msra.mxu1 %v414_v28  ;;  %v672_v28 = vld [vmem:[#allocation14 + $0x100] sm:$0xff] }
 0x1a1   :  { %577 = vmatprep.subr.mxu1 %v411_v29  ;;  %v674_v29 = vld [vmem:[#allocation14 + $0x110] sm:$0xff] }
 0x1a2   :  { %578 = vmatpush1.msra.mxu1 %v410_v31  ;;  %v667_v31 = vld [vmem:[#allocation14 + $0xd8] sm:$0xff] }
 0x1a3   :  { %579 = vmatprep.subr.mxu1 %v407_v33  ;;  %v666_v33 = vld [vmem:[#allocation14 + $0xd0] sm:$0xff] }
 0x1a4   :  { %580 = vmatpush1.msra.mxu1 %v406_v35  ;;  %v659_v35 = vld [vmem:[#allocation14 + $0x98] sm:$0xff] }
 0x1a5   :  { %581 = vmatprep.subr.mxu1 %v403_v37  ;;  %v658_v37 = vld [vmem:[#allocation14 + $0x90] sm:$0xff] }
 0x1a6   :  { %582 = vmatpush1.msra.mxu1 %v402_v39  ;;  %v651_v39 = vld [vmem:[#allocation14 + $0x58] sm:$0xff] }
 0x1a7   :  { %881 = vmatprep.subr.mxu1 %v763_v46  ;;  %v765_v46 = vld [vmem:[#allocation14 + $0x3e8] sm:$0xff] }
 0x247   :  { %v395_v41 = vpop.f32.mrf.mxu1 }
 0x248   :  { %v396_v42 = vadd.f32 %v2457_v40, %v395_v41  ;;  %v648_v40 = vld [vmem:[#allocation14 + $0x40] sm:$0xff]  ;;  %v650_v41 = vld [vmem:[#allocation14 + $0x50] sm:$0xff] }
 0x249   :  { %v2634_v43 = vpop.f32.mrf.mxu1 }
 0x24a   :  { %v399_v44 = vmax.f32 %v396_v42, 0.0  ;;  %v641_v42 = vld [vmem:[#allocation14 + $0x8] sm:$0xff]  ;;  %v643_v43 = vld [vmem:[#allocation14 + $0x18] sm:$0xff] }
 0x24c   :  { %546 = vmatmul.mubr.f32.vlgmr.msra.gmra.mxu0 %v399_v44  ;;  %616 = vmatmul.mubr.f32.vlgmr.msra.gmra.mxu1 %v399_v44  ;;  %v640_v44 = vld [vmem:[#allocation14] sm:$0xff] }
 0x24d   :  { %874 = vmatprep.mubr.f32.mxu0 %v3028_v0  ;;  %945 = vmatprep.mubr.f32.mxu1 %v3028_v0 }
 0x24e   :  { %811 = vmatpush1.msra.mxu0 %v760_v47  ;;  %882 = vmatpush1.msra.mxu1 %v762_v48  ;;  %v767_v47 = vld [vmem:[#allocation14 + $0x3f8] sm:$0xff]  ;;  %v466_v48 = vlaneseq }
 0x24f   :  { %812 = vmatprep.subr.mxu0 %v753_v49  ;;  %883 = vmatprep.subr.mxu1 %v755_v50 }
 0x250   :  { %813 = vmatpush1.msra.mxu0 %v752_v51  ;;  %884 = vmatpush1.msra.mxu1 %v754_v52  ;;  %v3205_v49 = vshrl.u32 %v466_v48, 7  ;;  %v464_v51 = vld [vmem:[#allocation13] sm:$0xf] }
 0x251   :  { %814 = vmatprep.subr.mxu0 %v745_v53  ;;  %885 = vmatprep.subr.mxu1 %v747_v54  ;;  %v695_v48 = vld [vmem:[#allocation14 + $0x1b8] sm:$0xff] }
 0x252   :  { %815 = vmatpush1.msra.mxu0 %v744_v55  ;;  %886 = vmatpush1.msra.mxu1 %v746_v56  ;;  %v3208_v50 = vsub.s32 0, %v3205_v49  ;;  %v3212_v54 = vsub.s32 3, %v3205_v49 }
 0x253   :  { %816 = vmatprep.subr.mxu0 %v737_v57  ;;  %887 = vmatprep.subr.mxu1 %v739_v58 }
 0x254   :  { %817 = vmatpush1.msra.mxu0 %v736_v59  ;;  %888 = vmatpush1.msra.mxu1 %v738_v60  ;;  %v469_v52 = vrot.slane %v464_v51, %v3208_v50  ;;  %v477_v59 = vrot.slane %v464_v51, %v3212_v54 }
 0x255   :  { %818 = vmatprep.subr.mxu0 %v729_v61  ;;  %889 = vmatprep.subr.mxu1 %v731_v62  ;;  %v3216_v61 = vsub.s32 2, %v3205_v49 }
 0x256   :  { %819 = vmatpush1.msra.mxu0 %v728_v63  ;;  %890 = vmatpush1.msra.mxu1 %v730_v1 }
 0x257   :  { %820 = vmatprep.subr.mxu0 %v721_v2  ;;  %891 = vmatprep.subr.mxu1 %v723_v3  ;;  %v473_v63 = vrot.slane %v464_v51, %v3216_v61  ;;  %v692_v51 = vld [vmem:[#allocation14 + $0x1a0] sm:$0xff] }
 0x258   :  { %821 = vmatpush1.msra.mxu0 %v720_v4  ;;  %892 = vmatpush1.msra.mxu1 %v722_v5 }
 0x259   :  { %822 = vmatprep.subr.mxu0 %v713_v6  ;;  %893 = vmatprep.subr.mxu1 %v715_v7 }
 0x25a   :  { %823 = vmatpush1.msra.mxu0 %v712_v8  ;;  %894 = vmatpush1.msra.mxu1 %v714_v9 }
 0x25b   :  { %824 = vmatprep.subr.mxu0 %v705_v10  ;;  %895 = vmatprep.subr.mxu1 %v707_v11 }
 0x25c   :  { %825 = vmatpush1.msra.mxu0 %v704_v12  ;;  %896 = vmatpush1.msra.mxu1 %v706_v13  ;;  %v764_v13 = vld [vmem:[#allocation14 + $0x3e0] sm:$0xff] }
 0x25d   :  { %826 = vmatprep.subr.mxu0 %v697_v14  ;;  %897 = vmatprep.subr.mxu1 %v699_v15  ;;  %v766_v14 = vld [vmem:[#allocation14 + $0x3f0] sm:$0xff]  ;;  %v757_v15 = vld [vmem:[#allocation14 + $0x3a8] sm:$0xff] }
 0x25e   :  { %827 = vmatpush1.msra.mxu0 %v696_v16  ;;  %898 = vmatpush1.msra.mxu1 %v698_v17  ;;  %v759_v16 = vld [vmem:[#allocation14 + $0x3b8] sm:$0xff]  ;;  %v756_v17 = vld [vmem:[#allocation14 + $0x3a0] sm:$0xff] }
 0x25f   :  { %828 = vmatprep.subr.mxu0 %v689_v18  ;;  %899 = vmatprep.subr.mxu1 %v691_v19  ;;  %v758_v18 = vld [vmem:[#allocation14 + $0x3b0] sm:$0xff]  ;;  %v749_v19 = vld [vmem:[#allocation14 + $0x368] sm:$0xff] }
 0x260   :  { %829 = vmatpush1.msra.mxu0 %v688_v20  ;;  %900 = vmatpush1.msra.mxu1 %v690_v21  ;;  %v751_v20 = vld [vmem:[#allocation14 + $0x378] sm:$0xff]  ;;  %v748_v21 = vld [vmem:[#allocation14 + $0x360] sm:$0xff] }
 0x261   :  { %830 = vmatprep.subr.mxu0 %v681_v22  ;;  %901 = vmatprep.subr.mxu1 %v683_v23  ;;  %v750_v22 = vld [vmem:[#allocation14 + $0x370] sm:$0xff]  ;;  %v741_v23 = vld [vmem:[#allocation14 + $0x328] sm:$0xff] }
 0x262   :  { %831 = vmatpush1.msra.mxu0 %v680_v24  ;;  %902 = vmatpush1.msra.mxu1 %v682_v25  ;;  %v743_v24 = vld [vmem:[#allocation14 + $0x338] sm:$0xff]  ;;  %v740_v25 = vld [vmem:[#allocation14 + $0x320] sm:$0xff] }
 0x263   :  { %832 = vmatprep.subr.mxu0 %v673_v26  ;;  %903 = vmatprep.subr.mxu1 %v675_v27  ;;  %v742_v26 = vld [vmem:[#allocation14 + $0x330] sm:$0xff]  ;;  %v733_v27 = vld [vmem:[#allocation14 + $0x2e8] sm:$0xff] }
 0x264   :  { %833 = vmatpush1.msra.mxu0 %v672_v28  ;;  %904 = vmatpush1.msra.mxu1 %v674_v29  ;;  %v735_v28 = vld [vmem:[#allocation14 + $0x2f8] sm:$0xff]  ;;  %v732_v29 = vld [vmem:[#allocation14 + $0x2e0] sm:$0xff] }
 0x265   :  { %834 = vmatprep.subr.mxu0 %v665_v30  ;;  %905 = vmatprep.subr.mxu1 %v667_v31  ;;  %v734_v30 = vld [vmem:[#allocation14 + $0x2f0] sm:$0xff]  ;;  %v725_v31 = vld [vmem:[#allocation14 + $0x2a8] sm:$0xff] }
 0x266   :  { %835 = vmatpush1.msra.mxu0 %v664_v32  ;;  %906 = vmatpush1.msra.mxu1 %v666_v33  ;;  %v727_v32 = vld [vmem:[#allocation14 + $0x2b8] sm:$0xff]  ;;  %v724_v33 = vld [vmem:[#allocation14 + $0x2a0] sm:$0xff] }
 0x267   :  { %836 = vmatprep.subr.mxu0 %v657_v34  ;;  %907 = vmatprep.subr.mxu1 %v659_v35  ;;  %v726_v34 = vld [vmem:[#allocation14 + $0x2b0] sm:$0xff]  ;;  %v717_v35 = vld [vmem:[#allocation14 + $0x268] sm:$0xff] }
 0x268   :  { %837 = vmatpush1.msra.mxu0 %v656_v36  ;;  %908 = vmatpush1.msra.mxu1 %v658_v37  ;;  %v719_v36 = vld [vmem:[#allocation14 + $0x278] sm:$0xff]  ;;  %v716_v37 = vld [vmem:[#allocation14 + $0x260] sm:$0xff] }
 0x269   :  { %838 = vmatprep.subr.mxu0 %v649_v38  ;;  %909 = vmatprep.subr.mxu1 %v651_v39  ;;  %v718_v38 = vld [vmem:[#allocation14 + $0x270] sm:$0xff]  ;;  %v709_v39 = vld [vmem:[#allocation14 + $0x228] sm:$0xff] }
 0x26a   :  { %839 = vmatpush1.msra.mxu0 %v648_v40  ;;  %910 = vmatpush1.msra.mxu1 %v650_v41  ;;  %v711_v40 = vld [vmem:[#allocation14 + $0x238] sm:$0xff]  ;;  %v708_v41 = vld [vmem:[#allocation14 + $0x220] sm:$0xff] }
 0x26b   :  { %840 = vmatprep.subr.mxu0 %v641_v42  ;;  %911 = vmatprep.subr.mxu1 %v643_v43  ;;  %v710_v42 = vld [vmem:[#allocation14 + $0x230] sm:$0xff]  ;;  %v701_v43 = vld [vmem:[#allocation14 + $0x1e8] sm:$0xff] }
 0x26c   :  { %841 = vmatpush1.msra.mxu0 %v640_v44  ;;  %912 = vmatpush1.msra.mxu1 %v642_v45  ;;  %v703_v44 = vld [vmem:[#allocation14 + $0x1f8] sm:$0xff]  ;;  %v700_v45 = vld [vmem:[#allocation14 + $0x1e0] sm:$0xff] }
 0x26d   :  { %952 = vmatprep.subr.mxu0 %v765_v46  ;;  %1023 = vmatprep.subr.mxu1 %v767_v47  ;;  %v702_v46 = vld [vmem:[#allocation14 + $0x1f0] sm:$0xff]  ;;  %v693_v47 = vld [vmem:[#allocation14 + $0x1a8] sm:$0xff] }
 0x30c   :  { %v547_v53 = vpop.f32.mrf.mxu0  ;;  %v617_v56 = vpop.f32.mrf.mxu1 }
 0x30d   :  { %v548_v55 = vadd.f32 %v547_v53, %v469_v52  ;;  %v618_v2 = vadd.f32 %v617_v56, %v473_v63  ;;  %v694_v52 = vld [vmem:[#allocation14 + $0x1b0] sm:$0xff]  ;;  %v685_v53 = vld [vmem:[#allocation14 + $0x168] sm:$0xff]  ;;  %v684_v56 = vld [vmem:[#allocation14 + $0x160] sm:$0xff] }
 0x30e   :  { %v549_v57 = vpop.f32.mrf.mxu0  ;;  %v619_v60 = vpop.f32.mrf.mxu1  ;;  %v669_v63 = vld [vmem:[#allocation14 + $0xe8] sm:$0xff] }
 0x30f   :  { %v2458_v58 = vmul.f32 -1.442695, %v548_v55  ;;  %v620_v62 = vadd.f32 %v619_v60, %v477_v59  ;;  %v687_v55 = vld [vmem:[#allocation14 + $0x178] sm:$0xff]  ;;  %v686_v57 = vld [vmem:[#allocation14 + $0x170] sm:$0xff]  ;;  %v676_v60 = vld [vmem:[#allocation14 + $0x120] sm:$0xff] }
 0x310   :  { %v679_v59 = vld [vmem:[#allocation14 + $0x138] sm:$0xff] }
 0x311   :  { %2659 = vpow2.f32 %v2458_v58  ;;  %v2459_v1 = vmul.f32 -1.442695, %v620_v62  ;;  %v677_v58 = vld [vmem:[#allocation14 + $0x128] sm:$0xff]  ;;  %v678_v62 = vld [vmem:[#allocation14 + $0x130] sm:$0xff] }
 0x313   :  { %2661 = vpow2.f32 %v2459_v1  ;;  %v671_v1 = vld [vmem:[#allocation14 + $0xf8] sm:$0xff] }
 0x314   :  { %2663 = vtanh.f32 %v618_v2  ;;  %v668_v2 = vld [vmem:[#allocation14 + $0xe0] sm:$0xff] }
 0x31e   :  { %v2660_v3 = vpop.eup %2659 }
 0x31f   :  { %v625_v4 = vadd.f32 1.0, %v2660_v3  ;;  %v670_v3 = vld [vmem:[#allocation14 + $0xf0] sm:$0xff] }
 0x320   :  { %v2662_v5 = vpop.eup %2661 }
 0x321   :  { %2665 = vrcp.f32 %v625_v4  ;;  %v632_v6 = vadd.f32 1.0, %v2662_v5  ;;  %v2664_v7 = vpop.eup %2663  ;;  %v661_v4 = vld [vmem:[#allocation14 + $0xa8] sm:$0xff]  ;;  %v663_v5 = vld [vmem:[#allocation14 + $0xb8] sm:$0xff] }
 0x323   :  { %2667 = vrcp.f32 %v632_v6  ;;  %v660_v6 = vld [vmem:[#allocation14 + $0xa0] sm:$0xff] }
 0x32e   :  { %v2666_v8 = vpop.eup %2665 }
 0x32f   :  { %v635_v9 = vmul.f32 %v2666_v8, %v2664_v7  ;;  %v662_v7 = vld [vmem:[#allocation14 + $0xb0] sm:$0xff]  ;;  %v653_v8 = vld [vmem:[#allocation14 + $0x68] sm:$0xff] }
 0x330   :  { %v2668_v10 = vpop.eup %2667 }
 0x331   :  { %2669 = vtanh.f32 %v635_v9  ;;  %639 = vst [vmem:[#allocation26] sm:$0xff] %v635_v9  ;;  %v655_v9 = vld [vmem:[#allocation14 + $0x78] sm:$0xff] }
 0x33e   :  { %v2670_v11 = vpop.eup %2669 }
 0x33f   :  { %v3219_v12 = vmul.f32 %v2670_v11, %v2668_v10  ;;  %v652_v10 = vld [vmem:[#allocation14 + $0x60] sm:$0xff]  ;;  %v654_v11 = vld [vmem:[#allocation14 + $0x70] sm:$0xff] }
 0x341   :  { %875 = vmatmul.mubr.f32.vlgmr.msra.gmra.mxu0 %v3219_v12  ;;  %638 = vst [vmem:[#allocation24] sm:$0xff] %v3219_v12  ;;  %946 = vmatmul.mubr.f32.vlgmr.msra.gmra.mxu1 %v3219_v12 }
 0x342   :  { %953 = vmatpush1.msra.mxu0 %v764_v13  ;;  %1024 = vmatpush1.msra.mxu1 %v766_v14  ;;  %v645_v13 = vld [vmem:[#allocation14 + $0x28] sm:$0xff]  ;;  %v647_v14 = vld [vmem:[#allocation14 + $0x38] sm:$0xff] }
 0x343   :  { %954 = vmatprep.subr.mxu0 %v757_v15  ;;  %1025 = vmatprep.subr.mxu1 %v759_v16  ;;  %v644_v15 = vld [vmem:[#allocation14 + $0x20] sm:$0xff]  ;;  %v646_v16 = vld [vmem:[#allocation14 + $0x30] sm:$0xff] }
 0x344   :  { %955 = vmatpush1.msra.mxu0 %v756_v17  ;;  %1026 = vmatpush1.msra.mxu1 %v758_v18  ;;  %v1155_v17 = vld [vmem:[#allocation17 + $0x1e8] sm:$0xff] }
 0x345   :  { %956 = vmatprep.subr.mxu0 %v749_v19  ;;  %1027 = vmatprep.subr.mxu1 %v751_v20  ;;  %v1283_v18 = vld [vmem:[#allocation17 + $0x5e8] sm:$0xff]  ;;  %v1154_v19 = vld [vmem:[#allocation17 + $0x1e0] sm:$0xff] }
 0x346   :  { %957 = vmatpush1.msra.mxu0 %v748_v21  ;;  %1028 = vmatpush1.msra.mxu1 %v750_v22  ;;  %v1282_v20 = vld [vmem:[#allocation17 + $0x5e0] sm:$0xff]  ;;  %v1151_v21 = vld [vmem:[#allocation17 + $0x1c8] sm:$0xff] }
 0x347   :  { %958 = vmatprep.subr.mxu0 %v741_v23  ;;  %1029 = vmatprep.subr.mxu1 %v743_v24  ;;  %v1279_v22 = vld [vmem:[#allocation17 + $0x5c8] sm:$0xff]  ;;  %v1150_v23 = vld [vmem:[#allocation17 + $0x1c0] sm:$0xff] }
 0x348   :  { %959 = vmatpush1.msra.mxu0 %v740_v25  ;;  %1030 = vmatpush1.msra.mxu1 %v742_v26  ;;  %v1278_v24 = vld [vmem:[#allocation17 + $0x5c0] sm:$0xff]  ;;  %v1147_v25 = vld [vmem:[#allocation17 + $0x1a8] sm:$0xff] }
 0x349   :  { %960 = vmatprep.subr.mxu0 %v733_v27  ;;  %1031 = vmatprep.subr.mxu1 %v735_v28  ;;  %v1275_v26 = vld [vmem:[#allocation17 + $0x5a8] sm:$0xff]  ;;  %v1146_v27 = vld [vmem:[#allocation17 + $0x1a0] sm:$0xff] }
 0x34a   :  { %961 = vmatpush1.msra.mxu0 %v732_v29  ;;  %1032 = vmatpush1.msra.mxu1 %v734_v30  ;;  %v1143_v28 = vld [vmem:[#allocation17 + $0x188] sm:$0xff]  ;;  %v1270_v30 = vld [vmem:[#allocation17 + $0x580] sm:$0xff] }
 0x34b   :  { %962 = vmatprep.subr.mxu0 %v725_v31  ;;  %1033 = vmatprep.subr.mxu1 %v727_v32  ;;  %v1271_v29 = vld [vmem:[#allocation17 + $0x588] sm:$0xff] }
 0x34c   :  { %963 = vmatpush1.msra.mxu0 %v724_v33  ;;  %1034 = vmatpush1.msra.mxu1 %v726_v34  ;;  %v1139_v31 = vld [vmem:[#allocation17 + $0x168] sm:$0xff]  ;;  %v1138_v33 = vld [vmem:[#allocation17 + $0x160] sm:$0xff] }
 0x34d   :  { %964 = vmatprep.subr.mxu0 %v717_v35  ;;  %1035 = vmatprep.subr.mxu1 %v719_v36  ;;  %v1267_v32 = vld [vmem:[#allocation17 + $0x568] sm:$0xff]  ;;  %v1266_v34 = vld [vmem:[#allocation17 + $0x560] sm:$0xff] }
 0x34e   :  { %965 = vmatpush1.msra.mxu0 %v716_v37  ;;  %1036 = vmatpush1.msra.mxu1 %v718_v38  ;;  %v1135_v35 = vld [vmem:[#allocation17 + $0x148] sm:$0xff]  ;;  %v1134_v37 = vld [vmem:[#allocation17 + $0x140] sm:$0xff] }
 0x34f   :  { %966 = vmatprep.subr.mxu0 %v709_v39  ;;  %1037 = vmatprep.subr.mxu1 %v711_v40  ;;  %v1263_v36 = vld [vmem:[#allocation17 + $0x548] sm:$0xff]  ;;  %v1262_v38 = vld [vmem:[#allocation17 + $0x540] sm:$0xff] }
 0x350   :  { %967 = vmatpush1.msra.mxu0 %v708_v41  ;;  %1038 = vmatpush1.msra.mxu1 %v710_v42  ;;  %v1131_v39 = vld [vmem:[#allocation17 + $0x128] sm:$0xff]  ;;  %v1130_v41 = vld [vmem:[#allocation17 + $0x120] sm:$0xff] }
 0x351   :  { %968 = vmatprep.subr.mxu0 %v701_v43  ;;  %1039 = vmatprep.subr.mxu1 %v703_v44  ;;  %v1259_v40 = vld [vmem:[#allocation17 + $0x528] sm:$0xff]  ;;  %v1258_v42 = vld [vmem:[#allocation17 + $0x520] sm:$0xff] }
 0x352   :  { %969 = vmatpush1.msra.mxu0 %v700_v45  ;;  %1040 = vmatpush1.msra.mxu1 %v702_v46  ;;  %v1127_v43 = vld [vmem:[#allocation17 + $0x108] sm:$0xff]  ;;  %v1126_v45 = vld [vmem:[#allocation17 + $0x100] sm:$0xff] }
 0x353   :  { %970 = vmatprep.subr.mxu0 %v693_v47  ;;  %1041 = vmatprep.subr.mxu1 %v695_v48  ;;  %v1255_v44 = vld [vmem:[#allocation17 + $0x508] sm:$0xff]  ;;  %v1254_v46 = vld [vmem:[#allocation17 + $0x500] sm:$0xff] }
 0x354   :  { %971 = vmatpush1.msra.mxu0 %v692_v51  ;;  %1042 = vmatpush1.msra.mxu1 %v694_v52  ;;  %v1123_v47 = vld [vmem:[#allocation17 + $0xe8] sm:$0xff]  ;;  %v1122_v51 = vld [vmem:[#allocation17 + $0xe0] sm:$0xff] }
 0x355   :  { %972 = vmatprep.subr.mxu0 %v685_v53  ;;  %1043 = vmatprep.subr.mxu1 %v687_v55  ;;  %v1251_v48 = vld [vmem:[#allocation17 + $0x4e8] sm:$0xff]  ;;  %v1250_v52 = vld [vmem:[#allocation17 + $0x4e0] sm:$0xff] }
 0x356   :  { %973 = vmatpush1.msra.mxu0 %v684_v56  ;;  %1044 = vmatpush1.msra.mxu1 %v686_v57  ;;  %v1119_v53 = vld [vmem:[#allocation17 + $0xc8] sm:$0xff]  ;;  %v1118_v56 = vld [vmem:[#allocation17 + $0xc0] sm:$0xff] }
 0x357   :  { %974 = vmatprep.subr.mxu0 %v677_v58  ;;  %1045 = vmatprep.subr.mxu1 %v679_v59  ;;  %v1247_v55 = vld [vmem:[#allocation17 + $0x4c8] sm:$0xff]  ;;  %v1246_v57 = vld [vmem:[#allocation17 + $0x4c0] sm:$0xff] }
 0x358   :  { %975 = vmatpush1.msra.mxu0 %v676_v60  ;;  %1046 = vmatpush1.msra.mxu1 %v678_v62  ;;  %v1115_v58 = vld [vmem:[#allocation17 + $0xa8] sm:$0xff]  ;;  %v1114_v60 = vld [vmem:[#allocation17 + $0xa0] sm:$0xff] }
 0x359   :  { %976 = vmatprep.subr.mxu0 %v669_v63  ;;  %1047 = vmatprep.subr.mxu1 %v671_v1  ;;  %v1243_v59 = vld [vmem:[#allocation17 + $0x4a8] sm:$0xff]  ;;  %v1242_v62 = vld [vmem:[#allocation17 + $0x4a0] sm:$0xff] }
 0x35a   :  { %977 = vmatpush1.msra.mxu0 %v668_v2  ;;  %1048 = vmatpush1.msra.mxu1 %v670_v3  ;;  %v1111_v63 = vld [vmem:[#allocation17 + $0x88] sm:$0xff]  ;;  %v1110_v2 = vld [vmem:[#allocation17 + $0x80] sm:$0xff] }
 0x35b   :  { %978 = vmatprep.subr.mxu0 %v661_v4  ;;  %1049 = vmatprep.subr.mxu1 %v663_v5  ;;  %v1239_v1 = vld [vmem:[#allocation17 + $0x488] sm:$0xff]  ;;  %v1238_v3 = vld [vmem:[#allocation17 + $0x480] sm:$0xff] }
 0x35c   :  { %979 = vmatpush1.msra.mxu0 %v660_v6  ;;  %1050 = vmatpush1.msra.mxu1 %v662_v7  ;;  %v1107_v4 = vld [vmem:[#allocation17 + $0x68] sm:$0xff]  ;;  %v1106_v6 = vld [vmem:[#allocation17 + $0x60] sm:$0xff] }
 0x35d   :  { %980 = vmatprep.subr.mxu0 %v653_v8  ;;  %1051 = vmatprep.subr.mxu1 %v655_v9  ;;  %v1235_v5 = vld [vmem:[#allocation17 + $0x468] sm:$0xff]  ;;  %v1234_v7 = vld [vmem:[#allocation17 + $0x460] sm:$0xff] }
 0x35e   :  { %981 = vmatpush1.msra.mxu0 %v652_v10  ;;  %1052 = vmatpush1.msra.mxu1 %v654_v11  ;;  %v1103_v8 = vld [vmem:[#allocation17 + $0x48] sm:$0xff]  ;;  %v1102_v10 = vld [vmem:[#allocation17 + $0x40] sm:$0xff] }
 0x35f   :  { %982 = vmatprep.subr.mxu0 %v645_v13  ;;  %1053 = vmatprep.subr.mxu1 %v647_v14  ;;  %v1231_v9 = vld [vmem:[#allocation17 + $0x448] sm:$0xff]  ;;  %v1230_v11 = vld [vmem:[#allocation17 + $0x440] sm:$0xff] }
 0x360   :  { %983 = vmatpush1.msra.mxu0 %v644_v15  ;;  %1016 = vmatprep.mubr.f32.mxu0 %v3028_v0  ;;  %v1099_v13 = vld [vmem:[#allocation17 + $0x28] sm:$0xff]  ;;  %v1098_v15 = vld [vmem:[#allocation17 + $0x20] sm:$0xff] }
 0x361   :  { %1054 = vmatpush1.msra.mxu1 %v646_v16  ;;  %1087 = vmatprep.mubr.f32.mxu1 %v3028_v0  ;;  %v1274_v0 = vld [vmem:[#allocation17 + $0x5a0] sm:$0xff]  ;;  %v1227_v14 = vld [vmem:[#allocation17 + $0x428] sm:$0xff] }
 0x362   :  { %1017 = vmatmul.mubr.f32.vlgmr.msra.gmra.mxu0 %v3219_v12  ;;  %1088 = vmatmul.mubr.f32.vlgmr.msra.gmra.mxu1 %v3219_v12  ;;  %v1142_v12 = vld [vmem:[#allocation17 + $0x180] sm:$0xff] }
 0x363   :  { %1628 = vmatprep.subr.mxu0 %v1155_v17  ;;  %1699 = vmatprep.subr.mxu1 %v1283_v18  ;;  %v1226_v16 = vld [vmem:[#allocation17 + $0x420] sm:$0xff]  ;;  %v1095_v17 = vld [vmem:[#allocation17 + $0x8] sm:$0xff] }
 0x364   :  { %1629 = vmatpush1.msra.mxu0 %v1154_v19  ;;  %1700 = vmatpush1.msra.mxu1 %v1282_v20  ;;  %v1223_v18 = vld [vmem:[#allocation17 + $0x408] sm:$0xff]  ;;  %v1094_v19 = vld [vmem:[#allocation17] sm:$0xff] }
 0x365   :  { %1630 = vmatprep.subr.mxu0 %v1151_v21  ;;  %1701 = vmatprep.subr.mxu1 %v1279_v22  ;;  %v1222_v20 = vld [vmem:[#allocation17 + $0x400] sm:$0xff]  ;;  %v1219_v21 = vld [vmem:[#allocation17 + $0x3e8] sm:$0xff] }
 0x366   :  { %1631 = vmatpush1.msra.mxu0 %v1150_v23  ;;  %1702 = vmatpush1.msra.mxu1 %v1278_v24  ;;  %v1347_v22 = vld [vmem:[#allocation17 + $0x7e8] sm:$0xff]  ;;  %v1218_v23 = vld [vmem:[#allocation17 + $0x3e0] sm:$0xff] }
 0x367   :  { %1632 = vmatprep.subr.mxu0 %v1147_v25  ;;  %1703 = vmatprep.subr.mxu1 %v1275_v26  ;;  %v1346_v24 = vld [vmem:[#allocation17 + $0x7e0] sm:$0xff]  ;;  %v1215_v25 = vld [vmem:[#allocation17 + $0x3c8] sm:$0xff] }
 0x368   :  { %1633 = vmatpush1.msra.mxu0 %v1146_v27  ;;  %1704 = vmatpush1.msra.mxu1 %v1274_v0  ;;  %v1343_v26 = vld [vmem:[#allocation17 + $0x7c8] sm:$0xff]  ;;  %v1214_v27 = vld [vmem:[#allocation17 + $0x3c0] sm:$0xff] }
 0x369   :  { %1634 = vmatprep.subr.mxu0 %v1143_v28  ;;  %1705 = vmatprep.subr.mxu1 %v1271_v29  ;;  %v1342_v0 = vld [vmem:[#allocation17 + $0x7c0] sm:$0xff]  ;;  %v1211_v28 = vld [vmem:[#allocation17 + $0x3a8] sm:$0xff] }
 0x36a   :  { %1635 = vmatpush1.msra.mxu0 %v1142_v12  ;;  %1706 = vmatpush1.msra.mxu1 %v1270_v30  ;;  %v1339_v29 = vld [vmem:[#allocation17 + $0x7a8] sm:$0xff]  ;;  %v1210_v12 = vld [vmem:[#allocation17 + $0x3a0] sm:$0xff] }
 0x36b   :  { %1636 = vmatprep.subr.mxu0 %v1139_v31  ;;  %1707 = vmatprep.subr.mxu1 %v1267_v32  ;;  %v1338_v30 = vld [vmem:[#allocation17 + $0x7a0] sm:$0xff]  ;;  %v1207_v31 = vld [vmem:[#allocation17 + $0x388] sm:$0xff] }
 0x36c   :  { %1637 = vmatpush1.msra.mxu0 %v1138_v33  ;;  %1708 = vmatpush1.msra.mxu1 %v1266_v34  ;;  %v1335_v32 = vld [vmem:[#allocation17 + $0x788] sm:$0xff]  ;;  %v1206_v33 = vld [vmem:[#allocation17 + $0x380] sm:$0xff] }
 0x36d   :  { %1638 = vmatprep.subr.mxu0 %v1135_v35  ;;  %1709 = vmatprep.subr.mxu1 %v1263_v36  ;;  %v1334_v34 = vld [vmem:[#allocation17 + $0x780] sm:$0xff]  ;;  %v1203_v35 = vld [vmem:[#allocation17 + $0x368] sm:$0xff] }
 0x36e   :  { %1639 = vmatpush1.msra.mxu0 %v1134_v37  ;;  %1710 = vmatpush1.msra.mxu1 %v1262_v38  ;;  %v1331_v36 = vld [vmem:[#allocation17 + $0x768] sm:$0xff]  ;;  %v1202_v37 = vld [vmem:[#allocation17 + $0x360] sm:$0xff] }
 0x36f   :  { %1640 = vmatprep.subr.mxu0 %v1131_v39  ;;  %1711 = vmatprep.subr.mxu1 %v1259_v40  ;;  %v1330_v38 = vld [vmem:[#allocation17 + $0x760] sm:$0xff]  ;;  %v1199_v39 = vld [vmem:[#allocation17 + $0x348] sm:$0xff] }
 0x370   :  { %1641 = vmatpush1.msra.mxu0 %v1130_v41  ;;  %1712 = vmatpush1.msra.mxu1 %v1258_v42  ;;  %v1327_v40 = vld [vmem:[#allocation17 + $0x748] sm:$0xff]  ;;  %v1198_v41 = vld [vmem:[#allocation17 + $0x340] sm:$0xff] }
 0x371   :  { %1642 = vmatprep.subr.mxu0 %v1127_v43  ;;  %1713 = vmatprep.subr.mxu1 %v1255_v44  ;;  %v1326_v42 = vld [vmem:[#allocation17 + $0x740] sm:$0xff]  ;;  %v1195_v43 = vld [vmem:[#allocation17 + $0x328] sm:$0xff] }
 0x372   :  { %1643 = vmatpush1.msra.mxu0 %v1126_v45  ;;  %1714 = vmatpush1.msra.mxu1 %v1254_v46  ;;  %v1323_v44 = vld [vmem:[#allocation17 + $0x728] sm:$0xff]  ;;  %v1194_v45 = vld [vmem:[#allocation17 + $0x320] sm:$0xff] }
 0x373   :  { %1644 = vmatprep.subr.mxu0 %v1123_v47  ;;  %1715 = vmatprep.subr.mxu1 %v1251_v48  ;;  %v1322_v46 = vld [vmem:[#allocation17 + $0x720] sm:$0xff]  ;;  %v1191_v47 = vld [vmem:[#allocation17 + $0x308] sm:$0xff] }
 0x374   :  { %1645 = vmatpush1.msra.mxu0 %v1122_v51  ;;  %1716 = vmatpush1.msra.mxu1 %v1250_v52  ;;  %v1319_v48 = vld [vmem:[#allocation17 + $0x708] sm:$0xff]  ;;  %v1190_v51 = vld [vmem:[#allocation17 + $0x300] sm:$0xff] }
 0x375   :  { %1646 = vmatprep.subr.mxu0 %v1119_v53  ;;  %1717 = vmatprep.subr.mxu1 %v1247_v55  ;;  %v1318_v52 = vld [vmem:[#allocation17 + $0x700] sm:$0xff]  ;;  %v1187_v53 = vld [vmem:[#allocation17 + $0x2e8] sm:$0xff] }
 0x376   :  { %1647 = vmatpush1.msra.mxu0 %v1118_v56  ;;  %1718 = vmatpush1.msra.mxu1 %v1246_v57  ;;  %v1315_v55 = vld [vmem:[#allocation17 + $0x6e8] sm:$0xff]  ;;  %v1186_v56 = vld [vmem:[#allocation17 + $0x2e0] sm:$0xff] }
 0x377   :  { %1648 = vmatprep.subr.mxu0 %v1115_v58  ;;  %1719 = vmatprep.subr.mxu1 %v1243_v59  ;;  %v1314_v57 = vld [vmem:[#allocation17 + $0x6e0] sm:$0xff]  ;;  %v1183_v58 = vld [vmem:[#allocation17 + $0x2c8] sm:$0xff] }
 0x378   :  { %1649 = vmatpush1.msra.mxu0 %v1114_v60  ;;  %1720 = vmatpush1.msra.mxu1 %v1242_v62  ;;  %v1311_v59 = vld [vmem:[#allocation17 + $0x6c8] sm:$0xff]  ;;  %v1182_v60 = vld [vmem:[#allocation17 + $0x2c0] sm:$0xff] }
 0x379   :  { %1650 = vmatprep.subr.mxu0 %v1111_v63  ;;  %1721 = vmatprep.subr.mxu1 %v1239_v1  ;;  %v1310_v62 = vld [vmem:[#allocation17 + $0x6c0] sm:$0xff]  ;;  %v1179_v63 = vld [vmem:[#allocation17 + $0x2a8] sm:$0xff] }
 0x37a   :  { %1651 = vmatpush1.msra.mxu0 %v1110_v2  ;;  %1722 = vmatpush1.msra.mxu1 %v1238_v3  ;;  %v1307_v1 = vld [vmem:[#allocation17 + $0x6a8] sm:$0xff]  ;;  %v1178_v2 = vld [vmem:[#allocation17 + $0x2a0] sm:$0xff] }
 0x37b   :  { %1652 = vmatprep.subr.mxu0 %v1107_v4  ;;  %1723 = vmatprep.subr.mxu1 %v1235_v5  ;;  %v1306_v3 = vld [vmem:[#allocation17 + $0x6a0] sm:$0xff]  ;;  %v1175_v4 = vld [vmem:[#allocation17 + $0x288] sm:$0xff] }
 0x37c   :  { %1653 = vmatpush1.msra.mxu0 %v1106_v6  ;;  %1724 = vmatpush1.msra.mxu1 %v1234_v7  ;;  %v1303_v5 = vld [vmem:[#allocation17 + $0x688] sm:$0xff]  ;;  %v1174_v6 = vld [vmem:[#allocation17 + $0x280] sm:$0xff] }
 0x37d   :  { %1654 = vmatprep.subr.mxu0 %v1103_v8  ;;  %1725 = vmatprep.subr.mxu1 %v1231_v9  ;;  %v1302_v7 = vld [vmem:[#allocation17 + $0x680] sm:$0xff]  ;;  %v1171_v8 = vld [vmem:[#allocation17 + $0x268] sm:$0xff] }
 0x37e   :  { %1655 = vmatpush1.msra.mxu0 %v1102_v10  ;;  %1726 = vmatpush1.msra.mxu1 %v1230_v11  ;;  %v1299_v9 = vld [vmem:[#allocation17 + $0x668] sm:$0xff]  ;;  %v1170_v10 = vld [vmem:[#allocation17 + $0x260] sm:$0xff] }
 0x37f   :  { %1656 = vmatprep.subr.mxu0 %v1099_v13  ;;  %1727 = vmatprep.subr.mxu1 %v1227_v14  ;;  %v1298_v11 = vld [vmem:[#allocation17 + $0x660] sm:$0xff]  ;;  %v1167_v13 = vld [vmem:[#allocation17 + $0x248] sm:$0xff] }
 0x380   :  { %1657 = vmatpush1.msra.mxu0 %v1098_v15  ;;  %1728 = vmatpush1.msra.mxu1 %v1226_v16  ;;  %v1295_v14 = vld [vmem:[#allocation17 + $0x648] sm:$0xff]  ;;  %v1166_v15 = vld [vmem:[#allocation17 + $0x240] sm:$0xff] }
 0x381   :  { %1658 = vmatprep.subr.mxu0 %v1095_v17  ;;  %1729 = vmatprep.subr.mxu1 %v1223_v18  ;;  %v1294_v16 = vld [vmem:[#allocation17 + $0x640] sm:$0xff]  ;;  %v1163_v17 = vld [vmem:[#allocation17 + $0x228] sm:$0xff] }
 0x382   :  { %1659 = vmatpush1.msra.mxu0 %v1094_v19  ;;  %1730 = vmatpush1.msra.mxu1 %v1222_v20  ;;  %v1291_v18 = vld [vmem:[#allocation17 + $0x628] sm:$0xff]  ;;  %v1162_v19 = vld [vmem:[#allocation17 + $0x220] sm:$0xff] }
 0x383   :  { %1660 = vmatprep.subr.mxu0 %v1219_v21  ;;  %1731 = vmatprep.subr.mxu1 %v1347_v22  ;;  %v1290_v20 = vld [vmem:[#allocation17 + $0x620] sm:$0xff]  ;;  %v1159_v21 = vld [vmem:[#allocation17 + $0x208] sm:$0xff] }
 0x384   :  { %1661 = vmatpush2.msra.mxu0 %v1218_v23  ;;  %1732 = vmatpush2.msra.mxu1 %v1346_v24  ;;  %v1287_v22 = vld [vmem:[#allocation17 + $0x608] sm:$0xff]  ;;  %v1158_v23 = vld [vmem:[#allocation17 + $0x200] sm:$0xff] }
 0x385   :  { %1662 = vmatprep.subr.mxu0 %v1215_v25  ;;  %1733 = vmatprep.subr.mxu1 %v1343_v26  ;;  %v1286_v24 = vld [vmem:[#allocation17 + $0x600] sm:$0xff]  ;;  %v1411_v25 = vld [vmem:[#allocation17 + $0x9e8] sm:$0xff] }
 0x386   :  { %1663 = vmatpush2.msra.mxu0 %v1214_v27  ;;  %1734 = vmatpush2.msra.mxu1 %v1342_v0  ;;  %v1539_v26 = vld [vmem:[#allocation17 + $0xde8] sm:$0xff]  ;;  %v776_v27 = vsub.s32 1, %v3205_v49  ;;  %v3229_v0 = vld [vmem:[#allocation16] sm:$0xff] }
 0x387   :  { %1664 = vmatprep.subr.mxu0 %v1211_v28  ;;  %1735 = vmatprep.subr.mxu1 %v1339_v29  ;;  %v785_v29 = vrot.slane %v3229_v0, %v3212_v54 }
 0x388   :  { %1665 = vmatpush2.msra.mxu0 %v1210_v12  ;;  %1736 = vmatpush2.msra.mxu1 %v1338_v30  ;;  %v777_v28 = vrot.slane %v3229_v0, %v776_v27  ;;  %v773_v12 = vrot.slane %v3229_v0, %v3208_v50 }
 0x389   :  { %1666 = vmatprep.subr.mxu0 %v1207_v31  ;;  %1737 = vmatprep.subr.mxu1 %v1335_v32  ;;  %v781_v31 = vrot.slane %v3229_v0, %v3216_v61 }
 0x38a   :  { %1667 = vmatpush2.msra.mxu0 %v1206_v33  ;;  %1738 = vmatpush2.msra.mxu1 %v1334_v34 }
 0x38b   :  { %1668 = vmatprep.subr.mxu0 %v1203_v35  ;;  %1739 = vmatprep.subr.mxu1 %v1331_v36 }
 0x38c   :  { %1669 = vmatpush2.msra.mxu0 %v1202_v37  ;;  %1740 = vmatpush2.msra.mxu1 %v1330_v38 }
 0x38d   :  { %1670 = vmatprep.subr.mxu0 %v1199_v39  ;;  %1741 = vmatprep.subr.mxu1 %v1327_v40  ;;  %v1410_v39 = vld [vmem:[#allocation17 + $0x9e0] sm:$0xff] }
 0x38e   :  { %1671 = vmatpush2.msra.mxu0 %v1198_v41  ;;  %1742 = vmatpush2.msra.mxu1 %v1326_v42  ;;  %v1538_v40 = vld [vmem:[#allocation17 + $0xde0] sm:$0xff]  ;;  %v1407_v41 = vld [vmem:[#allocation17 + $0x9c8] sm:$0xff] }
 0x38f   :  { %1672 = vmatprep.subr.mxu0 %v1195_v43  ;;  %1743 = vmatprep.subr.mxu1 %v1323_v44  ;;  %v1535_v42 = vld [vmem:[#allocation17 + $0xdc8] sm:$0xff]  ;;  %v1406_v43 = vld [vmem:[#allocation17 + $0x9c0] sm:$0xff] }
 0x390   :  { %1673 = vmatpush2.msra.mxu0 %v1194_v45  ;;  %1744 = vmatpush2.msra.mxu1 %v1322_v46  ;;  %v1534_v44 = vld [vmem:[#allocation17 + $0xdc0] sm:$0xff]  ;;  %v1403_v45 = vld [vmem:[#allocation17 + $0x9a8] sm:$0xff] }
 0x391   :  { %1674 = vmatprep.subr.mxu0 %v1191_v47  ;;  %1745 = vmatprep.subr.mxu1 %v1319_v48  ;;  %v1531_v46 = vld [vmem:[#allocation17 + $0xda8] sm:$0xff]  ;;  %v1402_v47 = vld [vmem:[#allocation17 + $0x9a0] sm:$0xff] }
 0x392   :  { %1675 = vmatpush2.msra.mxu0 %v1190_v51  ;;  %1746 = vmatpush2.msra.mxu1 %v1318_v52  ;;  %v1530_v48 = vld [vmem:[#allocation17 + $0xda0] sm:$0xff]  ;;  %v1399_v51 = vld [vmem:[#allocation17 + $0x988] sm:$0xff] }
 0x393   :  { %1676 = vmatprep.subr.mxu0 %v1187_v53  ;;  %1747 = vmatprep.subr.mxu1 %v1315_v55  ;;  %v1527_v52 = vld [vmem:[#allocation17 + $0xd88] sm:$0xff]  ;;  %v1398_v53 = vld [vmem:[#allocation17 + $0x980] sm:$0xff] }
 0x394   :  { %1677 = vmatpush2.msra.mxu0 %v1186_v56  ;;  %1748 = vmatpush2.msra.mxu1 %v1314_v57  ;;  %v1526_v55 = vld [vmem:[#allocation17 + $0xd80] sm:$0xff]  ;;  %v1395_v56 = vld [vmem:[#allocation17 + $0x968] sm:$0xff] }
 0x395   :  { %1678 = vmatprep.subr.mxu0 %v1183_v58  ;;  %1749 = vmatprep.subr.mxu1 %v1311_v59  ;;  %v1523_v57 = vld [vmem:[#allocation17 + $0xd68] sm:$0xff]  ;;  %v1394_v58 = vld [vmem:[#allocation17 + $0x960] sm:$0xff] }
 0x396   :  { %1679 = vmatpush2.msra.mxu0 %v1182_v60  ;;  %1750 = vmatpush2.msra.mxu1 %v1310_v62  ;;  %v1522_v59 = vld [vmem:[#allocation17 + $0xd60] sm:$0xff]  ;;  %v1391_v60 = vld [vmem:[#allocation17 + $0x948] sm:$0xff] }
 0x397   :  { %1680 = vmatprep.subr.mxu0 %v1179_v63  ;;  %1751 = vmatprep.subr.mxu1 %v1307_v1  ;;  %v1519_v62 = vld [vmem:[#allocation17 + $0xd48] sm:$0xff]  ;;  %v1390_v63 = vld [vmem:[#allocation17 + $0x940] sm:$0xff] }
 0x398   :  { %1681 = vmatpush2.msra.mxu0 %v1178_v2  ;;  %1752 = vmatpush2.msra.mxu1 %v1306_v3  ;;  %v1518_v1 = vld [vmem:[#allocation17 + $0xd40] sm:$0xff]  ;;  %v1387_v2 = vld [vmem:[#allocation17 + $0x928] sm:$0xff] }
 0x399   :  { %1682 = vmatprep.subr.mxu0 %v1175_v4  ;;  %1753 = vmatprep.subr.mxu1 %v1303_v5  ;;  %v1515_v3 = vld [vmem:[#allocation17 + $0xd28] sm:$0xff]  ;;  %v1386_v4 = vld [vmem:[#allocation17 + $0x920] sm:$0xff] }
 0x39a   :  { %1683 = vmatpush2.msra.mxu0 %v1174_v6  ;;  %1754 = vmatpush2.msra.mxu1 %v1302_v7  ;;  %v1514_v5 = vld [vmem:[#allocation17 + $0xd20] sm:$0xff]  ;;  %v1383_v6 = vld [vmem:[#allocation17 + $0x908] sm:$0xff] }
 0x39b   :  { %1684 = vmatprep.subr.mxu0 %v1171_v8  ;;  %1755 = vmatprep.subr.mxu1 %v1299_v9  ;;  %v1511_v7 = vld [vmem:[#allocation17 + $0xd08] sm:$0xff]  ;;  %v1382_v8 = vld [vmem:[#allocation17 + $0x900] sm:$0xff] }
 0x39c   :  { %1685 = vmatpush2.msra.mxu0 %v1170_v10  ;;  %1756 = vmatpush2.msra.mxu1 %v1298_v11  ;;  %v1510_v9 = vld [vmem:[#allocation17 + $0xd00] sm:$0xff]  ;;  %v1379_v10 = vld [vmem:[#allocation17 + $0x8e8] sm:$0xff] }
 0x39d   :  { %1686 = vmatprep.subr.mxu0 %v1167_v13  ;;  %1757 = vmatprep.subr.mxu1 %v1295_v14  ;;  %v1507_v11 = vld [vmem:[#allocation17 + $0xce8] sm:$0xff]  ;;  %v1378_v13 = vld [vmem:[#allocation17 + $0x8e0] sm:$0xff] }
 0x39e   :  { %1687 = vmatpush2.msra.mxu0 %v1166_v15  ;;  %1758 = vmatpush2.msra.mxu1 %v1294_v16  ;;  %v1506_v14 = vld [vmem:[#allocation17 + $0xce0] sm:$0xff]  ;;  %v1375_v15 = vld [vmem:[#allocation17 + $0x8c8] sm:$0xff] }
 0x39f   :  { %1688 = vmatprep.subr.mxu0 %v1163_v17  ;;  %1759 = vmatprep.subr.mxu1 %v1291_v18  ;;  %v1503_v16 = vld [vmem:[#allocation17 + $0xcc8] sm:$0xff]  ;;  %v1374_v17 = vld [vmem:[#allocation17 + $0x8c0] sm:$0xff] }
 0x3a0   :  { %1689 = vmatpush2.msra.mxu0 %v1162_v19  ;;  %1760 = vmatpush2.msra.mxu1 %v1290_v20  ;;  %v1502_v18 = vld [vmem:[#allocation17 + $0xcc0] sm:$0xff]  ;;  %v1371_v19 = vld [vmem:[#allocation17 + $0x8a8] sm:$0xff] }
 0x3a1   :  { %1690 = vmatprep.subr.mxu0 %v1159_v21  ;;  %1761 = vmatprep.subr.mxu1 %v1287_v22  ;;  %v1499_v20 = vld [vmem:[#allocation17 + $0xca8] sm:$0xff]  ;;  %v1370_v21 = vld [vmem:[#allocation17 + $0x8a0] sm:$0xff] }
 0x3a2   :  { %1691 = vmatpush2.msra.mxu0 %v1158_v23  ;;  %1762 = vmatpush2.msra.mxu1 %v1286_v24  ;;  %v1498_v22 = vld [vmem:[#allocation17 + $0xca0] sm:$0xff]  ;;  %v1367_v23 = vld [vmem:[#allocation17 + $0x888] sm:$0xff] }
 0x3a3   :  { %1770 = vmatprep.subr.mxu0 %v1411_v25  ;;  %1841 = vmatprep.subr.mxu1 %v1539_v26  ;;  %v1495_v24 = vld [vmem:[#allocation17 + $0xc88] sm:$0xff]  ;;  %v1366_v25 = vld [vmem:[#allocation17 + $0x880] sm:$0xff] }
 0x3a4   :  { %v1494_v26 = vld [vmem:[#allocation17 + $0xc80] sm:$0xff] }
 0x401   :  { %v876_v30 = vpop.f32.mrf.mxu0  ;;  %v947_v32 = vpop.f32.mrf.mxu1 }
 0x402   :  { %v3244_v37 = vadd.f32 %v876_v30, %v773_v12  ;;  %v3246_v38 = vadd.f32 %v947_v32, %v781_v31  ;;  %v1362_v12 = vld [vmem:[#allocation17 + $0x860] sm:$0xff]  ;;  %v792_v31 = vsub.s32 5, %v3205_v49  ;;  %v800_v32 = vsub.s32 7, %v3205_v49 }
 0x403   :  { %v878_v33 = vpop.f32.mrf.mxu0  ;;  %v949_v34 = vpop.f32.mrf.mxu1  ;;  %v1490_v30 = vld [vmem:[#allocation17 + $0xc60] sm:$0xff] }
 0x404   :  { %v3240_v35 = vadd.f32 %v878_v33, %v777_v28  ;;  %v3242_v36 = vadd.f32 %v949_v34, %v785_v29  ;;  %v1363_v28 = vld [vmem:[#allocation17 + $0x868] sm:$0xff] }
 0x405   :  { %v1491_v29 = vld [vmem:[#allocation17 + $0xc68] sm:$0xff] }
 0x406   :  { %1692 = vmatprep.mubr.f32.mxu0 %v3240_v35  ;;  %1763 = vmatprep.mubr.f32.mxu1 %v3242_v36  ;;  %v1359_v33 = vld [vmem:[#allocation17 + $0x848] sm:$0xff] }
 0x407   :  { %1693 = vmatmul.mubr.f32.vlgmr.msra.gmra.mxu0 %v3244_v37  ;;  %1764 = vmatmul.mubr.f32.vlgmr.msra.gmra.mxu1 %v3246_v38  ;;  %v1487_v34 = vld [vmem:[#allocation17 + $0xc48] sm:$0xff] }
 0x408   :  { %1771 = vmatpush1.msra.mxu0 %v1410_v39  ;;  %1842 = vmatpush1.msra.mxu1 %v1538_v40  ;;  %v1358_v39 = vld [vmem:[#allocation17 + $0x840] sm:$0xff] }
 0x409   :  { %1772 = vmatprep.subr.mxu0 %v1407_v41  ;;  %1843 = vmatprep.subr.mxu1 %v1535_v42  ;;  %v1486_v40 = vld [vmem:[#allocation17 + $0xc40] sm:$0xff]  ;;  %v1355_v41 = vld [vmem:[#allocation17 + $0x828] sm:$0xff] }
 0x40a   :  { %1773 = vmatpush1.msra.mxu0 %v1406_v43  ;;  %1844 = vmatpush1.msra.mxu1 %v1534_v44  ;;  %v1483_v42 = vld [vmem:[#allocation17 + $0xc28] sm:$0xff]  ;;  %v793_v43 = vrot.slane %v3229_v0, %v792_v31  ;;  %v801_v44 = vrot.slane %v3229_v0, %v800_v32 }
 0x40b   :  { %1774 = vmatprep.subr.mxu0 %v1403_v45  ;;  %1845 = vmatprep.subr.mxu1 %v1531_v46  ;;  %v1354_v45 = vld [vmem:[#allocation17 + $0x820] sm:$0xff]  ;;  %v1443_v31 = vld [vmem:[#allocation17 + $0xae8] sm:$0xff] }
 0x40c   :  { %1775 = vmatpush1.msra.mxu0 %v1402_v47  ;;  %1846 = vmatpush1.msra.mxu1 %v1530_v48  ;;  %v1482_v46 = vld [vmem:[#allocation17 + $0xc20] sm:$0xff]  ;;  %v1571_v32 = vld [vmem:[#allocation17 + $0xee8] sm:$0xff] }
 0x40d   :  { %1776 = vmatprep.subr.mxu0 %v1399_v51  ;;  %1847 = vmatprep.subr.mxu1 %v1527_v52  ;;  %v1351_v51 = vld [vmem:[#allocation17 + $0x808] sm:$0xff] }
 0x40e   :  { %1777 = vmatpush1.msra.mxu0 %v1398_v53  ;;  %1848 = vmatpush1.msra.mxu1 %v1526_v55  ;;  %v1479_v52 = vld [vmem:[#allocation17 + $0xc08] sm:$0xff]  ;;  %v1350_v53 = vld [vmem:[#allocation17 + $0x800] sm:$0xff] }
 0x40f   :  { %1778 = vmatprep.subr.mxu0 %v1395_v56  ;;  %1849 = vmatprep.subr.mxu1 %v1523_v57  ;;  %v1478_v55 = vld [vmem:[#allocation17 + $0xc00] sm:$0xff] }
 0x410   :  { %1779 = vmatpush1.msra.mxu0 %v1394_v58  ;;  %1850 = vmatpush1.msra.mxu1 %v1522_v59 }
 0x411   :  { %1780 = vmatprep.subr.mxu0 %v1391_v60  ;;  %1851 = vmatprep.subr.mxu1 %v1519_v62  ;;  %v1475_v60 = vld [vmem:[#allocation17 + $0xbe8] sm:$0xff] }
 0x412   :  { %1781 = vmatpush1.msra.mxu0 %v1390_v63  ;;  %1852 = vmatpush1.msra.mxu1 %v1518_v1  ;;  %v1603_v62 = vld [vmem:[#allocation17 + $0xfe8] sm:$0xff]  ;;  %v1474_v63 = vld [vmem:[#allocation17 + $0xbe0] sm:$0xff] }
 0x413   :  { %1782 = vmatprep.subr.mxu0 %v1387_v2  ;;  %1853 = vmatprep.subr.mxu1 %v1515_v3  ;;  %v1602_v1 = vld [vmem:[#allocation17 + $0xfe0] sm:$0xff]  ;;  %v1471_v2 = vld [vmem:[#allocation17 + $0xbc8] sm:$0xff] }
 0x414   :  { %1783 = vmatpush1.msra.mxu0 %v1386_v4  ;;  %1854 = vmatpush1.msra.mxu1 %v1514_v5  ;;  %v1599_v3 = vld [vmem:[#allocation17 + $0xfc8] sm:$0xff]  ;;  %v1470_v4 = vld [vmem:[#allocation17 + $0xbc0] sm:$0xff] }
 0x415   :  { %1784 = vmatprep.subr.mxu0 %v1383_v6  ;;  %1855 = vmatprep.subr.mxu1 %v1511_v7  ;;  %v1598_v5 = vld [vmem:[#allocation17 + $0xfc0] sm:$0xff]  ;;  %v1467_v6 = vld [vmem:[#allocation17 + $0xba8] sm:$0xff] }
 0x416   :  { %1785 = vmatpush1.msra.mxu0 %v1382_v8  ;;  %1856 = vmatpush1.msra.mxu1 %v1510_v9  ;;  %v1595_v7 = vld [vmem:[#allocation17 + $0xfa8] sm:$0xff]  ;;  %v1466_v8 = vld [vmem:[#allocation17 + $0xba0] sm:$0xff] }
 0x417   :  { %1786 = vmatprep.subr.mxu0 %v1379_v10  ;;  %1857 = vmatprep.subr.mxu1 %v1507_v11  ;;  %v1594_v9 = vld [vmem:[#allocation17 + $0xfa0] sm:$0xff]  ;;  %v1463_v10 = vld [vmem:[#allocation17 + $0xb88] sm:$0xff] }
 0x418   :  { %1787 = vmatpush1.msra.mxu0 %v1378_v13  ;;  %1858 = vmatpush1.msra.mxu1 %v1506_v14  ;;  %v1591_v11 = vld [vmem:[#allocation17 + $0xf88] sm:$0xff]  ;;  %v1462_v13 = vld [vmem:[#allocation17 + $0xb80] sm:$0xff] }
 0x419   :  { %1788 = vmatprep.subr.mxu0 %v1375_v15  ;;  %1859 = vmatprep.subr.mxu1 %v1503_v16  ;;  %v1590_v14 = vld [vmem:[#allocation17 + $0xf80] sm:$0xff]  ;;  %v1459_v15 = vld [vmem:[#allocation17 + $0xb68] sm:$0xff] }
 0x41a   :  { %1789 = vmatpush1.msra.mxu0 %v1374_v17  ;;  %1860 = vmatpush1.msra.mxu1 %v1502_v18  ;;  %v1587_v16 = vld [vmem:[#allocation17 + $0xf68] sm:$0xff]  ;;  %v1458_v17 = vld [vmem:[#allocation17 + $0xb60] sm:$0xff] }
 0x41b   :  { %1790 = vmatprep.subr.mxu0 %v1371_v19  ;;  %1861 = vmatprep.subr.mxu1 %v1499_v20  ;;  %v1586_v18 = vld [vmem:[#allocation17 + $0xf60] sm:$0xff]  ;;  %v1455_v19 = vld [vmem:[#allocation17 + $0xb48] sm:$0xff] }
 0x41c   :  { %1791 = vmatpush1.msra.mxu0 %v1370_v21  ;;  %1862 = vmatpush1.msra.mxu1 %v1498_v22  ;;  %v1583_v20 = vld [vmem:[#allocation17 + $0xf48] sm:$0xff]  ;;  %v1454_v21 = vld [vmem:[#allocation17 + $0xb40] sm:$0xff] }
 0x41d   :  { %1792 = vmatprep.subr.mxu0 %v1367_v23  ;;  %1863 = vmatprep.subr.mxu1 %v1495_v24  ;;  %v1582_v22 = vld [vmem:[#allocation17 + $0xf40] sm:$0xff]  ;;  %v1451_v23 = vld [vmem:[#allocation17 + $0xb28] sm:$0xff] }
 0x41e   :  { %1793 = vmatpush1.msra.mxu0 %v1366_v25  ;;  %1864 = vmatpush1.msra.mxu1 %v1494_v26  ;;  %v1579_v24 = vld [vmem:[#allocation17 + $0xf28] sm:$0xff]  ;;  %v1450_v25 = vld [vmem:[#allocation17 + $0xb20] sm:$0xff] }
 0x41f   :  { %1794 = vmatprep.subr.mxu0 %v1363_v28  ;;  %1865 = vmatprep.subr.mxu1 %v1491_v29  ;;  %v1578_v26 = vld [vmem:[#allocation17 + $0xf20] sm:$0xff]  ;;  %v1447_v28 = vld [vmem:[#allocation17 + $0xb08] sm:$0xff] }
 0x420   :  { %1795 = vmatpush1.msra.mxu0 %v1362_v12  ;;  %1866 = vmatpush1.msra.mxu1 %v1490_v30  ;;  %v1575_v29 = vld [vmem:[#allocation17 + $0xf08] sm:$0xff]  ;;  %v1446_v12 = vld [vmem:[#allocation17 + $0xb00] sm:$0xff] }
 0x421   :  { %1796 = vmatprep.subr.mxu0 %v1359_v33  ;;  %1867 = vmatprep.subr.mxu1 %v1487_v34  ;;  %v1574_v30 = vld [vmem:[#allocation17 + $0xf00] sm:$0xff] }
 0x422   :  { %v3256_v47 = vpop.f32.mrf.mxu0  ;;  %v3258_v48 = vpop.f32.mrf.mxu1  ;;  %1797 = vmatpush1.msra.mxu0 %v1358_v39  ;;  %1868 = vmatpush1.msra.mxu1 %v1486_v40  ;;  %v1442_v33 = vld [vmem:[#allocation17 + $0xae0] sm:$0xff]  ;;  %v1439_v39 = vld [vmem:[#allocation17 + $0xac8] sm:$0xff] }
 0x423   :  { %1798 = vmatprep.subr.mxu0 %v1355_v41  ;;  %1869 = vmatprep.subr.mxu1 %v1483_v42  ;;  %v1570_v34 = vld [vmem:[#allocation17 + $0xee0] sm:$0xff]  ;;  %v1567_v40 = vld [vmem:[#allocation17 + $0xec8] sm:$0xff] }
 0x424   :  { %v1020_v56 = vpop.f32.mrf.mxu0  ;;  %v1091_v57 = vpop.f32.mrf.mxu1  ;;  %1799 = vmatpush1.msra.mxu0 %v1354_v45  ;;  %1870 = vmatpush1.msra.mxu1 %v1482_v46  ;;  %v1438_v41 = vld [vmem:[#allocation17 + $0xac0] sm:$0xff] }
 0x425   :  { %v3260_v58 = vadd.f32 %v1020_v56, %v793_v43  ;;  %v3262_v59 = vadd.f32 %v1091_v57, %v801_v44  ;;  %1800 = vmatprep.subr.mxu0 %v1351_v51  ;;  %1871 = vmatprep.subr.mxu1 %v1479_v52  ;;  %v1566_v42 = vld [vmem:[#allocation17 + $0xec0] sm:$0xff]  ;;  %v1435_v43 = vld [vmem:[#allocation17 + $0xaa8] sm:$0xff] }
 0x426   :  { %1801 = vmatpush1.msra.mxu0 %v1350_v53  ;;  %1872 = vmatpush1.msra.mxu1 %v1478_v55  ;;  %v1563_v44 = vld [vmem:[#allocation17 + $0xea8] sm:$0xff]  ;;  %v1434_v45 = vld [vmem:[#allocation17 + $0xaa0] sm:$0xff] }
 0x427   :  { %1834 = vmatprep.mubr.f32.mxu0 %v3260_v58  ;;  %1905 = vmatprep.mubr.f32.mxu1 %v3262_v59  ;;  %v1562_v46 = vld [vmem:[#allocation17 + $0xea0] sm:$0xff]  ;;  %v1431_v51 = vld [vmem:[#allocation17 + $0xa88] sm:$0xff] }
 0x428   :  { %1802 = vmatprep.subr.mxu0 %v1475_v60  ;;  %1873 = vmatprep.subr.mxu1 %v1603_v62  ;;  %v1559_v52 = vld [vmem:[#allocation17 + $0xe88] sm:$0xff]  ;;  %v1430_v53 = vld [vmem:[#allocation17 + $0xa80] sm:$0xff]  ;;  %v788_v60 = vsub.s32 4, %v3205_v49  ;;  %v796_v62 = vsub.s32 6, %v3205_v49  ;;  %v2246_v49 = vld [vmem:[#allocation20 + $0x190] sm:$0xff] }
 0x429   :  { %1803 = vmatpush2.msra.mxu0 %v1474_v63  ;;  %1874 = vmatpush2.msra.mxu1 %v1602_v1  ;;  %v1558_v55 = vld [vmem:[#allocation17 + $0xe80] sm:$0xff]  ;;  %v1427_v56 = vld [vmem:[#allocation17 + $0xa68] sm:$0xff] }
 0x42a   :  { %1804 = vmatprep.subr.mxu0 %v1471_v2  ;;  %1875 = vmatprep.subr.mxu1 %v1599_v3  ;;  %v1555_v57 = vld [vmem:[#allocation17 + $0xe68] sm:$0xff]  ;;  %v1426_v63 = vld [vmem:[#allocation17 + $0xa60] sm:$0xff] }
 0x42b   :  { %1805 = vmatpush2.msra.mxu0 %v1470_v4  ;;  %1876 = vmatpush2.msra.mxu1 %v1598_v5  ;;  %v1554_v1 = vld [vmem:[#allocation17 + $0xe60] sm:$0xff]  ;;  %v1423_v2 = vld [vmem:[#allocation17 + $0xa48] sm:$0xff] }
 0x42c   :  { %1806 = vmatprep.subr.mxu0 %v1467_v6  ;;  %1877 = vmatprep.subr.mxu1 %v1595_v7  ;;  %v1551_v3 = vld [vmem:[#allocation17 + $0xe48] sm:$0xff]  ;;  %v1422_v4 = vld [vmem:[#allocation17 + $0xa40] sm:$0xff] }
 0x42d   :  { %1807 = vmatpush2.msra.mxu0 %v1466_v8  ;;  %1878 = vmatpush2.msra.mxu1 %v1594_v9  ;;  %v1550_v5 = vld [vmem:[#allocation17 + $0xe40] sm:$0xff]  ;;  %v1419_v6 = vld [vmem:[#allocation17 + $0xa28] sm:$0xff]  ;;  %v789_v8 = vrot.slane %v3229_v0, %v788_v60  ;;  %v797_v9 = vrot.slane %v3229_v0, %v796_v62  ;;  %v1157_v0 = vld [vmem:[#allocation17 + $0x1f8] sm:$0xff] }
 0x42e   :  { %1808 = vmatprep.subr.mxu0 %v1463_v10  ;;  %1879 = vmatprep.subr.mxu1 %v1591_v11  ;;  %v1547_v7 = vld [vmem:[#allocation17 + $0xe28] sm:$0xff]  ;;  %v1418_v10 = vld [vmem:[#allocation17 + $0xa20] sm:$0xff]  ;;  %v1252_v60 = vld [vmem:[#allocation17 + $0x4f0] sm:$0xff] }
 0x42f   :  { %1809 = vmatpush2.msra.mxu0 %v1462_v13  ;;  %1880 = vmatpush2.msra.mxu1 %v1590_v14  ;;  %v1546_v11 = vld [vmem:[#allocation17 + $0xe20] sm:$0xff]  ;;  %v1415_v13 = vld [vmem:[#allocation17 + $0xa08] sm:$0xff]  ;;  %v1121_v62 = vld [vmem:[#allocation17 + $0xd8] sm:$0xff] }
 0x430   :  { %1810 = vmatprep.subr.mxu0 %v1459_v15  ;;  %1881 = vmatprep.subr.mxu1 %v1587_v16  ;;  %v1543_v14 = vld [vmem:[#allocation17 + $0xe08] sm:$0xff]  ;;  %v1414_v15 = vld [vmem:[#allocation17 + $0xa00] sm:$0xff] }
 0x431   :  { %1811 = vmatpush2.msra.mxu0 %v1458_v17  ;;  %1882 = vmatpush2.msra.mxu1 %v1586_v18  ;;  %v1542_v16 = vld [vmem:[#allocation17 + $0xe00] sm:$0xff]  ;;  %v3271_v17 = vadd.f32 %v3256_v47, %v789_v8  ;;  %v3274_v18 = vadd.f32 %v3258_v48, %v797_v9  ;;  %v1281_v47 = vld [vmem:[#allocation17 + $0x5d8] sm:$0xff]  ;;  %v1152_v48 = vld [vmem:[#allocation17 + $0x1d0] sm:$0xff] }
 0x432   :  { %1812 = vmatprep.subr.mxu0 %v1455_v19  ;;  %1883 = vmatprep.subr.mxu1 %v1583_v20  ;;  %v1285_v19 = vld [vmem:[#allocation17 + $0x5f8] sm:$0xff]  ;;  %v1156_v20 = vld [vmem:[#allocation17 + $0x1f0] sm:$0xff] }
 0x433   :  { %1813 = vmatpush2.msra.mxu0 %v1454_v21  ;;  %1884 = vmatpush2.msra.mxu1 %v1582_v22  ;;  %v1284_v21 = vld [vmem:[#allocation17 + $0x5f0] sm:$0xff]  ;;  %v1153_v22 = vld [vmem:[#allocation17 + $0x1d8] sm:$0xff] }
 0x434   :  { %1814 = vmatprep.subr.mxu0 %v1451_v23  ;;  %1885 = vmatprep.subr.mxu1 %v1579_v24  ;;  %v1280_v23 = vld [vmem:[#allocation17 + $0x5d0] sm:$0xff]  ;;  %v1149_v24 = vld [vmem:[#allocation17 + $0x1b8] sm:$0xff] }
 0x435   :  { %1815 = vmatpush2.msra.mxu0 %v1450_v25  ;;  %1886 = vmatpush2.msra.mxu1 %v1578_v26  ;;  %v1277_v25 = vld [vmem:[#allocation17 + $0x5b8] sm:$0xff]  ;;  %v1148_v26 = vld [vmem:[#allocation17 + $0x1b0] sm:$0xff] }
 0x436   :  { %1816 = vmatprep.subr.mxu0 %v1447_v28  ;;  %1887 = vmatprep.subr.mxu1 %v1575_v29  ;;  %v1276_v28 = vld [vmem:[#allocation17 + $0x5b0] sm:$0xff]  ;;  %v1145_v29 = vld [vmem:[#allocation17 + $0x198] sm:$0xff] }
 0x437   :  { %1817 = vmatpush2.msra.mxu0 %v1446_v12  ;;  %1888 = vmatpush2.msra.mxu1 %v1574_v30  ;;  %v1273_v12 = vld [vmem:[#allocation17 + $0x598] sm:$0xff]  ;;  %v1144_v30 = vld [vmem:[#allocation17 + $0x190] sm:$0xff] }
 0x438   :  { %1818 = vmatprep.subr.mxu0 %v1443_v31  ;;  %1889 = vmatprep.subr.mxu1 %v1571_v32  ;;  %v1272_v31 = vld [vmem:[#allocation17 + $0x590] sm:$0xff]  ;;  %v1269_v32 = vld [vmem:[#allocation17 + $0x578] sm:$0xff] }
 0x439   :  { %1819 = vmatpush2.msra.mxu0 %v1442_v33  ;;  %1890 = vmatpush2.msra.mxu1 %v1570_v34  ;;  %v1268_v33 = vld [vmem:[#allocation17 + $0x570] sm:$0xff]  ;;  %v1137_v34 = vld [vmem:[#allocation17 + $0x158] sm:$0xff] }
 0x43a   :  { %1820 = vmatprep.subr.mxu0 %v1439_v39  ;;  %1891 = vmatprep.subr.mxu1 %v1567_v40  ;;  %v1265_v39 = vld [vmem:[#allocation17 + $0x558] sm:$0xff]  ;;  %v1136_v40 = vld [vmem:[#allocation17 + $0x150] sm:$0xff] }
 0x43b   :  { %1821 = vmatpush2.msra.mxu0 %v1438_v41  ;;  %1892 = vmatpush2.msra.mxu1 %v1566_v42  ;;  %v1264_v41 = vld [vmem:[#allocation17 + $0x550] sm:$0xff]  ;;  %v1133_v42 = vld [vmem:[#allocation17 + $0x138] sm:$0xff] }
 0x43c   :  { %1822 = vmatprep.subr.mxu0 %v1435_v43  ;;  %1893 = vmatprep.subr.mxu1 %v1563_v44  ;;  %v1261_v43 = vld [vmem:[#allocation17 + $0x538] sm:$0xff]  ;;  %v1132_v44 = vld [vmem:[#allocation17 + $0x130] sm:$0xff] }
 0x43d   :  { %1823 = vmatpush2.msra.mxu0 %v1434_v45  ;;  %1894 = vmatpush2.msra.mxu1 %v1562_v46  ;;  %v1260_v45 = vld [vmem:[#allocation17 + $0x530] sm:$0xff]  ;;  %v1129_v46 = vld [vmem:[#allocation17 + $0x118] sm:$0xff] }
 0x43e   :  { %1824 = vmatprep.subr.mxu0 %v1431_v51  ;;  %1895 = vmatprep.subr.mxu1 %v1559_v52  ;;  %v1257_v51 = vld [vmem:[#allocation17 + $0x518] sm:$0xff]  ;;  %v1128_v52 = vld [vmem:[#allocation17 + $0x110] sm:$0xff] }
 0x43f   :  { %1825 = vmatpush2.msra.mxu0 %v1430_v53  ;;  %1896 = vmatpush2.msra.mxu1 %v1558_v55  ;;  %v1256_v53 = vld [vmem:[#allocation17 + $0x510] sm:$0xff]  ;;  %v1125_v55 = vld [vmem:[#allocation17 + $0xf8] sm:$0xff] }
 0x440   :  { %1826 = vmatprep.subr.mxu0 %v1427_v56  ;;  %1897 = vmatprep.subr.mxu1 %v1555_v57  ;;  %v1253_v56 = vld [vmem:[#allocation17 + $0x4f8] sm:$0xff]  ;;  %v1124_v57 = vld [vmem:[#allocation17 + $0xf0] sm:$0xff] }
 0x441   :  { %1827 = vmatpush2.msra.mxu0 %v1426_v63  ;;  %1898 = vmatpush2.msra.mxu1 %v1554_v1  ;;  %v1249_v63 = vld [vmem:[#allocation17 + $0x4d8] sm:$0xff]  ;;  %v1120_v1 = vld [vmem:[#allocation17 + $0xd0] sm:$0xff] }
 0x442   :  { %1828 = vmatprep.subr.mxu0 %v1423_v2  ;;  %1899 = vmatprep.subr.mxu1 %v1551_v3  ;;  %v1248_v2 = vld [vmem:[#allocation17 + $0x4d0] sm:$0xff]  ;;  %v1117_v3 = vld [vmem:[#allocation17 + $0xb8] sm:$0xff] }
 0x443   :  { %1829 = vmatpush2.msra.mxu0 %v1422_v4  ;;  %1900 = vmatpush2.msra.mxu1 %v1550_v5  ;;  %v1245_v4 = vld [vmem:[#allocation17 + $0x4b8] sm:$0xff]  ;;  %v1116_v5 = vld [vmem:[#allocation17 + $0xb0] sm:$0xff] }
 0x444   :  { %1830 = vmatprep.subr.mxu0 %v1419_v6  ;;  %1901 = vmatprep.subr.mxu1 %v1547_v7  ;;  %v1244_v6 = vld [vmem:[#allocation17 + $0x4b0] sm:$0xff]  ;;  %v1113_v7 = vld [vmem:[#allocation17 + $0x98] sm:$0xff] }
 0x445   :  { %1831 = vmatpush2.msra.mxu0 %v1418_v10  ;;  %1902 = vmatpush2.msra.mxu1 %v1546_v11  ;;  %v1241_v8 = vld [vmem:[#allocation17 + $0x498] sm:$0xff]  ;;  %v1112_v9 = vld [vmem:[#allocation17 + $0x90] sm:$0xff] }
 0x446   :  { %1832 = vmatprep.subr.mxu0 %v1415_v13  ;;  %1903 = vmatprep.subr.mxu1 %v1543_v14  ;;  %v1240_v10 = vld [vmem:[#allocation17 + $0x490] sm:$0xff]  ;;  %v1109_v11 = vld [vmem:[#allocation17 + $0x78] sm:$0xff] }
 0x447   :  { %1833 = vmatpush2.msra.mxu0 %v1414_v15  ;;  %1904 = vmatpush2.msra.mxu1 %v1542_v16  ;;  %v1237_v13 = vld [vmem:[#allocation17 + $0x478] sm:$0xff]  ;;  %v1108_v14 = vld [vmem:[#allocation17 + $0x70] sm:$0xff] }
 0x448   :  { %1835 = vmatmul.mubr.f32.vlgmr.msra.gmra.mxu0 %v3271_v17  ;;  %1906 = vmatmul.mubr.f32.vlgmr.msra.gmra.mxu1 %v3274_v18  ;;  %v1236_v15 = vld [vmem:[#allocation17 + $0x470] sm:$0xff]  ;;  %v1105_v16 = vld [vmem:[#allocation17 + $0x58] sm:$0xff] }
 0x449   :  { %1912 = vmatprep.subr.mxu0 %v1157_v0  ;;  %1983 = vmatprep.subr.mxu1 %v1285_v19  ;;  %v1233_v0 = vld [vmem:[#allocation17 + $0x458] sm:$0xff]  ;;  %v1104_v19 = vld [vmem:[#allocation17 + $0x50] sm:$0xff] }
 0x44a   :  { %1913 = vmatpush1.msra.mxu0 %v1156_v20  ;;  %1976 = vmatprep.mubr.f32.mxu0 %v3240_v35  ;;  %v1141_v35 = vld [vmem:[#allocation17 + $0x178] sm:$0xff]  ;;  %v1232_v20 = vld [vmem:[#allocation17 + $0x450] sm:$0xff] }
 0x44b   :  { %1984 = vmatpush1.msra.mxu1 %v1284_v21  ;;  %2047 = vmatprep.mubr.f32.mxu1 %v3242_v36  ;;  %v1140_v36 = vld [vmem:[#allocation17 + $0x170] sm:$0xff]  ;;  %v1101_v21 = vld [vmem:[#allocation17 + $0x38] sm:$0xff] }
 0x44c   :  { %1914 = vmatprep.subr.mxu0 %v1153_v22  ;;  %1985 = vmatprep.subr.mxu1 %v1281_v47  ;;  %v1229_v22 = vld [vmem:[#allocation17 + $0x438] sm:$0xff]  ;;  %v1100_v47 = vld [vmem:[#allocation17 + $0x30] sm:$0xff] }
 0x44d   :  { %1915 = vmatpush1.msra.mxu0 %v1152_v48  ;;  %1986 = vmatpush1.msra.mxu1 %v1280_v23  ;;  %v1228_v48 = vld [vmem:[#allocation17 + $0x430] sm:$0xff]  ;;  %v1097_v23 = vld [vmem:[#allocation17 + $0x18] sm:$0xff] }
 0x44e   :  { %1916 = vmatprep.subr.mxu0 %v1149_v24  ;;  %1987 = vmatprep.subr.mxu1 %v1277_v25  ;;  %v1225_v24 = vld [vmem:[#allocation17 + $0x418] sm:$0xff]  ;;  %v1096_v25 = vld [vmem:[#allocation17 + $0x10] sm:$0xff] }
 0x44f   :  { %1917 = vmatpush1.msra.mxu0 %v1148_v26  ;;  %1988 = vmatpush1.msra.mxu1 %v1276_v28  ;;  %v1224_v26 = vld [vmem:[#allocation17 + $0x410] sm:$0xff]  ;;  %v1221_v28 = vld [vmem:[#allocation17 + $0x3f8] sm:$0xff] }
 0x450   :  { %1918 = vmatprep.subr.mxu0 %v1145_v29  ;;  %1989 = vmatprep.subr.mxu1 %v1273_v12  ;;  %v1349_v29 = vld [vmem:[#allocation17 + $0x7f8] sm:$0xff]  ;;  %v1220_v12 = vld [vmem:[#allocation17 + $0x3f0] sm:$0xff] }
 0x451   :  { %1919 = vmatpush1.msra.mxu0 %v1144_v30  ;;  %1990 = vmatpush1.msra.mxu1 %v1272_v31  ;;  %v1348_v30 = vld [vmem:[#allocation17 + $0x7f0] sm:$0xff]  ;;  %v1217_v31 = vld [vmem:[#allocation17 + $0x3d8] sm:$0xff] }
 0x452   :  { %1920 = vmatprep.subr.mxu0 %v1141_v35  ;;  %1991 = vmatprep.subr.mxu1 %v1269_v32  ;;  %v1345_v35 = vld [vmem:[#allocation17 + $0x7d8] sm:$0xff]  ;;  %v1216_v32 = vld [vmem:[#allocation17 + $0x3d0] sm:$0xff] }
 0x453   :  { %1921 = vmatpush1.msra.mxu0 %v1140_v36  ;;  %1992 = vmatpush1.msra.mxu1 %v1268_v33  ;;  %v1344_v36 = vld [vmem:[#allocation17 + $0x7d0] sm:$0xff]  ;;  %v1213_v33 = vld [vmem:[#allocation17 + $0x3b8] sm:$0xff] }
 0x454   :  { %1922 = vmatprep.subr.mxu0 %v1137_v34  ;;  %1993 = vmatprep.subr.mxu1 %v1265_v39  ;;  %v1341_v34 = vld [vmem:[#allocation17 + $0x7b8] sm:$0xff]  ;;  %v1212_v39 = vld [vmem:[#allocation17 + $0x3b0] sm:$0xff] }
 0x455   :  { %1923 = vmatpush1.msra.mxu0 %v1136_v40  ;;  %1994 = vmatpush1.msra.mxu1 %v1264_v41  ;;  %v1340_v40 = vld [vmem:[#allocation17 + $0x7b0] sm:$0xff]  ;;  %v1209_v41 = vld [vmem:[#allocation17 + $0x398] sm:$0xff] }
 0x456   :  { %1924 = vmatprep.subr.mxu0 %v1133_v42  ;;  %1995 = vmatprep.subr.mxu1 %v1261_v43  ;;  %v1337_v42 = vld [vmem:[#allocation17 + $0x798] sm:$0xff]  ;;  %v1208_v43 = vld [vmem:[#allocation17 + $0x390] sm:$0xff] }
 0x457   :  { %1925 = vmatpush1.msra.mxu0 %v1132_v44  ;;  %1996 = vmatpush1.msra.mxu1 %v1260_v45  ;;  %v1336_v44 = vld [vmem:[#allocation17 + $0x790] sm:$0xff]  ;;  %v1205_v45 = vld [vmem:[#allocation17 + $0x378] sm:$0xff] }
 0x458   :  { %1926 = vmatprep.subr.mxu0 %v1129_v46  ;;  %1997 = vmatprep.subr.mxu1 %v1257_v51  ;;  %v1333_v46 = vld [vmem:[#allocation17 + $0x778] sm:$0xff]  ;;  %v1204_v51 = vld [vmem:[#allocation17 + $0x370] sm:$0xff] }
 0x459   :  { %1927 = vmatpush1.msra.mxu0 %v1128_v52  ;;  %1998 = vmatpush1.msra.mxu1 %v1256_v53  ;;  %v1332_v52 = vld [vmem:[#allocation17 + $0x770] sm:$0xff]  ;;  %v1201_v53 = vld [vmem:[#allocation17 + $0x358] sm:$0xff] }
 0x45a   :  { %1928 = vmatprep.subr.mxu0 %v1125_v55  ;;  %1999 = vmatprep.subr.mxu1 %v1253_v56  ;;  %v1329_v55 = vld [vmem:[#allocation17 + $0x758] sm:$0xff]  ;;  %v1200_v56 = vld [vmem:[#allocation17 + $0x350] sm:$0xff] }
 0x45b   :  { %1929 = vmatpush1.msra.mxu0 %v1124_v57  ;;  %2000 = vmatpush1.msra.mxu1 %v1252_v60  ;;  %v1328_v57 = vld [vmem:[#allocation17 + $0x750] sm:$0xff]  ;;  %v1197_v60 = vld [vmem:[#allocation17 + $0x338] sm:$0xff] }
 0x45c   :  { %1930 = vmatprep.subr.mxu0 %v1121_v62  ;;  %2001 = vmatprep.subr.mxu1 %v1249_v63  ;;  %v1325_v62 = vld [vmem:[#allocation17 + $0x738] sm:$0xff]  ;;  %v1196_v63 = vld [vmem:[#allocation17 + $0x330] sm:$0xff] }
 0x45d   :  { %1931 = vmatpush1.msra.mxu0 %v1120_v1  ;;  %2002 = vmatpush1.msra.mxu1 %v1248_v2  ;;  %v1324_v1 = vld [vmem:[#allocation17 + $0x730] sm:$0xff]  ;;  %v1193_v2 = vld [vmem:[#allocation17 + $0x318] sm:$0xff] }
 0x45e   :  { %1932 = vmatprep.subr.mxu0 %v1117_v3  ;;  %2003 = vmatprep.subr.mxu1 %v1245_v4  ;;  %v1321_v3 = vld [vmem:[#allocation17 + $0x718] sm:$0xff]  ;;  %v1192_v4 = vld [vmem:[#allocation17 + $0x310] sm:$0xff] }
 0x45f   :  { %1933 = vmatpush1.msra.mxu0 %v1116_v5  ;;  %2004 = vmatpush1.msra.mxu1 %v1244_v6  ;;  %v1320_v5 = vld [vmem:[#allocation17 + $0x710] sm:$0xff]  ;;  %v1189_v6 = vld [vmem:[#allocation17 + $0x2f8] sm:$0xff] }
 0x460   :  { %1934 = vmatprep.subr.mxu0 %v1113_v7  ;;  %2005 = vmatprep.subr.mxu1 %v1241_v8  ;;  %v1317_v7 = vld [vmem:[#allocation17 + $0x6f8] sm:$0xff]  ;;  %v1188_v8 = vld [vmem:[#allocation17 + $0x2f0] sm:$0xff] }
 0x461   :  { %1935 = vmatpush1.msra.mxu0 %v1112_v9  ;;  %2006 = vmatpush1.msra.mxu1 %v1240_v10  ;;  %v1316_v9 = vld [vmem:[#allocation17 + $0x6f0] sm:$0xff]  ;;  %v1185_v10 = vld [vmem:[#allocation17 + $0x2d8] sm:$0xff] }
 0x462   :  { %1936 = vmatprep.subr.mxu0 %v1109_v11  ;;  %2007 = vmatprep.subr.mxu1 %v1237_v13  ;;  %v1313_v11 = vld [vmem:[#allocation17 + $0x6d8] sm:$0xff]  ;;  %v1184_v13 = vld [vmem:[#allocation17 + $0x2d0] sm:$0xff] }
 0x463   :  { %1937 = vmatpush1.msra.mxu0 %v1108_v14  ;;  %2008 = vmatpush1.msra.mxu1 %v1236_v15  ;;  %v1312_v14 = vld [vmem:[#allocation17 + $0x6d0] sm:$0xff]  ;;  %v1181_v15 = vld [vmem:[#allocation17 + $0x2b8] sm:$0xff] }
 0x464   :  { %1938 = vmatprep.subr.mxu0 %v1105_v16  ;;  %2009 = vmatprep.subr.mxu1 %v1233_v0  ;;  %v1309_v16 = vld [vmem:[#allocation17 + $0x6b8] sm:$0xff]  ;;  %v1180_v0 = vld [vmem:[#allocation17 + $0x2b0] sm:$0xff] }
 0x465   :  { %1939 = vmatpush1.msra.mxu0 %v1104_v19  ;;  %2010 = vmatpush1.msra.mxu1 %v1232_v20  ;;  %v1308_v19 = vld [vmem:[#allocation17 + $0x6b0] sm:$0xff]  ;;  %v1177_v20 = vld [vmem:[#allocation17 + $0x298] sm:$0xff] }
 0x466   :  { %1940 = vmatprep.subr.mxu0 %v1101_v21  ;;  %2011 = vmatprep.subr.mxu1 %v1229_v22  ;;  %v1305_v21 = vld [vmem:[#allocation17 + $0x698] sm:$0xff]  ;;  %v1176_v22 = vld [vmem:[#allocation17 + $0x290] sm:$0xff] }
 0x467   :  { %1941 = vmatpush1.msra.mxu0 %v1100_v47  ;;  %2012 = vmatpush1.msra.mxu1 %v1228_v48  ;;  %v1304_v47 = vld [vmem:[#allocation17 + $0x690] sm:$0xff]  ;;  %v1173_v48 = vld [vmem:[#allocation17 + $0x278] sm:$0xff] }
 0x468   :  { %1942 = vmatprep.subr.mxu0 %v1097_v23  ;;  %2013 = vmatprep.subr.mxu1 %v1225_v24  ;;  %v1301_v23 = vld [vmem:[#allocation17 + $0x678] sm:$0xff]  ;;  %v1172_v24 = vld [vmem:[#allocation17 + $0x270] sm:$0xff] }
 0x469   :  { %1943 = vmatpush1.msra.mxu0 %v1096_v25  ;;  %2014 = vmatpush1.msra.mxu1 %v1224_v26  ;;  %v1300_v25 = vld [vmem:[#allocation17 + $0x670] sm:$0xff]  ;;  %v1169_v26 = vld [vmem:[#allocation17 + $0x258] sm:$0xff] }
 0x46a   :  { %1944 = vmatprep.subr.mxu0 %v1221_v28  ;;  %2015 = vmatprep.subr.mxu1 %v1349_v29  ;;  %v1297_v28 = vld [vmem:[#allocation17 + $0x658] sm:$0xff]  ;;  %v1168_v29 = vld [vmem:[#allocation17 + $0x250] sm:$0xff] }
 0x46b   :  { %1945 = vmatpush2.msra.mxu0 %v1220_v12  ;;  %2016 = vmatpush2.msra.mxu1 %v1348_v30  ;;  %v1296_v12 = vld [vmem:[#allocation17 + $0x650] sm:$0xff]  ;;  %v1165_v30 = vld [vmem:[#allocation17 + $0x238] sm:$0xff] }
 0x46c   :  { %1946 = vmatprep.subr.mxu0 %v1217_v31  ;;  %2017 = vmatprep.subr.mxu1 %v1345_v35  ;;  %v1293_v31 = vld [vmem:[#allocation17 + $0x638] sm:$0xff]  ;;  %v1164_v35 = vld [vmem:[#allocation17 + $0x230] sm:$0xff] }
 0x46d   :  { %1947 = vmatpush2.msra.mxu0 %v1216_v32  ;;  %2018 = vmatpush2.msra.mxu1 %v1344_v36  ;;  %v1292_v32 = vld [vmem:[#allocation17 + $0x630] sm:$0xff]  ;;  %v1161_v36 = vld [vmem:[#allocation17 + $0x218] sm:$0xff] }
 0x46e   :  { %1948 = vmatprep.subr.mxu0 %v1213_v33  ;;  %2019 = vmatprep.subr.mxu1 %v1341_v34  ;;  %v1289_v33 = vld [vmem:[#allocation17 + $0x618] sm:$0xff]  ;;  %v1160_v34 = vld [vmem:[#allocation17 + $0x210] sm:$0xff] }
 0x46f   :  { %1949 = vmatpush2.msra.mxu0 %v1212_v39  ;;  %2020 = vmatpush2.msra.mxu1 %v1340_v40  ;;  %v1288_v39 = vld [vmem:[#allocation17 + $0x610] sm:$0xff]  ;;  %v1413_v40 = vld [vmem:[#allocation17 + $0x9f8] sm:$0xff] }
 0x470   :  { %1950 = vmatprep.subr.mxu0 %v1209_v41  ;;  %2021 = vmatprep.subr.mxu1 %v1337_v42  ;;  %v1541_v41 = vld [vmem:[#allocation17 + $0xdf8] sm:$0xff]  ;;  %v1412_v42 = vld [vmem:[#allocation17 + $0x9f0] sm:$0xff] }
 0x471   :  { %1951 = vmatpush2.msra.mxu0 %v1208_v43  ;;  %2022 = vmatpush2.msra.mxu1 %v1336_v44  ;;  %v1540_v43 = vld [vmem:[#allocation17 + $0xdf0] sm:$0xff]  ;;  %v1409_v44 = vld [vmem:[#allocation17 + $0x9d8] sm:$0xff] }
 0x472   :  { %1952 = vmatprep.subr.mxu0 %v1205_v45  ;;  %2023 = vmatprep.subr.mxu1 %v1333_v46  ;;  %v1537_v45 = vld [vmem:[#allocation17 + $0xdd8] sm:$0xff]  ;;  %v1408_v46 = vld [vmem:[#allocation17 + $0x9d0] sm:$0xff] }
 0x473   :  { %1953 = vmatpush2.msra.mxu0 %v1204_v51  ;;  %2024 = vmatpush2.msra.mxu1 %v1332_v52  ;;  %v1536_v51 = vld [vmem:[#allocation17 + $0xdd0] sm:$0xff]  ;;  %v1405_v52 = vld [vmem:[#allocation17 + $0x9b8] sm:$0xff] }
 0x474   :  { %1954 = vmatprep.subr.mxu0 %v1201_v53  ;;  %2025 = vmatprep.subr.mxu1 %v1329_v55  ;;  %v1533_v53 = vld [vmem:[#allocation17 + $0xdb8] sm:$0xff]  ;;  %v1532_v55 = vld [vmem:[#allocation17 + $0xdb0] sm:$0xff] }
 0x475   :  { %1955 = vmatpush2.msra.mxu0 %v1200_v56  ;;  %2026 = vmatpush2.msra.mxu1 %v1328_v57  ;;  %v1529_v56 = vld [vmem:[#allocation17 + $0xd98] sm:$0xff]  ;;  %v1400_v57 = vld [vmem:[#allocation17 + $0x990] sm:$0xff] }
 0x476   :  { %1956 = vmatprep.subr.mxu0 %v1197_v60  ;;  %2027 = vmatprep.subr.mxu1 %v1325_v62  ;;  %v1528_v60 = vld [vmem:[#allocation17 + $0xd90] sm:$0xff]  ;;  %v1525_v62 = vld [vmem:[#allocation17 + $0xd78] sm:$0xff] }
 0x477   :  { %1957 = vmatpush2.msra.mxu0 %v1196_v63  ;;  %2028 = vmatpush2.msra.mxu1 %v1324_v1  ;;  %v1524_v63 = vld [vmem:[#allocation17 + $0xd70] sm:$0xff]  ;;  %v1393_v1 = vld [vmem:[#allocation17 + $0x958] sm:$0xff] }
 0x478   :  { %1958 = vmatprep.subr.mxu0 %v1193_v2  ;;  %2029 = vmatprep.subr.mxu1 %v1321_v3  ;;  %v1521_v2 = vld [vmem:[#allocation17 + $0xd58] sm:$0xff]  ;;  %v1392_v3 = vld [vmem:[#allocation17 + $0x950] sm:$0xff] }
 0x479   :  { %1959 = vmatpush2.msra.mxu0 %v1192_v4  ;;  %2030 = vmatpush2.msra.mxu1 %v1320_v5  ;;  %v1520_v4 = vld [vmem:[#allocation17 + $0xd50] sm:$0xff]  ;;  %v1389_v5 = vld [vmem:[#allocation17 + $0x938] sm:$0xff] }
 0x47a   :  { %1960 = vmatprep.subr.mxu0 %v1189_v6  ;;  %2031 = vmatprep.subr.mxu1 %v1317_v7  ;;  %v1517_v6 = vld [vmem:[#allocation17 + $0xd38] sm:$0xff]  ;;  %v1388_v7 = vld [vmem:[#allocation17 + $0x930] sm:$0xff] }
 0x47b   :  { %1961 = vmatpush2.msra.mxu0 %v1188_v8  ;;  %2032 = vmatpush2.msra.mxu1 %v1316_v9  ;;  %v1516_v8 = vld [vmem:[#allocation17 + $0xd30] sm:$0xff]  ;;  %v1385_v9 = vld [vmem:[#allocation17 + $0x918] sm:$0xff] }
 0x47c   :  { %1962 = vmatprep.subr.mxu0 %v1185_v10  ;;  %2033 = vmatprep.subr.mxu1 %v1313_v11  ;;  %v1513_v10 = vld [vmem:[#allocation17 + $0xd18] sm:$0xff]  ;;  %v1384_v11 = vld [vmem:[#allocation17 + $0x910] sm:$0xff] }
 0x47d   :  { %1963 = vmatpush2.msra.mxu0 %v1184_v13  ;;  %2034 = vmatpush2.msra.mxu1 %v1312_v14  ;;  %v1512_v13 = vld [vmem:[#allocation17 + $0xd10] sm:$0xff]  ;;  %v1381_v14 = vld [vmem:[#allocation17 + $0x8f8] sm:$0xff] }
 0x47e   :  { %1964 = vmatprep.subr.mxu0 %v1181_v15  ;;  %2035 = vmatprep.subr.mxu1 %v1309_v16  ;;  %v1509_v15 = vld [vmem:[#allocation17 + $0xcf8] sm:$0xff]  ;;  %v1380_v16 = vld [vmem:[#allocation17 + $0x8f0] sm:$0xff] }
 0x47f   :  { %1965 = vmatpush2.msra.mxu0 %v1180_v0  ;;  %2036 = vmatpush2.msra.mxu1 %v1308_v19  ;;  %v1508_v0 = vld [vmem:[#allocation17 + $0xcf0] sm:$0xff]  ;;  %v1377_v19 = vld [vmem:[#allocation17 + $0x8d8] sm:$0xff] }
 0x480   :  { %1966 = vmatprep.subr.mxu0 %v1177_v20  ;;  %2037 = vmatprep.subr.mxu1 %v1305_v21  ;;  %v1505_v20 = vld [vmem:[#allocation17 + $0xcd8] sm:$0xff]  ;;  %v1376_v21 = vld [vmem:[#allocation17 + $0x8d0] sm:$0xff] }
 0x481   :  { %1967 = vmatpush2.msra.mxu0 %v1176_v22  ;;  %2038 = vmatpush2.msra.mxu1 %v1304_v47  ;;  %v1504_v22 = vld [vmem:[#allocation17 + $0xcd0] sm:$0xff]  ;;  %v1373_v47 = vld [vmem:[#allocation17 + $0x8b8] sm:$0xff] }
 0x482   :  { %1968 = vmatprep.subr.mxu0 %v1173_v48  ;;  %2039 = vmatprep.subr.mxu1 %v1301_v23  ;;  %v1501_v48 = vld [vmem:[#allocation17 + $0xcb8] sm:$0xff]  ;;  %v1372_v23 = vld [vmem:[#allocation17 + $0x8b0] sm:$0xff] }
 0x483   :  { %1969 = vmatpush2.msra.mxu0 %v1172_v24  ;;  %2040 = vmatpush2.msra.mxu1 %v1300_v25  ;;  %v1500_v24 = vld [vmem:[#allocation17 + $0xcb0] sm:$0xff]  ;;  %v1369_v25 = vld [vmem:[#allocation17 + $0x898] sm:$0xff] }
 0x484   :  { %1970 = vmatprep.subr.mxu0 %v1169_v26  ;;  %2041 = vmatprep.subr.mxu1 %v1297_v28  ;;  %v1497_v26 = vld [vmem:[#allocation17 + $0xc98] sm:$0xff]  ;;  %v1368_v28 = vld [vmem:[#allocation17 + $0x890] sm:$0xff] }
 0x485   :  { %1971 = vmatpush2.msra.mxu0 %v1168_v29  ;;  %2042 = vmatpush2.msra.mxu1 %v1296_v12  ;;  %v1496_v29 = vld [vmem:[#allocation17 + $0xc90] sm:$0xff]  ;;  %v1365_v12 = vld [vmem:[#allocation17 + $0x878] sm:$0xff] }
 0x486   :  { %1972 = vmatprep.subr.mxu0 %v1165_v30  ;;  %2043 = vmatprep.subr.mxu1 %v1293_v31  ;;  %v1493_v30 = vld [vmem:[#allocation17 + $0xc78] sm:$0xff]  ;;  %v1364_v31 = vld [vmem:[#allocation17 + $0x870] sm:$0xff] }
 0x487   :  { %1973 = vmatpush2.msra.mxu0 %v1164_v35  ;;  %2044 = vmatpush2.msra.mxu1 %v1292_v32  ;;  %v1492_v35 = vld [vmem:[#allocation17 + $0xc70] sm:$0xff]  ;;  %v1361_v32 = vld [vmem:[#allocation17 + $0x858] sm:$0xff] }
 0x488   :  { %1974 = vmatprep.subr.mxu0 %v1161_v36  ;;  %2045 = vmatprep.subr.mxu1 %v1289_v33  ;;  %v1489_v36 = vld [vmem:[#allocation17 + $0xc58] sm:$0xff]  ;;  %v1360_v33 = vld [vmem:[#allocation17 + $0x850] sm:$0xff] }
 0x489   :  { %1975 = vmatpush2.msra.mxu0 %v1160_v34  ;;  %2046 = vmatpush2.msra.mxu1 %v1288_v39  ;;  %v1488_v34 = vld [vmem:[#allocation17 + $0xc50] sm:$0xff]  ;;  %v1357_v39 = vld [vmem:[#allocation17 + $0x838] sm:$0xff] }
 0x48a   :  { %1977 = vmatmul.mubr.f32.vlgmr.msra.gmra.mxu0 %v3244_v37  ;;  %2048 = vmatmul.mubr.f32.vlgmr.msra.gmra.mxu1 %v3246_v38  ;;  %v1404_v37 = vld [vmem:[#allocation17 + $0x9b0] sm:$0xff]  ;;  %v1401_v38 = vld [vmem:[#allocation17 + $0x998] sm:$0xff] }
 0x48b   :  { %2054 = vmatprep.subr.mxu0 %v1413_v40  ;;  %2125 = vmatprep.subr.mxu1 %v1541_v41  ;;  %v1485_v40 = vld [vmem:[#allocation17 + $0xc38] sm:$0xff]  ;;  %v1356_v41 = vld [vmem:[#allocation17 + $0x830] sm:$0xff] }
 0x48c   :  { %2055 = vmatpush1.msra.mxu0 %v1412_v42  ;;  %2118 = vmatprep.mubr.f32.mxu0 %v3260_v58  ;;  %v1397_v58 = vld [vmem:[#allocation17 + $0x978] sm:$0xff]  ;;  %v1484_v42 = vld [vmem:[#allocation17 + $0xc30] sm:$0xff] }
 0x48d   :  { %2126 = vmatpush1.msra.mxu1 %v1540_v43  ;;  %2189 = vmatprep.mubr.f32.mxu1 %v3262_v59  ;;  %v1396_v59 = vld [vmem:[#allocation17 + $0x970] sm:$0xff]  ;;  %v1353_v43 = vld [vmem:[#allocation17 + $0x818] sm:$0xff] }
 0x48e   :  { %2056 = vmatprep.subr.mxu0 %v1409_v44  ;;  %2127 = vmatprep.subr.mxu1 %v1537_v45  ;;  %v1481_v44 = vld [vmem:[#allocation17 + $0xc18] sm:$0xff]  ;;  %v1352_v45 = vld [vmem:[#allocation17 + $0x810] sm:$0xff] }
 0x48f   :  { %2057 = vmatpush1.msra.mxu0 %v1408_v46  ;;  %2128 = vmatpush1.msra.mxu1 %v1536_v51  ;;  %v1480_v46 = vld [vmem:[#allocation17 + $0xc10] sm:$0xff]  ;;  %v1477_v51 = vld [vmem:[#allocation17 + $0xbf8] sm:$0xff] }
 0x490   :  { %2058 = vmatprep.subr.mxu0 %v1405_v52  ;;  %2129 = vmatprep.subr.mxu1 %v1533_v53  ;;  %v1605_v52 = vld [vmem:[#allocation17 + $0xff8] sm:$0xff]  ;;  %v1476_v53 = vld [vmem:[#allocation17 + $0xbf0] sm:$0xff] }
 0x491   :  { %2059 = vmatpush1.msra.mxu0 %v1404_v37  ;;  %2130 = vmatpush1.msra.mxu1 %v1532_v55  ;;  %v1604_v37 = vld [vmem:[#allocation17 + $0xff0] sm:$0xff]  ;;  %v1473_v55 = vld [vmem:[#allocation17 + $0xbd8] sm:$0xff] }
 0x492   :  { %2060 = vmatprep.subr.mxu0 %v1401_v38  ;;  %2131 = vmatprep.subr.mxu1 %v1529_v56  ;;  %v1601_v38 = vld [vmem:[#allocation17 + $0xfd8] sm:$0xff]  ;;  %v1472_v56 = vld [vmem:[#allocation17 + $0xbd0] sm:$0xff] }
 0x493   :  { %2061 = vmatpush1.msra.mxu0 %v1400_v57  ;;  %2132 = vmatpush1.msra.mxu1 %v1528_v60  ;;  %v1600_v57 = vld [vmem:[#allocation17 + $0xfd0] sm:$0xff]  ;;  %v1469_v60 = vld [vmem:[#allocation17 + $0xbb8] sm:$0xff] }
 0x494   :  { %2062 = vmatprep.subr.mxu0 %v1397_v58  ;;  %2133 = vmatprep.subr.mxu1 %v1525_v62  ;;  %v1597_v58 = vld [vmem:[#allocation17 + $0xfb8] sm:$0xff]  ;;  %v1468_v62 = vld [vmem:[#allocation17 + $0xbb0] sm:$0xff] }
 0x495   :  { %2063 = vmatpush1.msra.mxu0 %v1396_v59  ;;  %2134 = vmatpush1.msra.mxu1 %v1524_v63  ;;  %v1596_v59 = vld [vmem:[#allocation17 + $0xfb0] sm:$0xff]  ;;  %v1465_v63 = vld [vmem:[#allocation17 + $0xb98] sm:$0xff] }
 0x496   :  { %2064 = vmatprep.subr.mxu0 %v1393_v1  ;;  %2135 = vmatprep.subr.mxu1 %v1521_v2  ;;  %v1593_v1 = vld [vmem:[#allocation17 + $0xf98] sm:$0xff]  ;;  %v1464_v2 = vld [vmem:[#allocation17 + $0xb90] sm:$0xff] }
 0x497   :  { %2065 = vmatpush1.msra.mxu0 %v1392_v3  ;;  %2136 = vmatpush1.msra.mxu1 %v1520_v4  ;;  %v1592_v3 = vld [vmem:[#allocation17 + $0xf90] sm:$0xff]  ;;  %v1461_v4 = vld [vmem:[#allocation17 + $0xb78] sm:$0xff] }
 0x498   :  { %2066 = vmatprep.subr.mxu0 %v1389_v5  ;;  %2137 = vmatprep.subr.mxu1 %v1517_v6  ;;  %v1589_v5 = vld [vmem:[#allocation17 + $0xf78] sm:$0xff]  ;;  %v1460_v6 = vld [vmem:[#allocation17 + $0xb70] sm:$0xff] }
 0x499   :  { %2067 = vmatpush1.msra.mxu0 %v1388_v7  ;;  %2138 = vmatpush1.msra.mxu1 %v1516_v8  ;;  %v1588_v7 = vld [vmem:[#allocation17 + $0xf70] sm:$0xff]  ;;  %v1457_v8 = vld [vmem:[#allocation17 + $0xb58] sm:$0xff] }
 0x49a   :  { %2068 = vmatprep.subr.mxu0 %v1385_v9  ;;  %2139 = vmatprep.subr.mxu1 %v1513_v10  ;;  %v1585_v9 = vld [vmem:[#allocation17 + $0xf58] sm:$0xff]  ;;  %v1456_v10 = vld [vmem:[#allocation17 + $0xb50] sm:$0xff] }
 0x49b   :  { %2069 = vmatpush1.msra.mxu0 %v1384_v11  ;;  %2140 = vmatpush1.msra.mxu1 %v1512_v13  ;;  %v1584_v11 = vld [vmem:[#allocation17 + $0xf50] sm:$0xff]  ;;  %v1453_v13 = vld [vmem:[#allocation17 + $0xb38] sm:$0xff] }
 0x49c   :  { %2070 = vmatprep.subr.mxu0 %v1381_v14  ;;  %2141 = vmatprep.subr.mxu1 %v1509_v15  ;;  %v1581_v14 = vld [vmem:[#allocation17 + $0xf38] sm:$0xff]  ;;  %v1452_v15 = vld [vmem:[#allocation17 + $0xb30] sm:$0xff] }
 0x49d   :  { %2071 = vmatpush1.msra.mxu0 %v1380_v16  ;;  %2142 = vmatpush1.msra.mxu1 %v1508_v0  ;;  %v1580_v16 = vld [vmem:[#allocation17 + $0xf30] sm:$0xff]  ;;  %v1449_v0 = vld [vmem:[#allocation17 + $0xb18] sm:$0xff] }
 0x49e   :  { %2072 = vmatprep.subr.mxu0 %v1377_v19  ;;  %2143 = vmatprep.subr.mxu1 %v1505_v20  ;;  %v1577_v19 = vld [vmem:[#allocation17 + $0xf18] sm:$0xff]  ;;  %v1448_v20 = vld [vmem:[#allocation17 + $0xb10] sm:$0xff] }
 0x49f   :  { %2073 = vmatpush1.msra.mxu0 %v1376_v21  ;;  %2144 = vmatpush1.msra.mxu1 %v1504_v22  ;;  %v1576_v21 = vld [vmem:[#allocation17 + $0xf10] sm:$0xff]  ;;  %v1445_v22 = vld [vmem:[#allocation17 + $0xaf8] sm:$0xff] }
 0x4a0   :  { %2074 = vmatprep.subr.mxu0 %v1373_v47  ;;  %2145 = vmatprep.subr.mxu1 %v1501_v48  ;;  %v1573_v47 = vld [vmem:[#allocation17 + $0xef8] sm:$0xff]  ;;  %v1444_v48 = vld [vmem:[#allocation17 + $0xaf0] sm:$0xff] }
 0x4a1   :  { %2075 = vmatpush1.msra.mxu0 %v1372_v23  ;;  %2146 = vmatpush1.msra.mxu1 %v1500_v24  ;;  %v1572_v23 = vld [vmem:[#allocation17 + $0xef0] sm:$0xff]  ;;  %v1441_v24 = vld [vmem:[#allocation17 + $0xad8] sm:$0xff] }
 0x4a2   :  { %2076 = vmatprep.subr.mxu0 %v1369_v25  ;;  %2147 = vmatprep.subr.mxu1 %v1497_v26  ;;  %v1569_v25 = vld [vmem:[#allocation17 + $0xed8] sm:$0xff]  ;;  %v1440_v26 = vld [vmem:[#allocation17 + $0xad0] sm:$0xff] }
 0x4a3   :  { %2077 = vmatpush1.msra.mxu0 %v1368_v28  ;;  %2148 = vmatpush1.msra.mxu1 %v1496_v29  ;;  %v1568_v28 = vld [vmem:[#allocation17 + $0xed0] sm:$0xff]  ;;  %v1437_v29 = vld [vmem:[#allocation17 + $0xab8] sm:$0xff] }
 0x4a4   :  { %2078 = vmatprep.subr.mxu0 %v1365_v12  ;;  %2149 = vmatprep.subr.mxu1 %v1493_v30  ;;  %v1565_v12 = vld [vmem:[#allocation17 + $0xeb8] sm:$0xff]  ;;  %v1436_v30 = vld [vmem:[#allocation17 + $0xab0] sm:$0xff] }
 0x4a5   :  { %2079 = vmatpush1.msra.mxu0 %v1364_v31  ;;  %2150 = vmatpush1.msra.mxu1 %v1492_v35  ;;  %v1564_v31 = vld [vmem:[#allocation17 + $0xeb0] sm:$0xff]  ;;  %v1433_v35 = vld [vmem:[#allocation17 + $0xa98] sm:$0xff] }
 0x4a6   :  { %2080 = vmatprep.subr.mxu0 %v1361_v32  ;;  %2151 = vmatprep.subr.mxu1 %v1489_v36  ;;  %v1561_v32 = vld [vmem:[#allocation17 + $0xe98] sm:$0xff]  ;;  %v1432_v36 = vld [vmem:[#allocation17 + $0xa90] sm:$0xff] }
 0x4a7   :  { %2081 = vmatpush1.msra.mxu0 %v1360_v33  ;;  %2152 = vmatpush1.msra.mxu1 %v1488_v34  ;;  %v1560_v33 = vld [vmem:[#allocation17 + $0xe90] sm:$0xff]  ;;  %v1429_v34 = vld [vmem:[#allocation17 + $0xa78] sm:$0xff] }
 0x4a8   :  { %2082 = vmatprep.subr.mxu0 %v1357_v39  ;;  %2153 = vmatprep.subr.mxu1 %v1485_v40  ;;  %v1557_v39 = vld [vmem:[#allocation17 + $0xe78] sm:$0xff]  ;;  %v1428_v40 = vld [vmem:[#allocation17 + $0xa70] sm:$0xff] }
 0x4a9   :  { %2083 = vmatpush1.msra.mxu0 %v1356_v41  ;;  %2154 = vmatpush1.msra.mxu1 %v1484_v42  ;;  %v1556_v41 = vld [vmem:[#allocation17 + $0xe70] sm:$0xff]  ;;  %v1425_v42 = vld [vmem:[#allocation17 + $0xa58] sm:$0xff] }
 0x4aa   :  { %2084 = vmatprep.subr.mxu0 %v1353_v43  ;;  %2155 = vmatprep.subr.mxu1 %v1481_v44  ;;  %v1553_v43 = vld [vmem:[#allocation17 + $0xe58] sm:$0xff]  ;;  %v1424_v44 = vld [vmem:[#allocation17 + $0xa50] sm:$0xff] }
 0x4ab   :  { %2085 = vmatpush1.msra.mxu0 %v1352_v45  ;;  %2156 = vmatpush1.msra.mxu1 %v1480_v46  ;;  %v1552_v45 = vld [vmem:[#allocation17 + $0xe50] sm:$0xff]  ;;  %v1421_v46 = vld [vmem:[#allocation17 + $0xa38] sm:$0xff] }
 0x4ac   :  { %2086 = vmatprep.subr.mxu0 %v1477_v51  ;;  %2157 = vmatprep.subr.mxu1 %v1605_v52  ;;  %v1549_v51 = vld [vmem:[#allocation17 + $0xe38] sm:$0xff]  ;;  %v1420_v52 = vld [vmem:[#allocation17 + $0xa30] sm:$0xff] }
 0x4ad   :  { %2087 = vmatpush2.msra.mxu0 %v1476_v53  ;;  %2158 = vmatpush2.msra.mxu1 %v1604_v37  ;;  %v1548_v53 = vld [vmem:[#allocation17 + $0xe30] sm:$0xff]  ;;  %v1417_v37 = vld [vmem:[#allocation17 + $0xa18] sm:$0xff] }
 0x4ae   :  { %2088 = vmatprep.subr.mxu0 %v1473_v55  ;;  %2159 = vmatprep.subr.mxu1 %v1601_v38  ;;  %v1545_v55 = vld [vmem:[#allocation17 + $0xe18] sm:$0xff]  ;;  %v1416_v38 = vld [vmem:[#allocation17 + $0xa10] sm:$0xff] }
 0x4af   :  { %2089 = vmatpush2.msra.mxu0 %v1472_v56  ;;  %2160 = vmatpush2.msra.mxu1 %v1600_v57  ;;  %v1544_v56 = vld [vmem:[#allocation17 + $0xe10] sm:$0xff]  ;;  %v2227_v57 = vld [vmem:[#allocation20 + $0xf8] sm:$0xff] }
 0x4b0   :  { %2090 = vmatprep.subr.mxu0 %v1469_v60  ;;  %2161 = vmatprep.subr.mxu1 %v1597_v58  ;;  %v2211_v60 = vld [vmem:[#allocation20 + $0x78] sm:$0xff]  ;;  %v2226_v58 = vld [vmem:[#allocation20 + $0xf0] sm:$0xff] }
 0x4b1   :  { %2091 = vmatpush2.msra.mxu0 %v1468_v62  ;;  %2162 = vmatpush2.msra.mxu1 %v1596_v59  ;;  %v2210_v62 = vld [vmem:[#allocation20 + $0x70] sm:$0xff]  ;;  %v2225_v59 = vld [vmem:[#allocation20 + $0xe8] sm:$0xff] }
 0x4b2   :  { %2092 = vmatprep.subr.mxu0 %v1465_v63  ;;  %2163 = vmatprep.subr.mxu1 %v1593_v1  ;;  %v2209_v63 = vld [vmem:[#allocation20 + $0x68] sm:$0xff]  ;;  %v2259_v1 = vld [vmem:[#allocation20 + $0x1f8] sm:$0xff] }
 0x4b3   :  { %2093 = vmatpush2.msra.mxu0 %v1464_v2  ;;  %2164 = vmatpush2.msra.mxu1 %v1592_v3  ;;  %v2243_v2 = vld [vmem:[#allocation20 + $0x178] sm:$0xff]  ;;  %v2258_v3 = vld [vmem:[#allocation20 + $0x1f0] sm:$0xff] }
 0x4b4   :  { %2094 = vmatprep.subr.mxu0 %v1461_v4  ;;  %2165 = vmatprep.subr.mxu1 %v1589_v5  ;;  %v2224_v4 = vld [vmem:[#allocation20 + $0xe0] sm:$0xff]  ;;  %v2242_v5 = vld [vmem:[#allocation20 + $0x170] sm:$0xff] }
 0x4b5   :  { %2095 = vmatpush2.msra.mxu0 %v1460_v6  ;;  %2166 = vmatpush2.msra.mxu1 %v1588_v7  ;;  %v2208_v6 = vld [vmem:[#allocation20 + $0x60] sm:$0xff]  ;;  %v2241_v7 = vld [vmem:[#allocation20 + $0x168] sm:$0xff] }
 0x4b6   :  { %2096 = vmatprep.subr.mxu0 %v1457_v8  ;;  %2167 = vmatprep.subr.mxu1 %v1585_v9  ;;  %v2207_v8 = vld [vmem:[#allocation20 + $0x58] sm:$0xff]  ;;  %v2256_v9 = vld [vmem:[#allocation20 + $0x1e0] sm:$0xff] }
 0x4b7   :  { %2097 = vmatpush2.msra.mxu0 %v1456_v10  ;;  %2168 = vmatpush2.msra.mxu1 %v1584_v11  ;;  %v2222_v10 = vld [vmem:[#allocation20 + $0xd0] sm:$0xff]  ;;  %v2240_v11 = vld [vmem:[#allocation20 + $0x160] sm:$0xff] }
 0x4b8   :  { %2098 = vmatprep.subr.mxu0 %v1453_v13  ;;  %2169 = vmatprep.subr.mxu1 %v1581_v14  ;;  %v2206_v13 = vld [vmem:[#allocation20 + $0x50] sm:$0xff]  ;;  %v2255_v14 = vld [vmem:[#allocation20 + $0x1d8] sm:$0xff] }
 0x4b9   :  { %2099 = vmatpush2.msra.mxu0 %v1452_v15  ;;  %2170 = vmatpush2.msra.mxu1 %v1580_v16  ;;  %v2221_v15 = vld [vmem:[#allocation20 + $0xc8] sm:$0xff]  ;;  %v2239_v16 = vld [vmem:[#allocation20 + $0x158] sm:$0xff] }
 0x4ba   :  { %2100 = vmatprep.subr.mxu0 %v1449_v0  ;;  %2171 = vmatprep.subr.mxu1 %v1577_v19  ;;  %v2205_v0 = vld [vmem:[#allocation20 + $0x48] sm:$0xff]  ;;  %v2254_v19 = vld [vmem:[#allocation20 + $0x1d0] sm:$0xff] }
 0x4bb   :  { %2101 = vmatpush2.msra.mxu0 %v1448_v20  ;;  %2172 = vmatpush2.msra.mxu1 %v1576_v21  ;;  %v2220_v20 = vld [vmem:[#allocation20 + $0xc0] sm:$0xff]  ;;  %v2238_v21 = vld [vmem:[#allocation20 + $0x150] sm:$0xff] }
 0x4bc   :  { %2102 = vmatprep.subr.mxu0 %v1445_v22  ;;  %2173 = vmatprep.subr.mxu1 %v1573_v47  ;;  %v2204_v22 = vld [vmem:[#allocation20 + $0x40] sm:$0xff]  ;;  %v2253_v47 = vld [vmem:[#allocation20 + $0x1c8] sm:$0xff] }
 0x4bd   :  { %2103 = vmatpush2.msra.mxu0 %v1444_v48  ;;  %2174 = vmatpush2.msra.mxu1 %v1572_v23  ;;  %v2219_v48 = vld [vmem:[#allocation20 + $0xb8] sm:$0xff]  ;;  %v2237_v23 = vld [vmem:[#allocation20 + $0x148] sm:$0xff] }
 0x4be   :  { %2104 = vmatprep.subr.mxu0 %v1441_v24  ;;  %2175 = vmatprep.subr.mxu1 %v1569_v25  ;;  %v2203_v24 = vld [vmem:[#allocation20 + $0x38] sm:$0xff]  ;;  %v2252_v25 = vld [vmem:[#allocation20 + $0x1c0] sm:$0xff] }
 0x4bf   :  { %2105 = vmatpush2.msra.mxu0 %v1440_v26  ;;  %2176 = vmatpush2.msra.mxu1 %v1568_v28  ;;  %v2218_v26 = vld [vmem:[#allocation20 + $0xb0] sm:$0xff]  ;;  %v2236_v28 = vld [vmem:[#allocation20 + $0x140] sm:$0xff] }
 0x4c0   :  { %2106 = vmatprep.subr.mxu0 %v1437_v29  ;;  %2177 = vmatprep.subr.mxu1 %v1565_v12  ;;  %v2202_v29 = vld [vmem:[#allocation20 + $0x30] sm:$0xff]  ;;  %v2251_v12 = vld [vmem:[#allocation20 + $0x1b8] sm:$0xff] }
 0x4c1   :  { %2107 = vmatpush2.msra.mxu0 %v1436_v30  ;;  %2178 = vmatpush2.msra.mxu1 %v1564_v31  ;;  %v2217_v30 = vld [vmem:[#allocation20 + $0xa8] sm:$0xff]  ;;  %v2235_v31 = vld [vmem:[#allocation20 + $0x138] sm:$0xff] }
 0x4c2   :  { %2108 = vmatprep.subr.mxu0 %v1433_v35  ;;  %2179 = vmatprep.subr.mxu1 %v1561_v32  ;;  %v2201_v35 = vld [vmem:[#allocation20 + $0x28] sm:$0xff]  ;;  %v2250_v32 = vld [vmem:[#allocation20 + $0x1b0] sm:$0xff] }
 0x4c3   :  { %2109 = vmatpush2.msra.mxu0 %v1432_v36  ;;  %2180 = vmatpush2.msra.mxu1 %v1560_v33  ;;  %v2216_v36 = vld [vmem:[#allocation20 + $0xa0] sm:$0xff]  ;;  %v2234_v33 = vld [vmem:[#allocation20 + $0x130] sm:$0xff] }
 0x4c4   :  { %2110 = vmatprep.subr.mxu0 %v1429_v34  ;;  %2181 = vmatprep.subr.mxu1 %v1557_v39  ;;  %v2200_v34 = vld [vmem:[#allocation20 + $0x20] sm:$0xff]  ;;  %v2249_v39 = vld [vmem:[#allocation20 + $0x1a8] sm:$0xff] }
 0x4c5   :  { %2111 = vmatpush2.msra.mxu0 %v1428_v40  ;;  %2182 = vmatpush2.msra.mxu1 %v1556_v41  ;;  %v2215_v40 = vld [vmem:[#allocation20 + $0x98] sm:$0xff]  ;;  %v2233_v41 = vld [vmem:[#allocation20 + $0x128] sm:$0xff] }
 0x4c6   :  { %2112 = vmatprep.subr.mxu0 %v1425_v42  ;;  %2183 = vmatprep.subr.mxu1 %v1553_v43  ;;  %v2199_v42 = vld [vmem:[#allocation20 + $0x18] sm:$0xff]  ;;  %v2248_v43 = vld [vmem:[#allocation20 + $0x1a0] sm:$0xff] }
 0x4c7   :  { %2113 = vmatpush2.msra.mxu0 %v1424_v44  ;;  %2184 = vmatpush2.msra.mxu1 %v1552_v45  ;;  %v2214_v44 = vld [vmem:[#allocation20 + $0x90] sm:$0xff]  ;;  %v2232_v45 = vld [vmem:[#allocation20 + $0x120] sm:$0xff] }
 0x4c8   :  { %2114 = vmatprep.subr.mxu0 %v1421_v46  ;;  %2185 = vmatprep.subr.mxu1 %v1549_v51  ;;  %v2198_v46 = vld [vmem:[#allocation20 + $0x10] sm:$0xff]  ;;  %v2213_v51 = vld [vmem:[#allocation20 + $0x88] sm:$0xff] }
 0x4c9   :  { %2115 = vmatpush2.msra.mxu0 %v1420_v52  ;;  %2186 = vmatpush2.msra.mxu1 %v1548_v53  ;;  %v2197_v52 = vld [vmem:[#allocation20 + $0x8] sm:$0xff]  ;;  %v2212_v53 = vld [vmem:[#allocation20 + $0x80] sm:$0xff] }
 0x4ca   :  { %2116 = vmatprep.subr.mxu0 %v1417_v37  ;;  %2187 = vmatprep.subr.mxu1 %v1545_v55  ;;  %v2196_v37 = vld [vmem:[#allocation20] sm:$0xff]  ;;  %v1606_v55 = vld [vmem:[#allocation19] sm:$0xf] }
 0x4cb   :  { %2117 = vmatpush2.msra.mxu0 %v1416_v38  ;;  %2188 = vmatpush2.msra.mxu1 %v1544_v56  ;;  %v1694_v38 = vpop.f32.mrf.mxu0  ;;  %v1611_v56 = vrot.slane %v1606_v55, %v3208_v50 }
 0x4cc   :  { %2119 = vmatmul.mubr.f32.vlgmr.msra.gmra.mxu0 %v3271_v17  ;;  %2190 = vmatmul.mubr.f32.vlgmr.msra.gmra.mxu1 %v3274_v18  ;;  %v2257_v17 = vld [vmem:[#allocation20 + $0x1e8] sm:$0xff]  ;;  %v2223_v18 = vld [vmem:[#allocation20 + $0xd8] sm:$0xff] }
 0x4cd   :  { %2495 = vmatprep.subr.mxu0 %v2227_v57  ;;  %2530 = vmatprep.subr.mxu1 %v2259_v1  ;;  %v1615_v57 = vrot.slane %v1606_v55, %v776_v27 }
 0x4ce   :  { %2496 = vmatpush3.msra.mxu0 %v2211_v60  ;;  %2531 = vmatpush3.msra.mxu1 %v2243_v2  ;;  %v1765_v60 = vpop.f32.mrf.mxu1 }
 0x4cf   :  { %2497 = vmatprep.subr.mxu0 %v2226_v58  ;;  %2532 = vmatprep.subr.mxu1 %v2258_v3  ;;  %v1696_v58 = vpop.f32.mrf.mxu0 }
 0x4d0   :  { %2498 = vmatpush3.msra.mxu0 %v2210_v62  ;;  %2533 = vmatpush3.msra.mxu1 %v2242_v5  ;;  %v1695_v62 = vadd.f32 %v1694_v38, %v1611_v56 }
 0x4d1   :  { %2499 = vmatprep.subr.mxu0 %v2225_v59  ;;  %2534 = vmatprep.subr.mxu1 %v2257_v17  ;;  %v1697_v59 = vadd.f32 %v1696_v58, %v1615_v57 }
 0x4d2   :  { %2500 = vmatpush3.msra.mxu0 %v2209_v63  ;;  %2535 = vmatpush3.msra.mxu1 %v2241_v7  ;;  %v1767_v63 = vpop.f32.mrf.mxu1  ;;  %v1766_v1 = vadd.f32 %v1765_v60, %v1695_v62 }
 0x4d3   :  { %2501 = vmatprep.subr.mxu0 %v2224_v4  ;;  %2536 = vmatprep.subr.mxu1 %v2256_v9  ;;  %v1768_v4 = vadd.f32 %v1767_v63, %v1697_v59  ;;  %v2230_v9 = vld [vmem:[#allocation20 + $0x110] sm:$0xff] }
 0x4d4   :  { %2502 = vmatpush3.msra.mxu0 %v2208_v6  ;;  %2537 = vmatpush3.msra.mxu1 %v2240_v11  ;;  %v2229_v11 = vld [vmem:[#allocation20 + $0x108] sm:$0xff] }
 0x4d5   :  { %2503 = vmatprep.subr.mxu0 %v2223_v18  ;;  %2538 = vmatprep.subr.mxu1 %v2255_v14  ;;  %v2247_v18 = vld [vmem:[#allocation20 + $0x198] sm:$0xff]  ;;  %v2228_v14 = vld [vmem:[#allocation20 + $0x100] sm:$0xff] }
 0x4d6   :  { %2504 = vmatpush3.msra.mxu0 %v2207_v8  ;;  %2539 = vmatpush3.msra.mxu1 %v2239_v16  ;;  %v2231_v8 = vld [vmem:[#allocation20 + $0x118] sm:$0xff]  ;;  %v1619_v16 = vrot.slane %v1606_v55, %v3216_v61 }
 0x4d7   :  { %2505 = vmatprep.subr.mxu0 %v2222_v10  ;;  %2540 = vmatprep.subr.mxu1 %v2254_v19  ;;  %v2245_v10 = vld [vmem:[#allocation20 + $0x188] sm:$0xff] }
 0x4d8   :  { %2506 = vmatpush3.msra.mxu0 %v2206_v13  ;;  %2541 = vmatpush3.msra.mxu1 %v2238_v21  ;;  %v2244_v13 = vld [vmem:[#allocation20 + $0x180] sm:$0xff] }
 0x4d9   :  { %2507 = vmatprep.subr.mxu0 %v2221_v15  ;;  %2542 = vmatprep.subr.mxu1 %v2253_v47 }
 0x4da   :  { %2508 = vmatpush3.msra.mxu0 %v2205_v0  ;;  %2543 = vmatpush3.msra.mxu1 %v2237_v23  ;;  %v1623_v0 = vrot.slane %v1606_v55, %v3212_v54 }
 0x4db   :  { %2509 = vmatprep.subr.mxu0 %v2220_v20  ;;  %2544 = vmatprep.subr.mxu1 %v2252_v25 }
 0x4dc   :  { %2510 = vmatpush3.msra.mxu0 %v2204_v22  ;;  %2545 = vmatpush3.msra.mxu1 %v2236_v28 }
 0x4dd   :  { %2511 = vmatprep.subr.mxu0 %v2219_v48  ;;  %2546 = vmatprep.subr.mxu1 %v2251_v12 }
 0x4de   :  { %2512 = vmatpush3.msra.mxu0 %v2203_v24  ;;  %2547 = vmatpush3.msra.mxu1 %v2235_v31 }
 0x4df   :  { %2513 = vmatprep.subr.mxu0 %v2218_v26  ;;  %2548 = vmatprep.subr.mxu1 %v2250_v32 }
 0x4e0   :  { %2514 = vmatpush3.msra.mxu0 %v2202_v29  ;;  %2549 = vmatpush3.msra.mxu1 %v2234_v33 }
 0x4e1   :  { %2515 = vmatprep.subr.mxu0 %v2217_v30  ;;  %2550 = vmatprep.subr.mxu1 %v2249_v39 }
 0x4e2   :  { %2516 = vmatpush3.msra.mxu0 %v2201_v35  ;;  %2551 = vmatpush3.msra.mxu1 %v2233_v41 }
 0x4e3   :  { %2517 = vmatprep.subr.mxu0 %v2216_v36  ;;  %2552 = vmatprep.subr.mxu1 %v2248_v43 }
 0x4e4   :  { %2518 = vmatpush3.msra.mxu0 %v2200_v34  ;;  %2553 = vmatpush3.msra.mxu1 %v2232_v45 }
 0x4e5   :  { %2519 = vmatprep.subr.mxu0 %v2215_v40  ;;  %2554 = vmatprep.subr.mxu1 %v2247_v18 }
 0x4e6   :  { %2520 = vmatpush3.msra.mxu0 %v2199_v42  ;;  %2555 = vmatpush3.msra.mxu1 %v2231_v8 }
 0x4e7   :  { %2521 = vmatprep.subr.mxu0 %v2214_v44  ;;  %2556 = vmatprep.subr.mxu1 %v2246_v49 }
 0x4e8   :  { %2522 = vmatpush3.msra.mxu0 %v2198_v46  ;;  %2557 = vmatpush3.msra.mxu1 %v2230_v9 }
 0x4e9   :  { %2523 = vmatprep.subr.mxu0 %v2213_v51  ;;  %2558 = vmatprep.subr.mxu1 %v2245_v10 }
 0x4ea   :  { %2524 = vmatpush3.msra.mxu0 %v2197_v52  ;;  %2559 = vmatpush3.msra.mxu1 %v2229_v11 }
 0x4eb   :  { %2525 = vmatprep.subr.mxu0 %v2212_v53  ;;  %2560 = vmatprep.subr.mxu1 %v2244_v13 }
 0x4ec   :  { %2526 = vmatpush3.msra.mxu0 %v2196_v37  ;;  %2561 = vmatpush3.msra.mxu1 %v2228_v14 }
 0x508   :  { %v1836_v2 = vpop.f32.mrf.mxu0  ;;  %v1907_v3 = vpop.f32.mrf.mxu1 }
 0x509   :  { %v1837_v5 = vadd.f32 %v1836_v2, %v1766_v1 }
 0x50a   :  { %v1838_v6 = vpop.f32.mrf.mxu0  ;;  %v1909_v7 = vpop.f32.mrf.mxu1 }
 0x50b   :  { %v1839_v17 = vadd.f32 %v1838_v6, %v1768_v4  ;;  %v1908_v27 = vadd.f32 %v1907_v3, %v1837_v5 }
 0x50d   :  { %v1910_v50 = vadd.f32 %v1909_v7, %v1839_v17 }
 0x50f   :  { %2331 = vmatprep.mubr.f32.mxu0 %v1910_v50 }
 0x510   :  { %2332 = vmatmul.mubr.f32.vlgmr.msra.gmra.mxu0 %v1908_v27 }
 0x54a   :  { %v1978_v15 = vpop.f32.mrf.mxu0  ;;  %v2049_v19 = vpop.f32.mrf.mxu1 }
 0x54b   :  { %v1979_v21 = vadd.f32 %v1978_v15, %v1619_v16 }
 0x54c   :  { %v1980_v20 = vpop.f32.mrf.mxu0  ;;  %v2051_v47 = vpop.f32.mrf.mxu1 }
 0x54d   :  { %v1981_v22 = vadd.f32 %v1980_v20, %v1623_v0  ;;  %v2050_v48 = vadd.f32 %v2049_v19, %v1979_v21 }
 0x54f   :  { %v2052_v25 = vadd.f32 %v2051_v47, %v1981_v22 }
 0x58c   :  { %v2120_v23 = vpop.f32.mrf.mxu0  ;;  %v2191_v24 = vpop.f32.mrf.mxu1 }
 0x58d   :  { %v2121_v26 = vadd.f32 %v2120_v23, %v2050_v48 }
 0x58e   :  { %v2122_v28 = vpop.f32.mrf.mxu0  ;;  %v2193_v12 = vpop.f32.mrf.mxu1 }
 0x58f   :  { %v2123_v29 = vadd.f32 %v2122_v28, %v2052_v25  ;;  %v2192_v31 = vadd.f32 %v2191_v24, %v2121_v26 }
 0x591   :  { %v2194_v30 = vadd.f32 %v2193_v12, %v2123_v29 }
 0x593   :  { %2401 = vmatprep.mubr.f32.mxu1 %v2194_v30 }
 0x594   :  { %2402 = vmatmul.mubr.f32.vlgmr.msra.gmra.mxu1 %v2192_v31 }
 0x595   :  { %2942 = shalt.err (!%p2939_p13)
}
 0x596   :  { %2427 = dma.vmem_to_hbm [thread:$0]  %s2425_s12, 128, %s3314_s14, [#allocation25]  }
 0x597   :  { %s3031_s28 = smov [#allocation26]  }
 0x598   :  { %s2434_s0 = sshll.u32 %s3031_s28, 4  ;;  %s2435_s0 = int_to_ptr.vmem [resolvable:$true] %s2434_s0 }
 0x599   :  { %s2951_s19 = scalar_lea.vmem %s2435_s0, 128  ;;  %p2956_p1 = scmp.lt.s32.totalorder %s2435_s0, %s2435_s0 }
 0x59a   :  { %p2952_p0 = scmp.ne.s32.totalorder %s2435_s0, %s2951_s19  ;;  %p2957_p2 = scmp.lt.s32.totalorder %s2951_s19, %s2951_s19 }
 0x59c   :  { %p2958_p3 = por %p2957_p2, %p2956_p1 }
 0x59e   :  { %p2959_p4 = pnand %p2958_p3, %p2952_p0 }
 0x5a0   :  { %2962 = shalt.err (!%p2959_p4)
}
 0x5a1   :  { %2437 = dma.vmem_to_hbm [thread:$0]  %s2435_s0, 128, %s3315_s15, [#allocation25]   ;;  %v2460_v32 = vld [vmem:[#allocation22] ss:$0 sm:$0xff] }
 0x5a2   :  { %s3032_s14 = smov [#allocation23]  }
 0x5a3   :  { %s2414_s2 = sshll.u32 %s3032_s14, 4  ;;  %s2415_s2 = int_to_ptr.vmem [resolvable:$true] %s2414_s2 }
 0x5a4   :  { %s2971_s23 = scalar_lea.vmem %s2415_s2, 128  ;;  %p2976_p6 = scmp.lt.s32.totalorder %s2415_s2, %s2415_s2 }
 0x5a5   :  { %p2972_p5 = scmp.ne.s32.totalorder %s2415_s2, %s2971_s23  ;;  %p2977_p7 = scmp.lt.s32.totalorder %s2971_s23, %s2971_s23 }
 0x5a7   :  { %p2978_p8 = por %p2977_p7, %p2976_p6 }
 0x5a9   :  { %p2979_p9 = pnand %p2978_p8, %p2972_p5 }
 0x5d0   :  { %v2527_v54 = vpop.f32.mrf.mxu0 }
 0x5d2   :  { %v2528_v61 = vpop.f32.mrf.mxu0 }
 0x5d3   :  { %v2529_v35 = vadd.f32 %v2528_v61, %v2527_v54 }
 0x5d5   :  { %v2334_v34 = vadd.f32 %v2529_v35, %v2460_v32 }
 0x654   :  { %v2562_v36 = vpop.f32.mrf.mxu1 }
 0x656   :  { %v2563_v33 = vpop.f32.mrf.mxu1 }
 0x657   :  { %v2564_v39 = vadd.f32 %v2563_v33, %v2562_v36 }
 0x659   :  { %v2404_v40 = vadd.f32 %v2564_v39, %v2334_v34 }
 0x65b   :  { %2407 = vst [vmem:[#allocation23] sm:$0xff] %v2404_v40 }
 0x65c   :  { %2982 = shalt.err (!%p2979_p9)
}
 0x65d   :  { %2417 = dma.vmem_to_hbm [thread:$0]  %s2415_s2, 128, %s3313_s13, [#allocation4]  }
 0x65e   :  { %3005 = dma.done.wait [#allocation4], 128  }
 0x65f   :  { %3006 = vsyncadd [#allocation4], 4294967168 }
 0x660   :  { %3007 = dma.done.wait [#allocation25], 256  }
 0x661   :  { %3008 = vsyncadd [#allocation25], 4294967040 }
 0x662   :  { %2447 = vsyncpa [#allocation3], 1 }
 0x663   :  { %2448 = vsyncpa [#allocation6], 1 }
 0x664   :  { %2449 = vsyncpa [#allocation9], 1 }
 0x665   :  { %2450 = vsyncpa [#allocation12], 1 }
 0x666   :  { %2451 = vsyncpa [#allocation15], 1 }
 0x667   :  { %2452 = vsyncpa [#allocation18], 1 }
 0x668   :  { %2453 = vsyncpa [#allocation21], 1 }
 0x669   :  { %2454 = vsyncpa [#allocation4], 1 }
 0x66a   :  { %2455 = vsyncpa [#allocation25], 1 }

</bundles_post_ra>
